<compile_context>
chip_gen: v7x
topology: tpu7x:2x2x1
jax: 0.10.0
libtpu: 0.0.40
codegen_flags: <defaults>
</compile_context>

<pallas_src>
import jax
import jax.numpy as jnp
from jax.experimental import pallas as pl
from jax.experimental.pallas import tpu as pltpu

BOARD_SIZE = 22
CHANNEL1 = 5
CHANNEL2 = 16
CHANNEL3 = 32
KERNEL1 = 3
KERNEL2 = 5

CONV1_OUT = BOARD_SIZE - KERNEL1 + 1                    # 20
POOL1_OUT = CONV1_OUT // 2                              # 10
CONV2_OUT = POOL1_OUT - KERNEL2 + 1                     # 6
POOL2_OUT = CONV2_OUT // 2                              # 3
CONV2_ROWS = (CONV2_OUT - 1) * POOL1_OUT + CONV2_OUT    # 56 flat conv2-canvas rows
CV_ROWS = CONV2_ROWS + (KERNEL2 - 1) * POOL1_OUT        # 96 shifted-canvas rows
FLAT_SIZE = POOL2_OUT * POOL2_OUT * CHANNEL3            # 288


# ------------------------------ fused kernel -------------------------------

def _conv_qnet_kernel(x_ref, w1_ref, b1_ref, w2_ref, b2_ref,
                      wl1_ref, bl1_ref, wl2_ref, bl2_ref,
                      out_ref, p1_ref, cv_ref, a2_ref, flat_ref):
    batch = flat_ref.shape[0]
    n_pool = POOL1_OUT * POOL1_OUT          # 100 pooled pixels per sample
    n1 = batch * n_pool                     # rows per pool-corner block

    # ---- conv1 + pool#1: 4 fused-K dots (one per 2x2 pool corner, M=B*100),
    #      pooled with a pure VPU max of the aligned corner blocks.
    w1 = w1_ref[...]
    z = None
    for corner in range(4):
        d = jnp.dot(x_ref[pl.ds(corner * n1, n1), :], w1,
                    preferred_element_type=jnp.float32)
        z = d if z is None else jnp.maximum(z, d)
    # relu(x + b) is monotone in x, so bias + ReLU commute with the corner max.
    p1_ref[...] = jnp.maximum(z + b1_ref[...], 0.0)          # (B*100, 16)

    for b in range(batch):
        # ---- conv2 canvas: 5 lane-shifted copies of the pooled canvas so the
        #      5 kj taps collapse into the K dimension (K = 5*16 = 80).
        for kj in range(KERNEL2):
            cv_ref[:, kj * CHANNEL2:(kj + 1) * CHANNEL2] = (
                p1_ref[pl.ds(b * n_pool + kj, CV_ROWS), :])

        # ---- conv2 (5x5 valid) + ReLU: 5 K=80 dots (one per ki).
        acc = None
        for ki in range(KERNEL2):
            d = jnp.dot(cv_ref[pl.ds(ki * POOL1_OUT, CONV2_ROWS), :],
                        w2_ref[ki], preferred_element_type=jnp.float32)
            acc = d if acc is None else acc + d
        a2_ref[...] = jnp.maximum(acc + b2_ref[...], 0.0)     # (56, 32) flat canvas
        # (rows with x-wrap garbage are never read below)

        # ---- pool#2 + NCHW flatten: VPU max of 4 canvas rows per output pixel,
        #      lane-packed into the (B, 288) linear1 input.  The torch flatten
        #      order is folded into wl1's layout (row = p*32 + c).
        for p in range(POOL2_OUT * POOL2_OUT):
            qy, qx = p // POOL2_OUT, p % POOL2_OUT
            r = 2 * qy * POOL1_OUT + 2 * qx
            v = jnp.maximum(
                jnp.maximum(a2_ref[r:r + 1, :], a2_ref[r + 1:r + 2, :]),
                jnp.maximum(a2_ref[r + POOL1_OUT:r + POOL1_OUT + 1, :],
                            a2_ref[r + POOL1_OUT + 1:r + POOL1_OUT + 2, :]))
            flat_ref[b:b + 1, p * CHANNEL3:(p + 1) * CHANNEL3] = v

    # ---- linear1 + ReLU, linear2: single dots with M = batch.
    h = jnp.maximum(
        jnp.dot(flat_ref[...], wl1_ref[...], preferred_element_type=jnp.float32)
        + bl1_ref[...], 0.0)
    out = (jnp.dot(h, wl2_ref[...], preferred_element_type=jnp.float32)
           + bl2_ref[...])
    out_ref[...] = out.astype(out_ref.dtype)


# ------------------------------ host wrappers -------------------------------

def _im2col_conv1(x):
    """NCHW (B,5,22,22) -> conv1 im2col rows in pool-corner-major order.

    Row index = corner*(B*100) + b*100 + (py*10 + px) with corner = dy*2 + dx,
    column index = (ki*3 + kj)*5 + c.  Conv1 is then one K=45 matmul per
    corner block and 2x2 max-pool #1 is an elementwise max of the 4 blocks.
    Runs as plain XLA, fused with the transpose the wrapper needed anyway.
    """
    b = x.shape[0]
    taps = KERNEL1 * KERNEL1 * CHANNEL1
    xh = jnp.transpose(x, (0, 2, 3, 1))                          # (B,22,22,5)
    cols = jnp.concatenate(
        [xh[:, ki:ki + CONV1_OUT, kj:kj + CONV1_OUT, :]
         for ki in range(KERNEL1) for kj in range(KERNEL1)],
        axis=-1)                                                 # (B,20,20,45)
    cols = cols.reshape(b, POOL1_OUT, 2, POOL1_OUT, 2, taps)
    cols = jnp.transpose(cols, (2, 4, 0, 1, 3, 5))               # (dy,dx,B,py,px,f)
    return cols.reshape(4 * b * POOL1_OUT * POOL1_OUT, taps)


def prepare_params(params):
    """One-time re-layout of PyTorch-convention parameters into kernel layouts."""
    hidden = params["lin1_w"].shape[0]
    # conv1 as an im2col matrix: row = (ki*3+kj)*5 + c, col = out-channel.
    w1 = jnp.transpose(params["conv1_w"], (2, 3, 1, 0)).reshape(
        KERNEL1 * KERNEL1 * CHANNEL1, CHANNEL2)
    # conv2 grouped by ki with the 5 kj taps fused along K: (5, 80, 32).
    w2 = jnp.transpose(params["conv2_w"], (2, 3, 1, 0)).reshape(
        KERNEL2, KERNEL2 * CHANNEL2, CHANNEL3)
    # linear1 with torch's NCHW flatten (c*9 + p) re-ordered to the kernel's
    # lane packing (p*32 + c).
    l1 = jnp.transpose(
        params["lin1_w"].reshape(hidden, CHANNEL3, POOL2_OUT * POOL2_OUT),
        (2, 1, 0)).reshape(POOL2_OUT * POOL2_OUT * CHANNEL3, hidden)
    return {
        "w1col": w1,
        "b1": params["conv1_b"].reshape(1, CHANNEL2),
        "w2taps": w2,
        "b2": params["conv2_b"].reshape(1, CHANNEL3),
        "wl1": l1,
        "bl1": params["lin1_b"].reshape(1, hidden),
        "wl2": jnp.transpose(params["lin2_w"]),                  # (hidden, out)
        "bl2": params["lin2_b"].reshape(1, -1),
    }


def conv_qnet_forward(prepped, x):
    """x: (B,5,22,22) NCHW or unbatched (5,22,22) -> (B, out) / (out,)."""
    squeeze = x.ndim == 3
    if squeeze:
        x = x[None]
    batch = x.shape[0]
    xcol = _im2col_conv1(x)                                      # (4*B*100, 45)
    out_size = prepped["bl2"].shape[1]
    vmem = pl.BlockSpec(memory_space=pltpu.MemorySpace.VMEM)
    out = pl.pallas_call(
        _conv_qnet_kernel,
        out_shape=jax.ShapeDtypeStruct((batch, out_size), jnp.float32),
        in_specs=[vmem] * 9,
        out_specs=vmem,
        scratch_shapes=[
            pltpu.VMEM((batch * POOL1_OUT * POOL1_OUT, CHANNEL2), jnp.float32),
            pltpu.VMEM((CV_ROWS, KERNEL2 * CHANNEL2), jnp.float32),
            pltpu.VMEM((CONV2_ROWS, CHANNEL3), jnp.float32),
            pltpu.VMEM((batch, FLAT_SIZE), jnp.float32),
        ],
    )(xcol, prepped["w1col"], prepped["b1"],
      prepped["w2taps"], prepped["b2"],
      prepped["wl1"], prepped["bl1"], prepped["wl2"], prepped["bl2"])
    return out[0] if squeeze else out


# ------------------------- init + pure-JAX reference -------------------------

def init_params(key, hidden_size, output_size):
    """Deterministic init matching PyTorch default shapes (uniform +-1/sqrt(fan_in))."""
    def u(k, shape, fan_in):
        bound = 1.0 / (fan_in ** 0.5)
        return jax.random.uniform(k, shape, jnp.float32, -bound, bound)

    ks = jax.random.split(key, 8)
    return {
        "conv1_w": u(ks[0], (CHANNEL2, CHANNEL1, KERNEL1, KERNEL1), CHANNEL1 * KERNEL1 * KERNEL1),
        "conv1_b": u(ks[1], (CHANNEL2,), CHANNEL1 * KERNEL1 * KERNEL1),
        "conv2_w": u(ks[2], (CHANNEL3, CHANNEL2, KERNEL2, KERNEL2), CHANNEL2 * KERNEL2 * KERNEL2),
        "conv2_b": u(ks[3], (CHANNEL3,), CHANNEL2 * KERNEL2 * KERNEL2),
        "lin1_w": u(ks[4], (hidden_size, FLAT_SIZE), FLAT_SIZE),
        "lin1_b": u(ks[5], (hidden_size,), FLAT_SIZE),
        "lin2_w": u(ks[6], (output_size, hidden_size), hidden_size),
        "lin2_b": u(ks[7], (output_size,), hidden_size),
    }


def _reference_forward(params, x):
    """Plain-XLA reference matching the PyTorch forward (for validation)."""
    z = jax.lax.conv_general_dilated(
        x, params["conv1_w"], (1, 1), "VALID",
        dimension_numbers=("NCHW", "OIHW", "NCHW"))
    z = jnp.maximum(z + params["conv1_b"][None, :, None, None], 0.0)
    z = jax.lax.reduce_window(z, -jnp.inf, jax.lax.max,
                              (1, 1, 2, 2), (1, 1, 2, 2), "VALID")
    z = jax.lax.conv_general_dilated(
        z, params["conv2_w"], (1, 1), "VALID",
        dimension_numbers=("NCHW", "OIHW", "NCHW"))
    z = jnp.maximum(z + params["conv2_b"][None, :, None, None], 0.0)
    z = jax.lax.reduce_window(z, -jnp.inf, jax.lax.max,
                              (1, 1, 2, 2), (1, 1, 2, 2), "VALID")
    z = z.reshape(z.shape[0], -1)
    h = jnp.maximum(z @ params["lin1_w"].T + params["lin1_b"], 0.0)
    return h @ params["lin2_w"].T + params["lin2_b"]


if __name__ == "__main__":
    key = jax.random.PRNGKey(0)
    k_params, k_x = jax.random.split(key)

    batch, hidden_size, output_size = 2, 32, 3
    params = init_params(k_params, hidden_size, output_size)
    prepped = prepare_params(params)        # one-time weight re-layout
    x = jax.random.normal(k_x, (batch, CHANNEL1, BOARD_SIZE, BOARD_SIZE), jnp.float32)

    fwd = jax.jit(conv_qnet_forward)
    out = fwd(prepped, x)
    jax.block_until_ready(out)
    assert out.shape == (batch, output_size), out.shape

    ref = _reference_forward(params, x)
    assert jnp.allclose(out, ref, rtol=2e-2, atol=2e-2), (
        "max abs diff %g" % float(jnp.max(jnp.abs(out - ref))))
    print("KERNEL_OK")
</pallas_src>

<mosaic_0001>
module attributes {stable_mosaic.version = 11 : i64} {
  func.func @_conv_qnet_kernel(%arg0: memref<800x45xf32, #tpu.memory_space<vmem>>, %arg1: memref<45x16xf32, #tpu.memory_space<vmem>>, %arg2: memref<1x16xf32, #tpu.memory_space<vmem>>, %arg3: memref<5x80x32xf32, #tpu.memory_space<vmem>>, %arg4: memref<1x32xf32, #tpu.memory_space<vmem>>, %arg5: memref<288x32xf32, #tpu.memory_space<vmem>>, %arg6: memref<1x32xf32, #tpu.memory_space<vmem>>, %arg7: memref<32x3xf32, #tpu.memory_space<vmem>>, %arg8: memref<1x3xf32, #tpu.memory_space<vmem>>, %arg9: memref<2x3xf32, #tpu.memory_space<vmem>>, %arg10: memref<200x16xf32, #tpu.memory_space<vmem>>, %arg11: memref<96x80xf32, #tpu.memory_space<vmem>>, %arg12: memref<56x32xf32, #tpu.memory_space<vmem>>, %arg13: memref<2x288xf32, #tpu.memory_space<vmem>>) attributes {dimension_semantics = [], scalar_prefetch = 0 : i64, scratch_operands = 4 : i64, tpu.core_type = #tpu.core_type<tc>} {
    %c0 = arith.constant 0 : index
    %c0_0 = arith.constant 0 : index
    %0 = vector.load %arg1[%c0, %c0_0] : memref<45x16xf32, #tpu.memory_space<vmem>>, vector<45x16xf32>
    %c0_1 = arith.constant 0 : index
    %c0_2 = arith.constant 0 : index
    %1 = vector.load %arg0[%c0_1, %c0_2] : memref<800x45xf32, #tpu.memory_space<vmem>>, vector<200x45xf32>
    %cst = arith.constant dense<0.000000e+00> : vector<200x16xf32>
    %2 = tpu.matmul %1, %0, %cst {dimension_numbers = #tpu.dot_dimension_numbers<[1], [0], [0], [1], [0, 0, 1, 1], [], []>} : vector<200x45xf32>, vector<45x16xf32>, vector<200x16xf32> -> vector<200x16xf32>
    %c200 = arith.constant 200 : index
    %c0_3 = arith.constant 0 : index
    %3 = vector.load %arg0[%c200, %c0_3] : memref<800x45xf32, #tpu.memory_space<vmem>>, vector<200x45xf32>
    %cst_4 = arith.constant dense<0.000000e+00> : vector<200x16xf32>
    %4 = tpu.matmul %3, %0, %cst_4 {dimension_numbers = #tpu.dot_dimension_numbers<[1], [0], [0], [1], [0, 0, 1, 1], [], []>} : vector<200x45xf32>, vector<45x16xf32>, vector<200x16xf32> -> vector<200x16xf32>
    %5 = arith.maximumf %2, %4 : vector<200x16xf32>
    %c400 = arith.constant 400 : index
    %c0_5 = arith.constant 0 : index
    %6 = vector.load %arg0[%c400, %c0_5] : memref<800x45xf32, #tpu.memory_space<vmem>>, vector<200x45xf32>
    %cst_6 = arith.constant dense<0.000000e+00> : vector<200x16xf32>
    %7 = tpu.matmul %6, %0, %cst_6 {dimension_numbers = #tpu.dot_dimension_numbers<[1], [0], [0], [1], [0, 0, 1, 1], [], []>} : vector<200x45xf32>, vector<45x16xf32>, vector<200x16xf32> -> vector<200x16xf32>
    %8 = arith.maximumf %5, %7 : vector<200x16xf32>
    %c600 = arith.constant 600 : index
    %c0_7 = arith.constant 0 : index
    %9 = vector.load %arg0[%c600, %c0_7] : memref<800x45xf32, #tpu.memory_space<vmem>>, vector<200x45xf32>
    %cst_8 = arith.constant dense<0.000000e+00> : vector<200x16xf32>
    %10 = tpu.matmul %9, %0, %cst_8 {dimension_numbers = #tpu.dot_dimension_numbers<[1], [0], [0], [1], [0, 0, 1, 1], [], []>} : vector<200x45xf32>, vector<45x16xf32>, vector<200x16xf32> -> vector<200x16xf32>
    %11 = arith.maximumf %8, %10 : vector<200x16xf32>
    %c0_9 = arith.constant 0 : index
    %c0_10 = arith.constant 0 : index
    %12 = vector.load %arg2[%c0_9, %c0_10] : memref<1x16xf32, #tpu.memory_space<vmem>>, vector<1x16xf32>
    %13 = vector.broadcast %12 : vector<1x16xf32> to vector<200x16xf32>
    %14 = arith.addf %11, %13 : vector<200x16xf32>
    %cst_11 = arith.constant 0.000000e+00 : f32
    %15 = vector.broadcast %cst_11 : f32 to vector<200x16xf32>
    %16 = arith.maximumf %14, %15 : vector<200x16xf32>
    %c0_12 = arith.constant 0 : index
    %c0_13 = arith.constant 0 : index
    %17 = vector.load %arg10[%c0_12, %c0_13] : memref<200x16xf32, #tpu.memory_space<vmem>>, vector<200x16xf32>
    tpu.vector_store %arg10[%c0_12, %c0_13], %16 {strides = array<i32>} : memref<200x16xf32, #tpu.memory_space<vmem>>, vector<200x16xf32>,
    %c0_14 = arith.constant 0 : index
    %c0_15 = arith.constant 0 : index
    %18 = vector.load %arg10[%c0_14, %c0_15] : memref<200x16xf32, #tpu.memory_space<vmem>>, vector<96x16xf32>
    %c0_16 = arith.constant 0 : index
    %c0_17 = arith.constant 0 : index
    %19 = vector.load %arg11[%c0_16, %c0_17] : memref<96x80xf32, #tpu.memory_space<vmem>>, vector<96x16xf32>
    tpu.vector_store %arg11[%c0_16, %c0_17], %18 {strides = array<i32>} : memref<96x80xf32, #tpu.memory_space<vmem>>, vector<96x16xf32>,
    %c1 = arith.constant 1 : index
    %c0_18 = arith.constant 0 : index
    %20 = vector.load %arg10[%c1, %c0_18] : memref<200x16xf32, #tpu.memory_space<vmem>>, vector<96x16xf32>
    %c0_19 = arith.constant 0 : index
    %c16 = arith.constant 16 : index
    %21 = vector.load %arg11[%c0_19, %c16] : memref<96x80xf32, #tpu.memory_space<vmem>>, vector<96x16xf32>
    tpu.vector_store %arg11[%c0_19, %c16], %20 {strides = array<i32>} : memref<96x80xf32, #tpu.memory_space<vmem>>, vector<96x16xf32>,
    %c2 = arith.constant 2 : index
    %c0_20 = arith.constant 0 : index
    %22 = vector.load %arg10[%c2, %c0_20] : memref<200x16xf32, #tpu.memory_space<vmem>>, vector<96x16xf32>
    %c0_21 = arith.constant 0 : index
    %c32 = arith.constant 32 : index
    %23 = vector.load %arg11[%c0_21, %c32] : memref<96x80xf32, #tpu.memory_space<vmem>>, vector<96x16xf32>
    tpu.vector_store %arg11[%c0_21, %c32], %22 {strides = array<i32>} : memref<96x80xf32, #tpu.memory_space<vmem>>, vector<96x16xf32>,
    %c3 = arith.constant 3 : index
    %c0_22 = arith.constant 0 : index
    %24 = vector.load %arg10[%c3, %c0_22] : memref<200x16xf32, #tpu.memory_space<vmem>>, vector<96x16xf32>
    %c0_23 = arith.constant 0 : index
    %c48 = arith.constant 48 : index
    %25 = vector.load %arg11[%c0_23, %c48] : memref<96x80xf32, #tpu.memory_space<vmem>>, vector<96x16xf32>
    tpu.vector_store %arg11[%c0_23, %c48], %24 {strides = array<i32>} : memref<96x80xf32, #tpu.memory_space<vmem>>, vector<96x16xf32>,
    %c4 = arith.constant 4 : index
    %c0_24 = arith.constant 0 : index
    %26 = vector.load %arg10[%c4, %c0_24] : memref<200x16xf32, #tpu.memory_space<vmem>>, vector<96x16xf32>
    %c0_25 = arith.constant 0 : index
    %c64 = arith.constant 64 : index
    %27 = vector.load %arg11[%c0_25, %c64] : memref<96x80xf32, #tpu.memory_space<vmem>>, vector<96x16xf32>
    tpu.vector_store %arg11[%c0_25, %c64], %26 {strides = array<i32>} : memref<96x80xf32, #tpu.memory_space<vmem>>, vector<96x16xf32>,
    %c0_26 = arith.constant 0 : index
    %c0_27 = arith.constant 0 : index
    %28 = vector.load %arg11[%c0_26, %c0_27] : memref<96x80xf32, #tpu.memory_space<vmem>>, vector<56x80xf32>
    %c0_28 = arith.constant 0 : index
    %c0_29 = arith.constant 0 : index
    %c0_30 = arith.constant 0 : index
    %29 = vector.load %arg3[%c0_28, %c0_29, %c0_30] : memref<5x80x32xf32, #tpu.memory_space<vmem>>, vector<1x80x32xf32>
    %30 = vector.shape_cast %29 : vector<1x80x32xf32> to vector<80x32xf32>
    %cst_31 = arith.constant dense<0.000000e+00> : vector<56x32xf32>
    %31 = tpu.matmul %28, %30, %cst_31 {dimension_numbers = #tpu.dot_dimension_numbers<[1], [0], [0], [1], [0, 0, 1, 1], [], []>} : vector<56x80xf32>, vector<80x32xf32>, vector<56x32xf32> -> vector<56x32xf32>
    %c10 = arith.constant 10 : index
    %c0_32 = arith.constant 0 : index
    %32 = vector.load %arg11[%c10, %c0_32] : memref<96x80xf32, #tpu.memory_space<vmem>>, vector<56x80xf32>
    %c1_33 = arith.constant 1 : index
    %c0_34 = arith.constant 0 : index
    %c0_35 = arith.constant 0 : index
    %33 = vector.load %arg3[%c1_33, %c0_34, %c0_35] : memref<5x80x32xf32, #tpu.memory_space<vmem>>, vector<1x80x32xf32>
    %34 = vector.shape_cast %33 : vector<1x80x32xf32> to vector<80x32xf32>
    %cst_36 = arith.constant dense<0.000000e+00> : vector<56x32xf32>
    %35 = tpu.matmul %32, %34, %cst_36 {dimension_numbers = #tpu.dot_dimension_numbers<[1], [0], [0], [1], [0, 0, 1, 1], [], []>} : vector<56x80xf32>, vector<80x32xf32>, vector<56x32xf32> -> vector<56x32xf32>
    %36 = arith.addf %31, %35 : vector<56x32xf32>
    %c20 = arith.constant 20 : index
    %c0_37 = arith.constant 0 : index
    %37 = vector.load %arg11[%c20, %c0_37] : memref<96x80xf32, #tpu.memory_space<vmem>>, vector<56x80xf32>
    %c2_38 = arith.constant 2 : index
    %c0_39 = arith.constant 0 : index
    %c0_40 = arith.constant 0 : index
    %38 = vector.load %arg3[%c2_38, %c0_39, %c0_40] : memref<5x80x32xf32, #tpu.memory_space<vmem>>, vector<1x80x32xf32>
    %39 = vector.shape_cast %38 : vector<1x80x32xf32> to vector<80x32xf32>
    %cst_41 = arith.constant dense<0.000000e+00> : vector<56x32xf32>
    %40 = tpu.matmul %37, %39, %cst_41 {dimension_numbers = #tpu.dot_dimension_numbers<[1], [0], [0], [1], [0, 0, 1, 1], [], []>} : vector<56x80xf32>, vector<80x32xf32>, vector<56x32xf32> -> vector<56x32xf32>
    %41 = arith.addf %36, %40 : vector<56x32xf32>
    %c30 = arith.constant 30 : index
    %c0_42 = arith.constant 0 : index
    %42 = vector.load %arg11[%c30, %c0_42] : memref<96x80xf32, #tpu.memory_space<vmem>>, vector<56x80xf32>
    %c3_43 = arith.constant 3 : index
    %c0_44 = arith.constant 0 : index
    %c0_45 = arith.constant 0 : index
    %43 = vector.load %arg3[%c3_43, %c0_44, %c0_45] : memref<5x80x32xf32, #tpu.memory_space<vmem>>, vector<1x80x32xf32>
    %44 = vector.shape_cast %43 : vector<1x80x32xf32> to vector<80x32xf32>
    %cst_46 = arith.constant dense<0.000000e+00> : vector<56x32xf32>
    %45 = tpu.matmul %42, %44, %cst_46 {dimension_numbers = #tpu.dot_dimension_numbers<[1], [0], [0], [1], [0, 0, 1, 1], [], []>} : vector<56x80xf32>, vector<80x32xf32>, vector<56x32xf32> -> vector<56x32xf32>
    %46 = arith.addf %41, %45 : vector<56x32xf32>
    %c40 = arith.constant 40 : index
    %c0_47 = arith.constant 0 : index
    %47 = vector.load %arg11[%c40, %c0_47] : memref<96x80xf32, #tpu.memory_space<vmem>>, vector<56x80xf32>
    %c4_48 = arith.constant 4 : index
    %c0_49 = arith.constant 0 : index
    %c0_50 = arith.constant 0 : index
    %48 = vector.load %arg3[%c4_48, %c0_49, %c0_50] : memref<5x80x32xf32, #tpu.memory_space<vmem>>, vector<1x80x32xf32>
    %49 = vector.shape_cast %48 : vector<1x80x32xf32> to vector<80x32xf32>
    %cst_51 = arith.constant dense<0.000000e+00> : vector<56x32xf32>
    %50 = tpu.matmul %47, %49, %cst_51 {dimension_numbers = #tpu.dot_dimension_numbers<[1], [0], [0], [1], [0, 0, 1, 1], [], []>} : vector<56x80xf32>, vector<80x32xf32>, vector<56x32xf32> -> vector<56x32xf32>
    %51 = arith.addf %46, %50 : vector<56x32xf32>
    %c0_52 = arith.constant 0 : index
    %c0_53 = arith.constant 0 : index
    %52 = vector.load %arg4[%c0_52, %c0_53] : memref<1x32xf32, #tpu.memory_space<vmem>>, vector<1x32xf32>
    %53 = vector.broadcast %52 : vector<1x32xf32> to vector<56x32xf32>
    %54 = arith.addf %51, %53 : vector<56x32xf32>
    %cst_54 = arith.constant 0.000000e+00 : f32
    %55 = vector.broadcast %cst_54 : f32 to vector<56x32xf32>
    %56 = arith.maximumf %54, %55 : vector<56x32xf32>
    %c0_55 = arith.constant 0 : index
    %c0_56 = arith.constant 0 : index
    %57 = vector.load %arg12[%c0_55, %c0_56] : memref<56x32xf32, #tpu.memory_space<vmem>>, vector<56x32xf32>
    tpu.vector_store %arg12[%c0_55, %c0_56], %56 {strides = array<i32>} : memref<56x32xf32, #tpu.memory_space<vmem>>, vector<56x32xf32>,
    %c0_57 = arith.constant 0 : index
    %c0_58 = arith.constant 0 : index
    %58 = vector.load %arg12[%c0_57, %c0_58] : memref<56x32xf32, #tpu.memory_space<vmem>>, vector<1x32xf32>
    %c1_59 = arith.constant 1 : index
    %c0_60 = arith.constant 0 : index
    %59 = vector.load %arg12[%c1_59, %c0_60] : memref<56x32xf32, #tpu.memory_space<vmem>>, vector<1x32xf32>
    %60 = arith.maximumf %58, %59 : vector<1x32xf32>
    %c10_61 = arith.constant 10 : index
    %c0_62 = arith.constant 0 : index
    %61 = vector.load %arg12[%c10_61, %c0_62] : memref<56x32xf32, #tpu.memory_space<vmem>>, vector<1x32xf32>
    %c11 = arith.constant 11 : index
    %c0_63 = arith.constant 0 : index
    %62 = vector.load %arg12[%c11, %c0_63] : memref<56x32xf32, #tpu.memory_space<vmem>>, vector<1x32xf32>
    %63 = arith.maximumf %61, %62 : vector<1x32xf32>
    %64 = arith.maximumf %60, %63 : vector<1x32xf32>
    %c0_64 = arith.constant 0 : index
    %c0_65 = arith.constant 0 : index
    %65 = vector.load %arg13[%c0_64, %c0_65] : memref<2x288xf32, #tpu.memory_space<vmem>>, vector<1x32xf32>
    tpu.vector_store %arg13[%c0_64, %c0_65], %64 {strides = array<i32>} : memref<2x288xf32, #tpu.memory_space<vmem>>, vector<1x32xf32>,
    %c2_66 = arith.constant 2 : index
    %c0_67 = arith.constant 0 : index
    %66 = vector.load %arg12[%c2_66, %c0_67] : memref<56x32xf32, #tpu.memory_space<vmem>>, vector<1x32xf32>
    %c3_68 = arith.constant 3 : index
    %c0_69 = arith.constant 0 : index
    %67 = vector.load %arg12[%c3_68, %c0_69] : memref<56x32xf32, #tpu.memory_space<vmem>>, vector<1x32xf32>
    %68 = arith.maximumf %66, %67 : vector<1x32xf32>
    %c12 = arith.constant 12 : index
    %c0_70 = arith.constant 0 : index
    %69 = vector.load %arg12[%c12, %c0_70] : memref<56x32xf32, #tpu.memory_space<vmem>>, vector<1x32xf32>
    %c13 = arith.constant 13 : index
    %c0_71 = arith.constant 0 : index
    %70 = vector.load %arg12[%c13, %c0_71] : memref<56x32xf32, #tpu.memory_space<vmem>>, vector<1x32xf32>
    %71 = arith.maximumf %69, %70 : vector<1x32xf32>
    %72 = arith.maximumf %68, %71 : vector<1x32xf32>
    %c0_72 = arith.constant 0 : index
    %c32_73 = arith.constant 32 : index
    %73 = vector.load %arg13[%c0_72, %c32_73] : memref<2x288xf32, #tpu.memory_space<vmem>>, vector<1x32xf32>
    tpu.vector_store %arg13[%c0_72, %c32_73], %72 {strides = array<i32>} : memref<2x288xf32, #tpu.memory_space<vmem>>, vector<1x32xf32>,
    %c4_74 = arith.constant 4 : index
    %c0_75 = arith.constant 0 : index
    %74 = vector.load %arg12[%c4_74, %c0_75] : memref<56x32xf32, #tpu.memory_space<vmem>>, vector<1x32xf32>
    %c5 = arith.constant 5 : index
    %c0_76 = arith.constant 0 : index
    %75 = vector.load %arg12[%c5, %c0_76] : memref<56x32xf32, #tpu.memory_space<vmem>>, vector<1x32xf32>
    %76 = arith.maximumf %74, %75 : vector<1x32xf32>
    %c14 = arith.constant 14 : index
    %c0_77 = arith.constant 0 : index
    %77 = vector.load %arg12[%c14, %c0_77] : memref<56x32xf32, #tpu.memory_space<vmem>>, vector<1x32xf32>
    %c15 = arith.constant 15 : index
    %c0_78 = arith.constant 0 : index
    %78 = vector.load %arg12[%c15, %c0_78] : memref<56x32xf32, #tpu.memory_space<vmem>>, vector<1x32xf32>
    %79 = arith.maximumf %77, %78 : vector<1x32xf32>
    %80 = arith.maximumf %76, %79 : vector<1x32xf32>
    %c0_79 = arith.constant 0 : index
    %c64_80 = arith.constant 64 : index
    %81 = vector.load %arg13[%c0_79, %c64_80] : memref<2x288xf32, #tpu.memory_space<vmem>>, vector<1x32xf32>
    tpu.vector_store %arg13[%c0_79, %c64_80], %80 {strides = array<i32>} : memref<2x288xf32, #tpu.memory_space<vmem>>, vector<1x32xf32>,
    %c20_81 = arith.constant 20 : index
    %c0_82 = arith.constant 0 : index
    %82 = vector.load %arg12[%c20_81, %c0_82] : memref<56x32xf32, #tpu.memory_space<vmem>>, vector<1x32xf32>
    %c21 = arith.constant 21 : index
    %c0_83 = arith.constant 0 : index
    %83 = vector.load %arg12[%c21, %c0_83] : memref<56x32xf32, #tpu.memory_space<vmem>>, vector<1x32xf32>
    %84 = arith.maximumf %82, %83 : vector<1x32xf32>
    %c30_84 = arith.constant 30 : index
    %c0_85 = arith.constant 0 : index
    %85 = vector.load %arg12[%c30_84, %c0_85] : memref<56x32xf32, #tpu.memory_space<vmem>>, vector<1x32xf32>
    %c31 = arith.constant 31 : index
    %c0_86 = arith.constant 0 : index
    %86 = vector.load %arg12[%c31, %c0_86] : memref<56x32xf32, #tpu.memory_space<vmem>>, vector<1x32xf32>
    %87 = arith.maximumf %85, %86 : vector<1x32xf32>
    %88 = arith.maximumf %84, %87 : vector<1x32xf32>
    %c0_87 = arith.constant 0 : index
    %c96 = arith.constant 96 : index
    %89 = vector.load %arg13[%c0_87, %c96] : memref<2x288xf32, #tpu.memory_space<vmem>>, vector<1x32xf32>
    tpu.vector_store %arg13[%c0_87, %c96], %88 {strides = array<i32>} : memref<2x288xf32, #tpu.memory_space<vmem>>, vector<1x32xf32>,
    %c22 = arith.constant 22 : index
    %c0_88 = arith.constant 0 : index
    %90 = vector.load %arg12[%c22, %c0_88] : memref<56x32xf32, #tpu.memory_space<vmem>>, vector<1x32xf32>
    %c23 = arith.constant 23 : index
    %c0_89 = arith.constant 0 : index
    %91 = vector.load %arg12[%c23, %c0_89] : memref<56x32xf32, #tpu.memory_space<vmem>>, vector<1x32xf32>
    %92 = arith.maximumf %90, %91 : vector<1x32xf32>
    %c32_90 = arith.constant 32 : index
    %c0_91 = arith.constant 0 : index
    %93 = vector.load %arg12[%c32_90, %c0_91] : memref<56x32xf32, #tpu.memory_space<vmem>>, vector<1x32xf32>
    %c33 = arith.constant 33 : index
    %c0_92 = arith.constant 0 : index
    %94 = vector.load %arg12[%c33, %c0_92] : memref<56x32xf32, #tpu.memory_space<vmem>>, vector<1x32xf32>
    %95 = arith.maximumf %93, %94 : vector<1x32xf32>
    %96 = arith.maximumf %92, %95 : vector<1x32xf32>
    %c0_93 = arith.constant 0 : index
    %c128 = arith.constant 128 : index
    %97 = vector.load %arg13[%c0_93, %c128] : memref<2x288xf32, #tpu.memory_space<vmem>>, vector<1x32xf32>
    tpu.vector_store %arg13[%c0_93, %c128], %96 {strides = array<i32>} : memref<2x288xf32, #tpu.memory_space<vmem>>, vector<1x32xf32>,
    %c24 = arith.constant 24 : index
    %c0_94 = arith.constant 0 : index
    %98 = vector.load %arg12[%c24, %c0_94] : memref<56x32xf32, #tpu.memory_space<vmem>>, vector<1x32xf32>
    %c25 = arith.constant 25 : index
    %c0_95 = arith.constant 0 : index
    %99 = vector.load %arg12[%c25, %c0_95] : memref<56x32xf32, #tpu.memory_space<vmem>>, vector<1x32xf32>
    %100 = arith.maximumf %98, %99 : vector<1x32xf32>
    %c34 = arith.constant 34 : index
    %c0_96 = arith.constant 0 : index
    %101 = vector.load %arg12[%c34, %c0_96] : memref<56x32xf32, #tpu.memory_space<vmem>>, vector<1x32xf32>
    %c35 = arith.constant 35 : index
    %c0_97 = arith.constant 0 : index
    %102 = vector.load %arg12[%c35, %c0_97] : memref<56x32xf32, #tpu.memory_space<vmem>>, vector<1x32xf32>
    %103 = arith.maximumf %101, %102 : vector<1x32xf32>
    %104 = arith.maximumf %100, %103 : vector<1x32xf32>
    %c0_98 = arith.constant 0 : index
    %c160 = arith.constant 160 : index
    %105 = vector.load %arg13[%c0_98, %c160] : memref<2x288xf32, #tpu.memory_space<vmem>>, vector<1x32xf32>
    tpu.vector_store %arg13[%c0_98, %c160], %104 {strides = array<i32>} : memref<2x288xf32, #tpu.memory_space<vmem>>, vector<1x32xf32>,
    %c40_99 = arith.constant 40 : index
    %c0_100 = arith.constant 0 : index
    %106 = vector.load %arg12[%c40_99, %c0_100] : memref<56x32xf32, #tpu.memory_space<vmem>>, vector<1x32xf32>
    %c41 = arith.constant 41 : index
    %c0_101 = arith.constant 0 : index
    %107 = vector.load %arg12[%c41, %c0_101] : memref<56x32xf32, #tpu.memory_space<vmem>>, vector<1x32xf32>
    %108 = arith.maximumf %106, %107 : vector<1x32xf32>
    %c50 = arith.constant 50 : index
    %c0_102 = arith.constant 0 : index
    %109 = vector.load %arg12[%c50, %c0_102] : memref<56x32xf32, #tpu.memory_space<vmem>>, vector<1x32xf32>
    %c51 = arith.constant 51 : index
    %c0_103 = arith.constant 0 : index
    %110 = vector.load %arg12[%c51, %c0_103] : memref<56x32xf32, #tpu.memory_space<vmem>>, vector<1x32xf32>
    %111 = arith.maximumf %109, %110 : vector<1x32xf32>
    %112 = arith.maximumf %108, %111 : vector<1x32xf32>
    %c0_104 = arith.constant 0 : index
    %c192 = arith.constant 192 : index
    %113 = vector.load %arg13[%c0_104, %c192] : memref<2x288xf32, #tpu.memory_space<vmem>>, vector<1x32xf32>
    tpu.vector_store %arg13[%c0_104, %c192], %112 {strides = array<i32>} : memref<2x288xf32, #tpu.memory_space<vmem>>, vector<1x32xf32>,
    %c42 = arith.constant 42 : index
    %c0_105 = arith.constant 0 : index
    %114 = vector.load %arg12[%c42, %c0_105] : memref<56x32xf32, #tpu.memory_space<vmem>>, vector<1x32xf32>
    %c43 = arith.constant 43 : index
    %c0_106 = arith.constant 0 : index
    %115 = vector.load %arg12[%c43, %c0_106] : memref<56x32xf32, #tpu.memory_space<vmem>>, vector<1x32xf32>
    %116 = arith.maximumf %114, %115 : vector<1x32xf32>
    %c52 = arith.constant 52 : index
    %c0_107 = arith.constant 0 : index
    %117 = vector.load %arg12[%c52, %c0_107] : memref<56x32xf32, #tpu.memory_space<vmem>>, vector<1x32xf32>
    %c53 = arith.constant 53 : index
    %c0_108 = arith.constant 0 : index
    %118 = vector.load %arg12[%c53, %c0_108] : memref<56x32xf32, #tpu.memory_space<vmem>>, vector<1x32xf32>
    %119 = arith.maximumf %117, %118 : vector<1x32xf32>
    %120 = arith.maximumf %116, %119 : vector<1x32xf32>
    %c0_109 = arith.constant 0 : index
    %c224 = arith.constant 224 : index
    %121 = vector.load %arg13[%c0_109, %c224] : memref<2x288xf32, #tpu.memory_space<vmem>>, vector<1x32xf32>
    tpu.vector_store %arg13[%c0_109, %c224], %120 {strides = array<i32>} : memref<2x288xf32, #tpu.memory_space<vmem>>, vector<1x32xf32>,
    %c44 = arith.constant 44 : index
    %c0_110 = arith.constant 0 : index
    %122 = vector.load %arg12[%c44, %c0_110] : memref<56x32xf32, #tpu.memory_space<vmem>>, vector<1x32xf32>
    %c45 = arith.constant 45 : index
    %c0_111 = arith.constant 0 : index
    %123 = vector.load %arg12[%c45, %c0_111] : memref<56x32xf32, #tpu.memory_space<vmem>>, vector<1x32xf32>
    %124 = arith.maximumf %122, %123 : vector<1x32xf32>
    %c54 = arith.constant 54 : index
    %c0_112 = arith.constant 0 : index
    %125 = vector.load %arg12[%c54, %c0_112] : memref<56x32xf32, #tpu.memory_space<vmem>>, vector<1x32xf32>
    %c55 = arith.constant 55 : index
    %c0_113 = arith.constant 0 : index
    %126 = vector.load %arg12[%c55, %c0_113] : memref<56x32xf32, #tpu.memory_space<vmem>>, vector<1x32xf32>
    %127 = arith.maximumf %125, %126 : vector<1x32xf32>
    %128 = arith.maximumf %124, %127 : vector<1x32xf32>
    %c0_114 = arith.constant 0 : index
    %c256 = arith.constant 256 : index
    %129 = vector.load %arg13[%c0_114, %c256] : memref<2x288xf32, #tpu.memory_space<vmem>>, vector<1x32xf32>
    tpu.vector_store %arg13[%c0_114, %c256], %128 {strides = array<i32>} : memref<2x288xf32, #tpu.memory_space<vmem>>, vector<1x32xf32>,
    %c100 = arith.constant 100 : index
    %c0_115 = arith.constant 0 : index
    %130 = vector.load %arg10[%c100, %c0_115] : memref<200x16xf32, #tpu.memory_space<vmem>>, vector<96x16xf32>
    %c0_116 = arith.constant 0 : index
    %c0_117 = arith.constant 0 : index
    %131 = vector.load %arg11[%c0_116, %c0_117] : memref<96x80xf32, #tpu.memory_space<vmem>>, vector<96x16xf32>
    tpu.vector_store %arg11[%c0_116, %c0_117], %130 {strides = array<i32>} : memref<96x80xf32, #tpu.memory_space<vmem>>, vector<96x16xf32>,
    %c101 = arith.constant 101 : index
    %c0_118 = arith.constant 0 : index
    %132 = vector.load %arg10[%c101, %c0_118] : memref<200x16xf32, #tpu.memory_space<vmem>>, vector<96x16xf32>
    %c0_119 = arith.constant 0 : index
    %c16_120 = arith.constant 16 : index
    %133 = vector.load %arg11[%c0_119, %c16_120] : memref<96x80xf32, #tpu.memory_space<vmem>>, vector<96x16xf32>
    tpu.vector_store %arg11[%c0_119, %c16_120], %132 {strides = array<i32>} : memref<96x80xf32, #tpu.memory_space<vmem>>, vector<96x16xf32>,
    %c102 = arith.constant 102 : index
    %c0_121 = arith.constant 0 : index
    %134 = vector.load %arg10[%c102, %c0_121] : memref<200x16xf32, #tpu.memory_space<vmem>>, vector<96x16xf32>
    %c0_122 = arith.constant 0 : index
    %c32_123 = arith.constant 32 : index
    %135 = vector.load %arg11[%c0_122, %c32_123] : memref<96x80xf32, #tpu.memory_space<vmem>>, vector<96x16xf32>
    tpu.vector_store %arg11[%c0_122, %c32_123], %134 {strides = array<i32>} : memref<96x80xf32, #tpu.memory_space<vmem>>, vector<96x16xf32>,
    %c103 = arith.constant 103 : index
    %c0_124 = arith.constant 0 : index
    %136 = vector.load %arg10[%c103, %c0_124] : memref<200x16xf32, #tpu.memory_space<vmem>>, vector<96x16xf32>
    %c0_125 = arith.constant 0 : index
    %c48_126 = arith.constant 48 : index
    %137 = vector.load %arg11[%c0_125, %c48_126] : memref<96x80xf32, #tpu.memory_space<vmem>>, vector<96x16xf32>
    tpu.vector_store %arg11[%c0_125, %c48_126], %136 {strides = array<i32>} : memref<96x80xf32, #tpu.memory_space<vmem>>, vector<96x16xf32>,
    %c104 = arith.constant 104 : index
    %c0_127 = arith.constant 0 : index
    %138 = vector.load %arg10[%c104, %c0_127] : memref<200x16xf32, #tpu.memory_space<vmem>>, vector<96x16xf32>
    %c0_128 = arith.constant 0 : index
    %c64_129 = arith.constant 64 : index
    %139 = vector.load %arg11[%c0_128, %c64_129] : memref<96x80xf32, #tpu.memory_space<vmem>>, vector<96x16xf32>
    tpu.vector_store %arg11[%c0_128, %c64_129], %138 {strides = array<i32>} : memref<96x80xf32, #tpu.memory_space<vmem>>, vector<96x16xf32>,
    %c0_130 = arith.constant 0 : index
    %c0_131 = arith.constant 0 : index
    %140 = vector.load %arg11[%c0_130, %c0_131] : memref<96x80xf32, #tpu.memory_space<vmem>>, vector<56x80xf32>
    %c0_132 = arith.constant 0 : index
    %c0_133 = arith.constant 0 : index
    %c0_134 = arith.constant 0 : index
    %141 = vector.load %arg3[%c0_132, %c0_133, %c0_134] : memref<5x80x32xf32, #tpu.memory_space<vmem>>, vector<1x80x32xf32>
    %142 = vector.shape_cast %141 : vector<1x80x32xf32> to vector<80x32xf32>
    %cst_135 = arith.constant dense<0.000000e+00> : vector<56x32xf32>
    %143 = tpu.matmul %140, %142, %cst_135 {dimension_numbers = #tpu.dot_dimension_numbers<[1], [0], [0], [1], [0, 0, 1, 1], [], []>} : vector<56x80xf32>, vector<80x32xf32>, vector<56x32xf32> -> vector<56x32xf32>
    %c10_136 = arith.constant 10 : index
    %c0_137 = arith.constant 0 : index
    %144 = vector.load %arg11[%c10_136, %c0_137] : memref<96x80xf32, #tpu.memory_space<vmem>>, vector<56x80xf32>
    %c1_138 = arith.constant 1 : index
    %c0_139 = arith.constant 0 : index
    %c0_140 = arith.constant 0 : index
    %145 = vector.load %arg3[%c1_138, %c0_139, %c0_140] : memref<5x80x32xf32, #tpu.memory_space<vmem>>, vector<1x80x32xf32>
    %146 = vector.shape_cast %145 : vector<1x80x32xf32> to vector<80x32xf32>
    %cst_141 = arith.constant dense<0.000000e+00> : vector<56x32xf32>
    %147 = tpu.matmul %144, %146, %cst_141 {dimension_numbers = #tpu.dot_dimension_numbers<[1], [0], [0], [1], [0, 0, 1, 1], [], []>} : vector<56x80xf32>, vector<80x32xf32>, vector<56x32xf32> -> vector<56x32xf32>
    %148 = arith.addf %143, %147 : vector<56x32xf32>
    %c20_142 = arith.constant 20 : index
    %c0_143 = arith.constant 0 : index
    %149 = vector.load %arg11[%c20_142, %c0_143] : memref<96x80xf32, #tpu.memory_space<vmem>>, vector<56x80xf32>
    %c2_144 = arith.constant 2 : index
    %c0_145 = arith.constant 0 : index
    %c0_146 = arith.constant 0 : index
    %150 = vector.load %arg3[%c2_144, %c0_145, %c0_146] : memref<5x80x32xf32, #tpu.memory_space<vmem>>, vector<1x80x32xf32>
    %151 = vector.shape_cast %150 : vector<1x80x32xf32> to vector<80x32xf32>
    %cst_147 = arith.constant dense<0.000000e+00> : vector<56x32xf32>
    %152 = tpu.matmul %149, %151, %cst_147 {dimension_numbers = #tpu.dot_dimension_numbers<[1], [0], [0], [1], [0, 0, 1, 1], [], []>} : vector<56x80xf32>, vector<80x32xf32>, vector<56x32xf32> -> vector<56x32xf32>
    %153 = arith.addf %148, %152 : vector<56x32xf32>
    %c30_148 = arith.constant 30 : index
    %c0_149 = arith.constant 0 : index
    %154 = vector.load %arg11[%c30_148, %c0_149] : memref<96x80xf32, #tpu.memory_space<vmem>>, vector<56x80xf32>
    %c3_150 = arith.constant 3 : index
    %c0_151 = arith.constant 0 : index
    %c0_152 = arith.constant 0 : index
    %155 = vector.load %arg3[%c3_150, %c0_151, %c0_152] : memref<5x80x32xf32, #tpu.memory_space<vmem>>, vector<1x80x32xf32>
    %156 = vector.shape_cast %155 : vector<1x80x32xf32> to vector<80x32xf32>
    %cst_153 = arith.constant dense<0.000000e+00> : vector<56x32xf32>
    %157 = tpu.matmul %154, %156, %cst_153 {dimension_numbers = #tpu.dot_dimension_numbers<[1], [0], [0], [1], [0, 0, 1, 1], [], []>} : vector<56x80xf32>, vector<80x32xf32>, vector<56x32xf32> -> vector<56x32xf32>
    %158 = arith.addf %153, %157 : vector<56x32xf32>
    %c40_154 = arith.constant 40 : index
    %c0_155 = arith.constant 0 : index
    %159 = vector.load %arg11[%c40_154, %c0_155] : memref<96x80xf32, #tpu.memory_space<vmem>>, vector<56x80xf32>
    %c4_156 = arith.constant 4 : index
    %c0_157 = arith.constant 0 : index
    %c0_158 = arith.constant 0 : index
    %160 = vector.load %arg3[%c4_156, %c0_157, %c0_158] : memref<5x80x32xf32, #tpu.memory_space<vmem>>, vector<1x80x32xf32>
    %161 = vector.shape_cast %160 : vector<1x80x32xf32> to vector<80x32xf32>
    %cst_159 = arith.constant dense<0.000000e+00> : vector<56x32xf32>
    %162 = tpu.matmul %159, %161, %cst_159 {dimension_numbers = #tpu.dot_dimension_numbers<[1], [0], [0], [1], [0, 0, 1, 1], [], []>} : vector<56x80xf32>, vector<80x32xf32>, vector<56x32xf32> -> vector<56x32xf32>
    %163 = arith.addf %158, %162 : vector<56x32xf32>
    %c0_160 = arith.constant 0 : index
    %c0_161 = arith.constant 0 : index
    %164 = vector.load %arg4[%c0_160, %c0_161] : memref<1x32xf32, #tpu.memory_space<vmem>>, vector<1x32xf32>
    %165 = vector.broadcast %164 : vector<1x32xf32> to vector<56x32xf32>
    %166 = arith.addf %163, %165 : vector<56x32xf32>
    %cst_162 = arith.constant 0.000000e+00 : f32
    %167 = vector.broadcast %cst_162 : f32 to vector<56x32xf32>
    %168 = arith.maximumf %166, %167 : vector<56x32xf32>
    %c0_163 = arith.constant 0 : index
    %c0_164 = arith.constant 0 : index
    %169 = vector.load %arg12[%c0_163, %c0_164] : memref<56x32xf32, #tpu.memory_space<vmem>>, vector<56x32xf32>
    tpu.vector_store %arg12[%c0_163, %c0_164], %168 {strides = array<i32>} : memref<56x32xf32, #tpu.memory_space<vmem>>, vector<56x32xf32>,
    %c0_165 = arith.constant 0 : index
    %c0_166 = arith.constant 0 : index
    %170 = vector.load %arg12[%c0_165, %c0_166] : memref<56x32xf32, #tpu.memory_space<vmem>>, vector<1x32xf32>
    %c1_167 = arith.constant 1 : index
    %c0_168 = arith.constant 0 : index
    %171 = vector.load %arg12[%c1_167, %c0_168] : memref<56x32xf32, #tpu.memory_space<vmem>>, vector<1x32xf32>
    %172 = arith.maximumf %170, %171 : vector<1x32xf32>
    %c10_169 = arith.constant 10 : index
    %c0_170 = arith.constant 0 : index
    %173 = vector.load %arg12[%c10_169, %c0_170] : memref<56x32xf32, #tpu.memory_space<vmem>>, vector<1x32xf32>
    %c11_171 = arith.constant 11 : index
    %c0_172 = arith.constant 0 : index
    %174 = vector.load %arg12[%c11_171, %c0_172] : memref<56x32xf32, #tpu.memory_space<vmem>>, vector<1x32xf32>
    %175 = arith.maximumf %173, %174 : vector<1x32xf32>
    %176 = arith.maximumf %172, %175 : vector<1x32xf32>
    %c1_173 = arith.constant 1 : index
    %c0_174 = arith.constant 0 : index
    %177 = vector.load %arg13[%c1_173, %c0_174] : memref<2x288xf32, #tpu.memory_space<vmem>>, vector<1x32xf32>
    tpu.vector_store %arg13[%c1_173, %c0_174], %176 {strides = array<i32>} : memref<2x288xf32, #tpu.memory_space<vmem>>, vector<1x32xf32>,
    %c2_175 = arith.constant 2 : index
    %c0_176 = arith.constant 0 : index
    %178 = vector.load %arg12[%c2_175, %c0_176] : memref<56x32xf32, #tpu.memory_space<vmem>>, vector<1x32xf32>
    %c3_177 = arith.constant 3 : index
    %c0_178 = arith.constant 0 : index
    %179 = vector.load %arg12[%c3_177, %c0_178] : memref<56x32xf32, #tpu.memory_space<vmem>>, vector<1x32xf32>
    %180 = arith.maximumf %178, %179 : vector<1x32xf32>
    %c12_179 = arith.constant 12 : index
    %c0_180 = arith.constant 0 : index
    %181 = vector.load %arg12[%c12_179, %c0_180] : memref<56x32xf32, #tpu.memory_space<vmem>>, vector<1x32xf32>
    %c13_181 = arith.constant 13 : index
    %c0_182 = arith.constant 0 : index
    %182 = vector.load %arg12[%c13_181, %c0_182] : memref<56x32xf32, #tpu.memory_space<vmem>>, vector<1x32xf32>
    %183 = arith.maximumf %181, %182 : vector<1x32xf32>
    %184 = arith.maximumf %180, %183 : vector<1x32xf32>
    %c1_183 = arith.constant 1 : index
    %c32_184 = arith.constant 32 : index
    %185 = vector.load %arg13[%c1_183, %c32_184] : memref<2x288xf32, #tpu.memory_space<vmem>>, vector<1x32xf32>
    tpu.vector_store %arg13[%c1_183, %c32_184], %184 {strides = array<i32>} : memref<2x288xf32, #tpu.memory_space<vmem>>, vector<1x32xf32>,
    %c4_185 = arith.constant 4 : index
    %c0_186 = arith.constant 0 : index
    %186 = vector.load %arg12[%c4_185, %c0_186] : memref<56x32xf32, #tpu.memory_space<vmem>>, vector<1x32xf32>
    %c5_187 = arith.constant 5 : index
    %c0_188 = arith.constant 0 : index
    %187 = vector.load %arg12[%c5_187, %c0_188] : memref<56x32xf32, #tpu.memory_space<vmem>>, vector<1x32xf32>
    %188 = arith.maximumf %186, %187 : vector<1x32xf32>
    %c14_189 = arith.constant 14 : index
    %c0_190 = arith.constant 0 : index
    %189 = vector.load %arg12[%c14_189, %c0_190] : memref<56x32xf32, #tpu.memory_space<vmem>>, vector<1x32xf32>
    %c15_191 = arith.constant 15 : index
    %c0_192 = arith.constant 0 : index
    %190 = vector.load %arg12[%c15_191, %c0_192] : memref<56x32xf32, #tpu.memory_space<vmem>>, vector<1x32xf32>
    %191 = arith.maximumf %189, %190 : vector<1x32xf32>
    %192 = arith.maximumf %188, %191 : vector<1x32xf32>
    %c1_193 = arith.constant 1 : index
    %c64_194 = arith.constant 64 : index
    %193 = vector.load %arg13[%c1_193, %c64_194] : memref<2x288xf32, #tpu.memory_space<vmem>>, vector<1x32xf32>
    tpu.vector_store %arg13[%c1_193, %c64_194], %192 {strides = array<i32>} : memref<2x288xf32, #tpu.memory_space<vmem>>, vector<1x32xf32>,
    %c20_195 = arith.constant 20 : index
    %c0_196 = arith.constant 0 : index
    %194 = vector.load %arg12[%c20_195, %c0_196] : memref<56x32xf32, #tpu.memory_space<vmem>>, vector<1x32xf32>
    %c21_197 = arith.constant 21 : index
    %c0_198 = arith.constant 0 : index
    %195 = vector.load %arg12[%c21_197, %c0_198] : memref<56x32xf32, #tpu.memory_space<vmem>>, vector<1x32xf32>
    %196 = arith.maximumf %194, %195 : vector<1x32xf32>
    %c30_199 = arith.constant 30 : index
    %c0_200 = arith.constant 0 : index
    %197 = vector.load %arg12[%c30_199, %c0_200] : memref<56x32xf32, #tpu.memory_space<vmem>>, vector<1x32xf32>
    %c31_201 = arith.constant 31 : index
    %c0_202 = arith.constant 0 : index
    %198 = vector.load %arg12[%c31_201, %c0_202] : memref<56x32xf32, #tpu.memory_space<vmem>>, vector<1x32xf32>
    %199 = arith.maximumf %197, %198 : vector<1x32xf32>
    %200 = arith.maximumf %196, %199 : vector<1x32xf32>
    %c1_203 = arith.constant 1 : index
    %c96_204 = arith.constant 96 : index
    %201 = vector.load %arg13[%c1_203, %c96_204] : memref<2x288xf32, #tpu.memory_space<vmem>>, vector<1x32xf32>
    tpu.vector_store %arg13[%c1_203, %c96_204], %200 {strides = array<i32>} : memref<2x288xf32, #tpu.memory_space<vmem>>, vector<1x32xf32>,
    %c22_205 = arith.constant 22 : index
    %c0_206 = arith.constant 0 : index
    %202 = vector.load %arg12[%c22_205, %c0_206] : memref<56x32xf32, #tpu.memory_space<vmem>>, vector<1x32xf32>
    %c23_207 = arith.constant 23 : index
    %c0_208 = arith.constant 0 : index
    %203 = vector.load %arg12[%c23_207, %c0_208] : memref<56x32xf32, #tpu.memory_space<vmem>>, vector<1x32xf32>
    %204 = arith.maximumf %202, %203 : vector<1x32xf32>
    %c32_209 = arith.constant 32 : index
    %c0_210 = arith.constant 0 : index
    %205 = vector.load %arg12[%c32_209, %c0_210] : memref<56x32xf32, #tpu.memory_space<vmem>>, vector<1x32xf32>
    %c33_211 = arith.constant 33 : index
    %c0_212 = arith.constant 0 : index
    %206 = vector.load %arg12[%c33_211, %c0_212] : memref<56x32xf32, #tpu.memory_space<vmem>>, vector<1x32xf32>
    %207 = arith.maximumf %205, %206 : vector<1x32xf32>
    %208 = arith.maximumf %204, %207 : vector<1x32xf32>
    %c1_213 = arith.constant 1 : index
    %c128_214 = arith.constant 128 : index
    %209 = vector.load %arg13[%c1_213, %c128_214] : memref<2x288xf32, #tpu.memory_space<vmem>>, vector<1x32xf32>
    tpu.vector_store %arg13[%c1_213, %c128_214], %208 {strides = array<i32>} : memref<2x288xf32, #tpu.memory_space<vmem>>, vector<1x32xf32>,
    %c24_215 = arith.constant 24 : index
    %c0_216 = arith.constant 0 : index
    %210 = vector.load %arg12[%c24_215, %c0_216] : memref<56x32xf32, #tpu.memory_space<vmem>>, vector<1x32xf32>
    %c25_217 = arith.constant 25 : index
    %c0_218 = arith.constant 0 : index
    %211 = vector.load %arg12[%c25_217, %c0_218] : memref<56x32xf32, #tpu.memory_space<vmem>>, vector<1x32xf32>
    %212 = arith.maximumf %210, %211 : vector<1x32xf32>
    %c34_219 = arith.constant 34 : index
    %c0_220 = arith.constant 0 : index
    %213 = vector.load %arg12[%c34_219, %c0_220] : memref<56x32xf32, #tpu.memory_space<vmem>>, vector<1x32xf32>
    %c35_221 = arith.constant 35 : index
    %c0_222 = arith.constant 0 : index
    %214 = vector.load %arg12[%c35_221, %c0_222] : memref<56x32xf32, #tpu.memory_space<vmem>>, vector<1x32xf32>
    %215 = arith.maximumf %213, %214 : vector<1x32xf32>
    %216 = arith.maximumf %212, %215 : vector<1x32xf32>
    %c1_223 = arith.constant 1 : index
    %c160_224 = arith.constant 160 : index
    %217 = vector.load %arg13[%c1_223, %c160_224] : memref<2x288xf32, #tpu.memory_space<vmem>>, vector<1x32xf32>
    tpu.vector_store %arg13[%c1_223, %c160_224], %216 {strides = array<i32>} : memref<2x288xf32, #tpu.memory_space<vmem>>, vector<1x32xf32>,
    %c40_225 = arith.constant 40 : index
    %c0_226 = arith.constant 0 : index
    %218 = vector.load %arg12[%c40_225, %c0_226] : memref<56x32xf32, #tpu.memory_space<vmem>>, vector<1x32xf32>
    %c41_227 = arith.constant 41 : index
    %c0_228 = arith.constant 0 : index
    %219 = vector.load %arg12[%c41_227, %c0_228] : memref<56x32xf32, #tpu.memory_space<vmem>>, vector<1x32xf32>
    %220 = arith.maximumf %218, %219 : vector<1x32xf32>
    %c50_229 = arith.constant 50 : index
    %c0_230 = arith.constant 0 : index
    %221 = vector.load %arg12[%c50_229, %c0_230] : memref<56x32xf32, #tpu.memory_space<vmem>>, vector<1x32xf32>
    %c51_231 = arith.constant 51 : index
    %c0_232 = arith.constant 0 : index
    %222 = vector.load %arg12[%c51_231, %c0_232] : memref<56x32xf32, #tpu.memory_space<vmem>>, vector<1x32xf32>
    %223 = arith.maximumf %221, %222 : vector<1x32xf32>
    %224 = arith.maximumf %220, %223 : vector<1x32xf32>
    %c1_233 = arith.constant 1 : index
    %c192_234 = arith.constant 192 : index
    %225 = vector.load %arg13[%c1_233, %c192_234] : memref<2x288xf32, #tpu.memory_space<vmem>>, vector<1x32xf32>
    tpu.vector_store %arg13[%c1_233, %c192_234], %224 {strides = array<i32>} : memref<2x288xf32, #tpu.memory_space<vmem>>, vector<1x32xf32>,
    %c42_235 = arith.constant 42 : index
    %c0_236 = arith.constant 0 : index
    %226 = vector.load %arg12[%c42_235, %c0_236] : memref<56x32xf32, #tpu.memory_space<vmem>>, vector<1x32xf32>
    %c43_237 = arith.constant 43 : index
    %c0_238 = arith.constant 0 : index
    %227 = vector.load %arg12[%c43_237, %c0_238] : memref<56x32xf32, #tpu.memory_space<vmem>>, vector<1x32xf32>
    %228 = arith.maximumf %226, %227 : vector<1x32xf32>
    %c52_239 = arith.constant 52 : index
    %c0_240 = arith.constant 0 : index
    %229 = vector.load %arg12[%c52_239, %c0_240] : memref<56x32xf32, #tpu.memory_space<vmem>>, vector<1x32xf32>
    %c53_241 = arith.constant 53 : index
    %c0_242 = arith.constant 0 : index
    %230 = vector.load %arg12[%c53_241, %c0_242] : memref<56x32xf32, #tpu.memory_space<vmem>>, vector<1x32xf32>
    %231 = arith.maximumf %229, %230 : vector<1x32xf32>
    %232 = arith.maximumf %228, %231 : vector<1x32xf32>
    %c1_243 = arith.constant 1 : index
    %c224_244 = arith.constant 224 : index
    %233 = vector.load %arg13[%c1_243, %c224_244] : memref<2x288xf32, #tpu.memory_space<vmem>>, vector<1x32xf32>
    tpu.vector_store %arg13[%c1_243, %c224_244], %232 {strides = array<i32>} : memref<2x288xf32, #tpu.memory_space<vmem>>, vector<1x32xf32>,
    %c44_245 = arith.constant 44 : index
    %c0_246 = arith.constant 0 : index
    %234 = vector.load %arg12[%c44_245, %c0_246] : memref<56x32xf32, #tpu.memory_space<vmem>>, vector<1x32xf32>
    %c45_247 = arith.constant 45 : index
    %c0_248 = arith.constant 0 : index
    %235 = vector.load %arg12[%c45_247, %c0_248] : memref<56x32xf32, #tpu.memory_space<vmem>>, vector<1x32xf32>
    %236 = arith.maximumf %234, %235 : vector<1x32xf32>
    %c54_249 = arith.constant 54 : index
    %c0_250 = arith.constant 0 : index
    %237 = vector.load %arg12[%c54_249, %c0_250] : memref<56x32xf32, #tpu.memory_space<vmem>>, vector<1x32xf32>
    %c55_251 = arith.constant 55 : index
    %c0_252 = arith.constant 0 : index
    %238 = vector.load %arg12[%c55_251, %c0_252] : memref<56x32xf32, #tpu.memory_space<vmem>>, vector<1x32xf32>
    %239 = arith.maximumf %237, %238 : vector<1x32xf32>
    %240 = arith.maximumf %236, %239 : vector<1x32xf32>
    %c1_253 = arith.constant 1 : index
    %c256_254 = arith.constant 256 : index
    %241 = vector.load %arg13[%c1_253, %c256_254] : memref<2x288xf32, #tpu.memory_space<vmem>>, vector<1x32xf32>
    tpu.vector_store %arg13[%c1_253, %c256_254], %240 {strides = array<i32>} : memref<2x288xf32, #tpu.memory_space<vmem>>, vector<1x32xf32>,
    %c0_255 = arith.constant 0 : index
    %c0_256 = arith.constant 0 : index
    %242 = vector.load %arg13[%c0_255, %c0_256] : memref<2x288xf32, #tpu.memory_space<vmem>>, vector<2x288xf32>
    %c0_257 = arith.constant 0 : index
    %c0_258 = arith.constant 0 : index
    %243 = vector.load %arg5[%c0_257, %c0_258] : memref<288x32xf32, #tpu.memory_space<vmem>>, vector<288x32xf32>
    %cst_259 = arith.constant dense<0.000000e+00> : vector<2x32xf32>
    %244 = tpu.matmul %242, %243, %cst_259 {dimension_numbers = #tpu.dot_dimension_numbers<[1], [0], [0], [1], [0, 0, 1, 1], [], []>} : vector<2x288xf32>, vector<288x32xf32>, vector<2x32xf32> -> vector<2x32xf32>
    %c0_260 = arith.constant 0 : index
    %c0_261 = arith.constant 0 : index
    %245 = vector.load %arg6[%c0_260, %c0_261] : memref<1x32xf32, #tpu.memory_space<vmem>>, vector<1x32xf32>
    %246 = vector.broadcast %245 : vector<1x32xf32> to vector<2x32xf32>
    %247 = arith.addf %244, %246 : vector<2x32xf32>
    %cst_262 = arith.constant 0.000000e+00 : f32
    %248 = vector.broadcast %cst_262 : f32 to vector<2x32xf32>
    %249 = arith.maximumf %247, %248 : vector<2x32xf32>
    %c0_263 = arith.constant 0 : index
    %c0_264 = arith.constant 0 : index
    %250 = vector.load %arg7[%c0_263, %c0_264] : memref<32x3xf32, #tpu.memory_space<vmem>>, vector<32x3xf32>
    %cst_265 = arith.constant dense<0.000000e+00> : vector<2x3xf32>
    %251 = tpu.matmul %249, %250, %cst_265 {dimension_numbers = #tpu.dot_dimension_numbers<[1], [0], [0], [1], [0, 0, 1, 1], [], []>} : vector<2x32xf32>, vector<32x3xf32>, vector<2x3xf32> -> vector<2x3xf32>
    %c0_266 = arith.constant 0 : index
    %c0_267 = arith.constant 0 : index
    %252 = vector.load %arg8[%c0_266, %c0_267] : memref<1x3xf32, #tpu.memory_space<vmem>>, vector<1x3xf32>
    %253 = vector.broadcast %252 : vector<1x3xf32> to vector<2x3xf32>
    %254 = arith.addf %251, %253 : vector<2x3xf32>
    %c0_268 = arith.constant 0 : index
    %c0_269 = arith.constant 0 : index
    %255 = vector.load %arg9[%c0_268, %c0_269] : memref<2x3xf32, #tpu.memory_space<vmem>>, vector<2x3xf32>
    tpu.vector_store %arg9[%c0_268, %c0_269], %254 {strides = array<i32>} : memref<2x3xf32, #tpu.memory_space<vmem>>, vector<2x3xf32>,
    return
  }
}

</mosaic_0001>

<bundles_post_ra>
// kernel: conv_qnet_forward.1
= control target key start
LH: loop header
LB: loop body
LE: loop exit
PB: predicated region body
PF: predicated region fallthrough
CT: control target
= control target key end

     0   :  { %v7730_v3 = vmov 0.0|0.0   ;;  %vm5711_vm0 = vmmov 0   ;;  %v7728_v6 = vmov 0.0   ;;  %vm140_vm1 = vcmask 1044480   ;;  %s7718_s0 = inlined_call_operand.vmem [shape: f32[800,45], index: 0, kind: input, shape index: {}]   ;;  %s7719_s1 = inlined_call_operand.vmem [shape: f32[45,16], index: 1, kind: input, shape index: {}]   ;;  %s7720_s2 = inlined_call_operand.vmem [shape: f32[1,16], index: 2, kind: input, shape index: {}]   ;;  %s7721_s3 = inlined_call_operand.vmem [shape: f32[5,80,32], index: 3, kind: input, shape index: {}]   ;;  %s7722_s4 = inlined_call_operand.vmem [shape: f32[1,32], index: 4, kind: input, shape index: {}]   ;;  %s7723_s5 = inlined_call_operand.vmem [shape: f32[288,32], index: 5, kind: input, shape index: {}]   ;;  %s7724_s6 = inlined_call_operand.vmem [shape: f32[1,32], index: 6, kind: input, shape index: {}]   ;;  %s7725_s7 = inlined_call_operand.vmem [shape: f32[32,3], index: 7, kind: input, shape index: {}]   ;;  %s7726_s8 = inlined_call_operand.vmem [shape: f32[1,3], index: 8, kind: input, shape index: {}]   ;;  %s7727_s9 = inlined_call_operand.hbm [shape: f32[2,3], index: 9, kind: output, shape index: {}]  }
   0x1   :  { %v33_v0 = vld [vmem:[%s7719_s1] sm:$0xff]  ;;  %v34_v1 = vld [vmem:[%s7719_s1 + $0x8] sm:$0xff]  ;;  %v35_v2 = vld [vmem:[%s7719_s1 + $0x10] sm:$0xff]  ;;  %5440 = vmatprep.subr.bf16.mxu0 %v7730_v3  ;;  %5450 = vmatprep.subr.bf16.mxu1 %v7730_v3  ;;  %vm5713_vm2 = vmmov 1   ;;  %vm64_vm4 = vcmask 367616  }
   0x2   :  { %v5441_v4 = vpack.c.bf16 %v34_v1, %v33_v0  ;;  %v36_v5 = vld [vmem:[%s7719_s1 + $0x18] sm:$0xff]  ;;  %4672 = vmatprep.mubr.msk.f32.mxu0 %vm5711_vm0, %v7728_v6  ;;  %4759 = vmatprep.mubr.msk.f32.mxu1 %vm5711_vm0, %v7728_v6  ;;  %v37_v8 = vld [vmem:[%s7719_s1 + $0x20] sm:$0xff]  ;;  %v38_v9 = vld [vmem:[%s7719_s1 + $0x28] sm:$0x1f] }
   0x3   :  { %v5444_v7 = vpack.c.bf16 %v36_v5, %v35_v2  ;;  %v5447_v10 = vpack.c.bf16 %v38_v9, %v37_v8  ;;  %vm5798_vm3 = vmpackc.low %vm140_vm1, %vm5713_vm2  ;;  %v39_v12 = vld [vmem:[%s7718_s0] sm:$0xff]  ;;  %v334_v13 = vld [vmem:[%s7718_s0 + $0xc8] sm:$0xff] }
   0x4   :  { %5442 = vmatpush3.bf16.msra.mxu0 %v5441_v4  ;;  %5452 = vmatpush3.bf16.msra.mxu1 %v5441_v4  ;;  %v40_v14 = vld [vmem:[%s7718_s0 + $0x8] sm:$0xff]  ;;  %v335_v15 = vld [vmem:[%s7718_s0 + $0xd0] sm:$0xff]  ;;  %v336_v17 = vld [vmem:[%s7718_s0 + $0xd8] sm:$0xff] }
   0x5   :  { %5443 = vmatprep.subr.bf16.mxu0 %v7730_v3  ;;  %5453 = vmatprep.subr.bf16.mxu1 %v7730_v3  ;;  %v41_v16 = vld [vmem:[%s7718_s0 + $0x10] sm:$0xff]  ;;  %v42_v18 = vld [vmem:[%s7718_s0 + $0x18] sm:$0xff]  ;;  %v337_v19 = vld [vmem:[%s7718_s0 + $0xe0] sm:$0xff] }
   0x8   :  { %5445 = vmatpush3.bf16.msra.mxu0 %v5444_v7  ;;  %5455 = vmatpush3.bf16.msra.mxu1 %v5444_v7 }
   0x9   :  { %5446 = vmatprep.subr.bf16.mxu0 %v7730_v3  ;;  %5456 = vmatprep.subr.bf16.mxu1 %v7730_v3 }
   0xc   :  { %5449 = vmatpush3.bf16.msk.msra.mxu0 %vm5798_vm3, %v5447_v10  ;;  %5459 = vmatpush3.bf16.msk.msra.mxu1 %vm5798_vm3, %v5447_v10 }
   0xd   :  { %5460 = vmatprep.subr.bf16.mxu0 %v7730_v3  ;;  %5470 = vmatprep.subr.bf16.mxu1 %v7730_v3 }
   0xf   :  { %4673 = vmatmul.mubr.msk.f32.vlgmr.msra.gmra.mrb[0].mxu0 %vm64_vm4, %v39_v12  ;;  %4760 = vmatmul.mubr.msk.f32.vlgmr.msra.gmra.mrb[0].mxu1 %vm64_vm4, %v334_v13 }
  0x10   :  { %5462 = vmatpush3.bf16.msra.mxu0 %v5441_v4  ;;  %4675 = vmatprep.mubr.msk.f32.mxu0 %vm5711_vm0, %v7728_v6 }
  0x11   :  { %5472 = vmatpush3.bf16.msra.mxu1 %v5441_v4  ;;  %4762 = vmatprep.mubr.msk.f32.mxu1 %vm5711_vm0, %v7728_v6 }
  0x12   :  { %5463 = vmatprep.subr.bf16.mxu0 %v7730_v3  ;;  %5473 = vmatprep.subr.bf16.mxu1 %v7730_v3 }
  0x13   :  { %4676 = vmatmul.mubr.msk.f32.gmra.mrb[2].mxu0 %vm64_vm4, %v40_v14  ;;  %4763 = vmatmul.mubr.msk.f32.gmra.mrb[2].mxu1 %vm64_vm4, %v335_v15 }
  0x14   :  { %4678 = vmatprep.mubr.msk.f32.mxu0 %vm5711_vm0, %v7728_v6  ;;  %4765 = vmatprep.mubr.msk.f32.mxu1 %vm5711_vm0, %v7728_v6 }
  0x15   :  { %5465 = vmatpush3.bf16.msra.mxu0 %v5444_v7  ;;  %5475 = vmatpush3.bf16.msra.mxu1 %v5444_v7 }
  0x16   :  { %5466 = vmatprep.subr.bf16.mxu0 %v7730_v3  ;;  %5476 = vmatprep.subr.bf16.mxu1 %v7730_v3 }
  0x17   :  { %4679 = vmatmul.mubr.msk.f32.gmra.mrb[4].mxu0 %vm64_vm4, %v41_v16  ;;  %4766 = vmatmul.mubr.msk.f32.gmra.mrb[4].mxu1 %vm64_vm4, %v336_v17 }
  0x18   :  { %4681 = vmatprep.mubr.msk.f32.mxu0 %vm5711_vm0, %v7728_v6  ;;  %4768 = vmatprep.mubr.msk.f32.mxu1 %vm5711_vm0, %v7728_v6 }
  0x19   :  { %5469 = vmatpush3.bf16.msk.msra.mxu0 %vm5798_vm3, %v5447_v10  ;;  %5479 = vmatpush3.bf16.msk.msra.mxu1 %vm5798_vm3, %v5447_v10 }
  0x1a   :  { %5480 = vmatprep.subr.bf16.mxu0 %v7730_v3  ;;  %5495 = vmatprep.subr.bf16.mxu1 %v7730_v3 }
  0x1b   :  { %4682 = vmatmul.mubr.msk.f32.gmra.mrb[6].mxu0 %vm64_vm4, %v42_v18  ;;  %4769 = vmatmul.mubr.msk.f32.gmra.mrb[6].mxu1 %vm64_vm4, %v337_v19 }
  0x1c   :  { %14 = vsyncpa [#allocation7], 0  ;;  %4684 = vmatprep.mubr.msk.f32.mxu0 %vm5711_vm0, %v7728_v6  ;;  %v43_v20 = vld [vmem:[%s7718_s0 + $0x20] sm:$0xff]  ;;  %4771 = vmatprep.mubr.msk.f32.mxu1 %vm5711_vm0, %v7728_v6  ;;  %v338_v21 = vld [vmem:[%s7718_s0 + $0xe8] sm:$0xff]  ;;  %vm1336_vm5 = vcmask 130048   ;;  %s5714_s27 = smov 32  }
  0x1d   :  { %v44_v22 = vld [vmem:[%s7718_s0 + $0x28] sm:$0xff]  ;;  %v339_v23 = vld [vmem:[%s7718_s0 + $0xf0] sm:$0xff]  ;;  %v340_v25 = vld [vmem:[%s7718_s0 + $0xf8] sm:$0xff]  ;;  %s5715_s28 = smov 16   ;;  %s5716_s29 = smov 48   ;;  %vm1446_vm6 = vcmask 261248  }
  0x1e   :  { %v45_v24 = vld [vmem:[%s7718_s0 + $0x30] sm:$0xff]  ;;  %v46_v26 = vld [vmem:[%s7718_s0 + $0x38] sm:$0xff]  ;;  %v341_v27 = vld [vmem:[%s7718_s0 + $0x100] sm:$0xff]  ;;  %s5717_s12 = smov 64   ;;  %vm1519_vm7 = vcmask 392448   ;;  %vm1592_vm8 = vcmask 523648  }
  0x1f   :  { %4685 = vmatmul.mubr.msk.f32.gmra.mrb[8].mxu0 %vm64_vm4, %v43_v20  ;;  %4772 = vmatmul.mubr.msk.f32.gmra.mrb[8].mxu1 %vm64_vm4, %v338_v21  ;;  %v47_v28 = vld [vmem:[%s7718_s0 + $0x40] sm:$0xff]  ;;  %v342_v29 = vld [vmem:[%s7718_s0 + $0x108] sm:$0xff]  ;;  %v343_v31 = vld [vmem:[%s7718_s0 + $0x110] sm:$0xff]  ;;  %vm1665_vm9 = vcmask 654848   ;;  %vm1713_vm10 = vcmask 654336   ;;  %vm2415_vm11 = vcmask 261120  }
  0x20   :  { %4687 = vmatprep.mubr.msk.f32.mxu0 %vm5711_vm0, %v7728_v6  ;;  %4774 = vmatprep.mubr.msk.f32.mxu1 %vm5711_vm0, %v7728_v6  ;;  %v48_v30 = vld [vmem:[%s7718_s0 + $0x48] sm:$0xff]  ;;  %v49_v32 = vld [vmem:[%s7718_s0 + $0x50] sm:$0xff]  ;;  %v344_v33 = vld [vmem:[%s7718_s0 + $0x118] sm:$0xff]  ;;  %vm2430_vm12 = vcmask 253952   ;;  %vm2450_vm13 = vcmask 516352   ;;  %vm2470_vm14 = vcmask 778752  }
  0x21   :  { %v50_v34 = vld [vmem:[%s7718_s0 + $0x58] sm:$0xff]  ;;  %v345_v35 = vld [vmem:[%s7718_s0 + $0x120] sm:$0xff]  ;;  %v346_v37 = vld [vmem:[%s7718_s0 + $0x128] sm:$0xff]  ;;  %vm2490_vm15 = vcmask 1041152  }
  0x22   :  { %v51_v36 = vld [vmem:[%s7718_s0 + $0x60] sm:$0xff]  ;;  %v52_v38 = vld [vmem:[%s7718_s0 + $0x68] sm:$0xff]  ;;  %v347_v39 = vld [vmem:[%s7718_s0 + $0x130] sm:$0xff] }
  0x23   :  { %4688 = vmatmul.mubr.msk.f32.gmra.mrb[10].mxu0 %vm64_vm4, %v44_v22  ;;  %4775 = vmatmul.mubr.msk.f32.gmra.mrb[10].mxu1 %vm64_vm4, %v339_v23  ;;  %v53_v40 = vld [vmem:[%s7718_s0 + $0x70] sm:$0xff]  ;;  %v348_v41 = vld [vmem:[%s7718_s0 + $0x138] sm:$0xff]  ;;  %v349_v43 = vld [vmem:[%s7718_s0 + $0x140] sm:$0xff] }
  0x24   :  { %4690 = vmatprep.mubr.msk.f32.mxu0 %vm5711_vm0, %v7728_v6  ;;  %4777 = vmatprep.mubr.msk.f32.mxu1 %vm5711_vm0, %v7728_v6  ;;  %v54_v42 = vld [vmem:[%s7718_s0 + $0x78] sm:$0xff]  ;;  %v55_v44 = vld [vmem:[%s7718_s0 + $0x80] sm:$0xff]  ;;  %v350_v45 = vld [vmem:[%s7718_s0 + $0x148] sm:$0xff] }
  0x25   :  { %v56_v46 = vld [vmem:[%s7718_s0 + $0x88] sm:$0xff]  ;;  %v351_v47 = vld [vmem:[%s7718_s0 + $0x150] sm:$0xff]  ;;  %v352_v49 = vld [vmem:[%s7718_s0 + $0x158] sm:$0xff] }
  0x26   :  { %v57_v48 = vld [vmem:[%s7718_s0 + $0x90] sm:$0xff]  ;;  %v58_v50 = vld [vmem:[%s7718_s0 + $0x98] sm:$0xff]  ;;  %v353_v51 = vld [vmem:[%s7718_s0 + $0x160] sm:$0xff] }
  0x27   :  { %4691 = vmatmul.mubr.msk.f32.gmra.mrb[12].mxu0 %vm64_vm4, %v45_v24  ;;  %4778 = vmatmul.mubr.msk.f32.gmra.mrb[12].mxu1 %vm64_vm4, %v340_v25  ;;  %v59_v52 = vld [vmem:[%s7718_s0 + $0xa0] sm:$0xff]  ;;  %v354_v53 = vld [vmem:[%s7718_s0 + $0x168] sm:$0xff]  ;;  %v355_v55 = vld [vmem:[%s7718_s0 + $0x170] sm:$0xff] }
  0x28   :  { %4693 = vmatprep.mubr.msk.f32.mxu0 %vm5711_vm0, %v7728_v6  ;;  %4780 = vmatprep.mubr.msk.f32.mxu1 %vm5711_vm0, %v7728_v6  ;;  %v60_v54 = vld [vmem:[%s7718_s0 + $0xa8] sm:$0xff]  ;;  %v61_v56 = vld [vmem:[%s7718_s0 + $0xb0] sm:$0xff]  ;;  %v356_v57 = vld [vmem:[%s7718_s0 + $0x178] sm:$0xff] }
  0x29   :  { %v62_v58 = vld [vmem:[%s7718_s0 + $0xb8] sm:$0xff]  ;;  %v357_v59 = vld [vmem:[%s7718_s0 + $0x180] sm:$0xff]  ;;  %v358_v61 = vld [vmem:[%s7718_s0 + $0x188] sm:$0xff] }
  0x2a   :  { %v63_v60 = vld [vmem:[%s7718_s0 + $0xc0] sm:$0xff]  ;;  %v649_v62 = vld [vmem:[%s7718_s0 + $0x190] sm:$0xff]  ;;  %v964_v63 = vld [vmem:[%s7718_s0 + $0x258] sm:$0xff] }
  0x2b   :  { %4694 = vmatmul.mubr.msk.f32.gmra.mrb[14].mxu0 %vm64_vm4, %v46_v26  ;;  %4781 = vmatmul.mubr.msk.f32.gmra.mrb[14].mxu1 %vm64_vm4, %v341_v27  ;;  %v650_v0 = vld [vmem:[%s7718_s0 + $0x198] sm:$0xff]  ;;  %v965_v1 = vld [vmem:[%s7718_s0 + $0x260] sm:$0xff]  ;;  %v966_v4 = vld [vmem:[%s7718_s0 + $0x268] sm:$0xff] }
  0x2c   :  { %4696 = vmatprep.mubr.msk.f32.mxu0 %vm5711_vm0, %v7728_v6  ;;  %4783 = vmatprep.mubr.msk.f32.mxu1 %vm5711_vm0, %v7728_v6  ;;  %v651_v2 = vld [vmem:[%s7718_s0 + $0x1a0] sm:$0xff]  ;;  %v652_v5 = vld [vmem:[%s7718_s0 + $0x1a8] sm:$0xff]  ;;  %v967_v7 = vld [vmem:[%s7718_s0 + $0x270] sm:$0xff] }
  0x2d   :  { %v653_v8 = vld [vmem:[%s7718_s0 + $0x1b0] sm:$0xff]  ;;  %v968_v9 = vld [vmem:[%s7718_s0 + $0x278] sm:$0xff]  ;;  %v969_v11 = vld [vmem:[%s7718_s0 + $0x280] sm:$0xff] }
  0x2e   :  { %v654_v10 = vld [vmem:[%s7718_s0 + $0x1b8] sm:$0xff]  ;;  %v655_v12 = vld [vmem:[%s7718_s0 + $0x1c0] sm:$0xff]  ;;  %v970_v13 = vld [vmem:[%s7718_s0 + $0x288] sm:$0xff] }
  0x2f   :  { %4697 = vmatmul.mubr.msk.f32.gmra.mrb[16].mxu0 %vm64_vm4, %v47_v28  ;;  %4784 = vmatmul.mubr.msk.f32.gmra.mrb[16].mxu1 %vm64_vm4, %v342_v29  ;;  %v656_v14 = vld [vmem:[%s7718_s0 + $0x1c8] sm:$0xff]  ;;  %v971_v15 = vld [vmem:[%s7718_s0 + $0x290] sm:$0xff]  ;;  %v972_v17 = vld [vmem:[%s7718_s0 + $0x298] sm:$0xff] }
  0x30   :  { %4699 = vmatprep.mubr.msk.f32.mxu0 %vm5711_vm0, %v7728_v6  ;;  %4786 = vmatprep.mubr.msk.f32.mxu1 %vm5711_vm0, %v7728_v6  ;;  %v657_v16 = vld [vmem:[%s7718_s0 + $0x1d0] sm:$0xff]  ;;  %v658_v18 = vld [vmem:[%s7718_s0 + $0x1d8] sm:$0xff]  ;;  %v973_v19 = vld [vmem:[%s7718_s0 + $0x2a0] sm:$0xff] }
  0x31   :  { %v659_v20 = vld [vmem:[%s7718_s0 + $0x1e0] sm:$0xff]  ;;  %v974_v21 = vld [vmem:[%s7718_s0 + $0x2a8] sm:$0xff]  ;;  %v975_v23 = vld [vmem:[%s7718_s0 + $0x2b0] sm:$0xff] }
  0x32   :  { %v660_v22 = vld [vmem:[%s7718_s0 + $0x1e8] sm:$0xff]  ;;  %v661_v24 = vld [vmem:[%s7718_s0 + $0x1f0] sm:$0xff]  ;;  %v976_v25 = vld [vmem:[%s7718_s0 + $0x2b8] sm:$0xff] }
  0x33   :  { %4700 = vmatmul.mubr.msk.f32.gmra.mrb[18].mxu0 %vm64_vm4, %v48_v30  ;;  %4787 = vmatmul.mubr.msk.f32.gmra.mrb[18].mxu1 %vm64_vm4, %v343_v31  ;;  %v662_v26 = vld [vmem:[%s7718_s0 + $0x1f8] sm:$0xff]  ;;  %v977_v27 = vld [vmem:[%s7718_s0 + $0x2c0] sm:$0xff]  ;;  %v978_v29 = vld [vmem:[%s7718_s0 + $0x2c8] sm:$0xff] }
  0x34   :  { %4702 = vmatprep.mubr.msk.f32.mxu0 %vm5711_vm0, %v7728_v6  ;;  %4789 = vmatprep.mubr.msk.f32.mxu1 %vm5711_vm0, %v7728_v6  ;;  %v663_v28 = vld [vmem:[%s7718_s0 + $0x200] sm:$0xff]  ;;  %v664_v30 = vld [vmem:[%s7718_s0 + $0x208] sm:$0xff]  ;;  %v979_v31 = vld [vmem:[%s7718_s0 + $0x2d0] sm:$0xff] }
  0x37   :  { %4703 = vmatmul.mubr.msk.f32.gmra.mrb[20].mxu0 %vm64_vm4, %v49_v32  ;;  %4790 = vmatmul.mubr.msk.f32.gmra.mrb[20].mxu1 %vm64_vm4, %v344_v33  ;;  %v665_v32 = vld [vmem:[%s7718_s0 + $0x210] sm:$0xff]  ;;  %v980_v33 = vld [vmem:[%s7718_s0 + $0x2d8] sm:$0xff] }
  0x38   :  { %4705 = vmatprep.mubr.msk.f32.mxu0 %vm5711_vm0, %v7728_v6  ;;  %4792 = vmatprep.mubr.msk.f32.mxu1 %vm5711_vm0, %v7728_v6 }
  0x3b   :  { %4706 = vmatmul.mubr.msk.f32.gmra.mrb[22].mxu0 %vm64_vm4, %v50_v34  ;;  %4793 = vmatmul.mubr.msk.f32.gmra.mrb[22].mxu1 %vm64_vm4, %v345_v35  ;;  %v666_v34 = vld [vmem:[%s7718_s0 + $0x218] sm:$0xff]  ;;  %v981_v35 = vld [vmem:[%s7718_s0 + $0x2e0] sm:$0xff] }
  0x3c   :  { %4708 = vmatprep.mubr.msk.f32.mxu0 %vm5711_vm0, %v7728_v6  ;;  %4795 = vmatprep.mubr.msk.f32.mxu1 %vm5711_vm0, %v7728_v6 }
  0x3f   :  { %4709 = vmatmul.mubr.msk.f32.gmra.mrb[24].mxu0 %vm64_vm4, %v51_v36  ;;  %4796 = vmatmul.mubr.msk.f32.gmra.mrb[24].mxu1 %vm64_vm4, %v346_v37  ;;  %v667_v36 = vld [vmem:[%s7718_s0 + $0x220] sm:$0xff]  ;;  %v982_v37 = vld [vmem:[%s7718_s0 + $0x2e8] sm:$0xff] }
  0x40   :  { %4711 = vmatprep.mubr.msk.f32.mxu0 %vm5711_vm0, %v7728_v6  ;;  %4798 = vmatprep.mubr.msk.f32.mxu1 %vm5711_vm0, %v7728_v6 }
  0x43   :  { %4712 = vmatmul.mubr.msk.f32.gmra.mrb[26].mxu0 %vm64_vm4, %v52_v38  ;;  %4799 = vmatmul.mubr.msk.f32.gmra.mrb[26].mxu1 %vm64_vm4, %v347_v39  ;;  %v668_v38 = vld [vmem:[%s7718_s0 + $0x228] sm:$0xff]  ;;  %v983_v39 = vld [vmem:[%s7718_s0 + $0x2f0] sm:$0xff] }
  0x44   :  { %4714 = vmatprep.mubr.msk.f32.mxu0 %vm5711_vm0, %v7728_v6  ;;  %4801 = vmatprep.mubr.msk.f32.mxu1 %vm5711_vm0, %v7728_v6 }
  0x47   :  { %4715 = vmatmul.mubr.msk.f32.gmra.mrb[28].mxu0 %vm64_vm4, %v53_v40  ;;  %4802 = vmatmul.mubr.msk.f32.gmra.mrb[28].mxu1 %vm64_vm4, %v348_v41  ;;  %v669_v40 = vld [vmem:[%s7718_s0 + $0x230] sm:$0xff]  ;;  %v984_v41 = vld [vmem:[%s7718_s0 + $0x2f8] sm:$0xff] }
  0x48   :  { %4717 = vmatprep.mubr.msk.f32.mxu0 %vm5711_vm0, %v7728_v6  ;;  %4804 = vmatprep.mubr.msk.f32.mxu1 %vm5711_vm0, %v7728_v6 }
  0x4b   :  { %4718 = vmatmul.mubr.msk.f32.gmra.mrb[30].mxu0 %vm64_vm4, %v54_v42  ;;  %4805 = vmatmul.mubr.msk.f32.gmra.mrb[30].mxu1 %vm64_vm4, %v349_v43  ;;  %v670_v42 = vld [vmem:[%s7718_s0 + $0x238] sm:$0xff]  ;;  %v985_v43 = vld [vmem:[%s7718_s0 + $0x300] sm:$0xff] }
  0x4c   :  { %4720 = vmatprep.mubr.msk.f32.mxu0 %vm5711_vm0, %v7728_v6  ;;  %4807 = vmatprep.mubr.msk.f32.mxu1 %vm5711_vm0, %v7728_v6 }
  0x4f   :  { %4721 = vmatmul.mubr.msk.f32.gmra.mrb[32].mxu0 %vm64_vm4, %v55_v44  ;;  %4808 = vmatmul.mubr.msk.f32.gmra.mrb[32].mxu1 %vm64_vm4, %v350_v45  ;;  %v671_v44 = vld [vmem:[%s7718_s0 + $0x240] sm:$0xff]  ;;  %v986_v45 = vld [vmem:[%s7718_s0 + $0x308] sm:$0xff] }
  0x50   :  { %4723 = vmatprep.mubr.msk.f32.mxu0 %vm5711_vm0, %v7728_v6  ;;  %4810 = vmatprep.mubr.msk.f32.mxu1 %vm5711_vm0, %v7728_v6 }
  0x53   :  { %4724 = vmatmul.mubr.msk.f32.gmra.mrb[34].mxu0 %vm64_vm4, %v56_v46  ;;  %4811 = vmatmul.mubr.msk.f32.gmra.mrb[34].mxu1 %vm64_vm4, %v351_v47  ;;  %v672_v46 = vld [vmem:[%s7718_s0 + $0x248] sm:$0xff]  ;;  %v987_v47 = vld [vmem:[%s7718_s0 + $0x310] sm:$0xff] }
  0x54   :  { %4726 = vmatprep.mubr.msk.f32.mxu0 %vm5711_vm0, %v7728_v6  ;;  %4813 = vmatprep.mubr.msk.f32.mxu1 %vm5711_vm0, %v7728_v6 }
  0x57   :  { %4727 = vmatmul.mubr.msk.f32.gmra.mrb[36].mxu0 %vm64_vm4, %v57_v48  ;;  %4814 = vmatmul.mubr.msk.f32.gmra.mrb[36].mxu1 %vm64_vm4, %v352_v49  ;;  %v673_v48 = vld [vmem:[%s7718_s0 + $0x250] sm:$0xff]  ;;  %v988_v49 = vld [vmem:[%s7718_s0 + $0x318] sm:$0xff] }
  0x58   :  { %4729 = vmatprep.mubr.msk.f32.mxu0 %vm5711_vm0, %v7728_v6  ;;  %4816 = vmatprep.mubr.msk.f32.mxu1 %vm5711_vm0, %v7728_v6 }
  0x5b   :  { %4730 = vmatmul.mubr.msk.f32.gmra.mrb[38].mxu0 %vm64_vm4, %v58_v50  ;;  %4817 = vmatmul.mubr.msk.f32.gmra.mrb[38].mxu1 %vm64_vm4, %v353_v51 }
  0x5c   :  { %4732 = vmatprep.mubr.msk.f32.mxu0 %vm5711_vm0, %v7728_v6  ;;  %4819 = vmatprep.mubr.msk.f32.mxu1 %vm5711_vm0, %v7728_v6 }
  0x5f   :  { %4733 = vmatmul.mubr.msk.f32.gmra.mrb[40].mxu0 %vm64_vm4, %v59_v52  ;;  %4820 = vmatmul.mubr.msk.f32.gmra.mrb[40].mxu1 %vm64_vm4, %v354_v53 }
  0x60   :  { %4735 = vmatprep.mubr.msk.f32.mxu0 %vm5711_vm0, %v7728_v6  ;;  %4822 = vmatprep.mubr.msk.f32.mxu1 %vm5711_vm0, %v7728_v6 }
  0x63   :  { %4736 = vmatmul.mubr.msk.f32.gmra.mrb[42].mxu0 %vm64_vm4, %v60_v54  ;;  %4823 = vmatmul.mubr.msk.f32.gmra.mrb[42].mxu1 %vm64_vm4, %v355_v55 }
  0x64   :  { %4738 = vmatprep.mubr.msk.f32.mxu0 %vm5711_vm0, %v7728_v6  ;;  %4825 = vmatprep.mubr.msk.f32.mxu1 %vm5711_vm0, %v7728_v6 }
  0x67   :  { %4739 = vmatmul.mubr.msk.f32.gmra.mrb[44].mxu0 %vm64_vm4, %v61_v56  ;;  %4826 = vmatmul.mubr.msk.f32.gmra.mrb[44].mxu1 %vm64_vm4, %v356_v57 }
  0x68   :  { %4741 = vmatprep.mubr.msk.f32.mxu0 %vm5711_vm0, %v7728_v6  ;;  %4828 = vmatprep.mubr.msk.f32.mxu1 %vm5711_vm0, %v7728_v6 }
  0x6b   :  { %4742 = vmatmul.mubr.msk.f32.gmra.mrb[46].mxu0 %vm64_vm4, %v62_v58  ;;  %4829 = vmatmul.mubr.msk.f32.gmra.mrb[46].mxu1 %vm64_vm4, %v357_v59 }
  0x6c   :  { %4744 = vmatprep.mubr.msk.f32.mxu0 %vm5711_vm0, %v7728_v6  ;;  %4831 = vmatprep.mubr.msk.f32.mxu1 %vm5711_vm0, %v7728_v6 }
  0x6f   :  { %4745 = vmatmul.mubr.msk.f32.gmra.mrb[48].mxu0 %vm64_vm4, %v63_v60  ;;  %4832 = vmatmul.mubr.msk.f32.gmra.mrb[48].mxu1 %vm64_vm4, %v358_v61 }
  0x70   :  { %4846 = vmatprep.mubr.msk.f32.mxu0 %vm5711_vm0, %v7728_v6  ;;  %4933 = vmatprep.mubr.msk.f32.mxu1 %vm5711_vm0, %v7728_v6 }
  0x73   :  { %4847 = vmatmul.mubr.msk.f32.vlgmr.msra.gmra.mrb[50].mxu0 %vm64_vm4, %v649_v62  ;;  %4934 = vmatmul.mubr.msk.f32.vlgmr.msra.gmra.mrb[50].mxu1 %vm64_vm4, %v964_v63 }
  0x74   :  { %4849 = vmatprep.mubr.msk.f32.mxu0 %vm5711_vm0, %v7728_v6  ;;  %4936 = vmatprep.mubr.msk.f32.mxu1 %vm5711_vm0, %v7728_v6 }
  0x77   :  { %4850 = vmatmul.mubr.msk.f32.gmra.mrb[52].mxu0 %vm64_vm4, %v650_v0  ;;  %4937 = vmatmul.mubr.msk.f32.gmra.mrb[52].mxu1 %vm64_vm4, %v965_v1 }
  0x78   :  { %4852 = vmatprep.mubr.msk.f32.mxu0 %vm5711_vm0, %v7728_v6  ;;  %4939 = vmatprep.mubr.msk.f32.mxu1 %vm5711_vm0, %v7728_v6 }
  0x7b   :  { %4853 = vmatmul.mubr.msk.f32.gmra.mrb[54].mxu0 %vm64_vm4, %v651_v2  ;;  %4940 = vmatmul.mubr.msk.f32.gmra.mrb[54].mxu1 %vm64_vm4, %v966_v4 }
  0x7c   :  { %4855 = vmatprep.mubr.msk.f32.mxu0 %vm5711_vm0, %v7728_v6  ;;  %4942 = vmatprep.mubr.msk.f32.mxu1 %vm5711_vm0, %v7728_v6 }
  0x7f   :  { %4856 = vmatmul.mubr.msk.f32.gmra.mrb[56].mxu0 %vm64_vm4, %v652_v5  ;;  %4943 = vmatmul.mubr.msk.f32.gmra.mrb[56].mxu1 %vm64_vm4, %v967_v7 }
  0x80   :  { %4858 = vmatprep.mubr.msk.f32.mxu0 %vm5711_vm0, %v7728_v6  ;;  %4945 = vmatprep.mubr.msk.f32.mxu1 %vm5711_vm0, %v7728_v6 }
  0x83   :  { %4859 = vmatmul.mubr.msk.f32.gmra.mrb[58].mxu0 %vm64_vm4, %v653_v8  ;;  %4946 = vmatmul.mubr.msk.f32.gmra.mrb[58].mxu1 %vm64_vm4, %v968_v9 }
  0x84   :  { %4861 = vmatprep.mubr.msk.f32.mxu0 %vm5711_vm0, %v7728_v6  ;;  %4948 = vmatprep.mubr.msk.f32.mxu1 %vm5711_vm0, %v7728_v6 }
  0x87   :  { %4862 = vmatmul.mubr.msk.f32.gmra.mrb[60].mxu0 %vm64_vm4, %v654_v10  ;;  %4949 = vmatmul.mubr.msk.f32.gmra.mrb[60].mxu1 %vm64_vm4, %v969_v11 }
  0x88   :  { %4864 = vmatprep.mubr.msk.f32.mxu0 %vm5711_vm0, %v7728_v6  ;;  %4951 = vmatprep.mubr.msk.f32.mxu1 %vm5711_vm0, %v7728_v6 }
  0x8b   :  { %4865 = vmatmul.mubr.msk.f32.gmra.mrb[62].mxu0 %vm64_vm4, %v655_v12  ;;  %4952 = vmatmul.mubr.msk.f32.gmra.mrb[62].mxu1 %vm64_vm4, %v970_v13 }
  0x8c   :  { %4867 = vmatprep.mubr.msk.f32.mxu0 %vm5711_vm0, %v7728_v6  ;;  %4954 = vmatprep.mubr.msk.f32.mxu1 %vm5711_vm0, %v7728_v6 }
  0x8f   :  { %4868 = vmatmul.mubr.msk.f32.gmra.mrb[64].mxu0 %vm64_vm4, %v656_v14  ;;  %4955 = vmatmul.mubr.msk.f32.gmra.mrb[64].mxu1 %vm64_vm4, %v971_v15 }
  0x90   :  { %4870 = vmatprep.mubr.msk.f32.mxu0 %vm5711_vm0, %v7728_v6  ;;  %4957 = vmatprep.mubr.msk.f32.mxu1 %vm5711_vm0, %v7728_v6 }
  0x93   :  { %4871 = vmatmul.mubr.msk.f32.gmra.mrb[66].mxu0 %vm64_vm4, %v657_v16  ;;  %4958 = vmatmul.mubr.msk.f32.gmra.mrb[66].mxu1 %vm64_vm4, %v972_v17 }
  0x94   :  { %4873 = vmatprep.mubr.msk.f32.mxu0 %vm5711_vm0, %v7728_v6  ;;  %4960 = vmatprep.mubr.msk.f32.mxu1 %vm5711_vm0, %v7728_v6 }
  0x97   :  { %4874 = vmatmul.mubr.msk.f32.gmra.mrb[68].mxu0 %vm64_vm4, %v658_v18  ;;  %4961 = vmatmul.mubr.msk.f32.gmra.mrb[68].mxu1 %vm64_vm4, %v973_v19 }
  0x98   :  { %4876 = vmatprep.mubr.msk.f32.mxu0 %vm5711_vm0, %v7728_v6  ;;  %4963 = vmatprep.mubr.msk.f32.mxu1 %vm5711_vm0, %v7728_v6 }
  0x9b   :  { %4877 = vmatmul.mubr.msk.f32.gmra.mrb[70].mxu0 %vm64_vm4, %v659_v20  ;;  %4964 = vmatmul.mubr.msk.f32.gmra.mrb[70].mxu1 %vm64_vm4, %v974_v21 }
  0x9c   :  { %4879 = vmatprep.mubr.msk.f32.mxu0 %vm5711_vm0, %v7728_v6  ;;  %4966 = vmatprep.mubr.msk.f32.mxu1 %vm5711_vm0, %v7728_v6 }
  0x9f   :  { %4880 = vmatmul.mubr.msk.f32.gmra.mrb[72].mxu0 %vm64_vm4, %v660_v22  ;;  %4967 = vmatmul.mubr.msk.f32.gmra.mrb[72].mxu1 %vm64_vm4, %v975_v23 }
  0xa0   :  { %4882 = vmatprep.mubr.msk.f32.mxu0 %vm5711_vm0, %v7728_v6  ;;  %4969 = vmatprep.mubr.msk.f32.mxu1 %vm5711_vm0, %v7728_v6 }
  0xa3   :  { %4883 = vmatmul.mubr.msk.f32.gmra.mrb[74].mxu0 %vm64_vm4, %v661_v24  ;;  %4970 = vmatmul.mubr.msk.f32.gmra.mrb[74].mxu1 %vm64_vm4, %v976_v25 }
  0xa4   :  { %4885 = vmatprep.mubr.msk.f32.mxu0 %vm5711_vm0, %v7728_v6  ;;  %4972 = vmatprep.mubr.msk.f32.mxu1 %vm5711_vm0, %v7728_v6 }
  0xa7   :  { %4886 = vmatmul.mubr.msk.f32.gmra.mrb[76].mxu0 %vm64_vm4, %v662_v26  ;;  %4973 = vmatmul.mubr.msk.f32.gmra.mrb[76].mxu1 %vm64_vm4, %v977_v27 }
  0xa8   :  { %4888 = vmatprep.mubr.msk.f32.mxu0 %vm5711_vm0, %v7728_v6  ;;  %4975 = vmatprep.mubr.msk.f32.mxu1 %vm5711_vm0, %v7728_v6 }
  0xab   :  { %4889 = vmatmul.mubr.msk.f32.gmra.mrb[78].mxu0 %vm64_vm4, %v663_v28  ;;  %4976 = vmatmul.mubr.msk.f32.gmra.mrb[78].mxu1 %vm64_vm4, %v978_v29 }
  0xac   :  { %4891 = vmatprep.mubr.msk.f32.mxu0 %vm5711_vm0, %v7728_v6  ;;  %4978 = vmatprep.mubr.msk.f32.mxu1 %vm5711_vm0, %v7728_v6 }
  0xaf   :  { %4892 = vmatmul.mubr.msk.f32.gmra.mrb[80].mxu0 %vm64_vm4, %v664_v30  ;;  %4979 = vmatmul.mubr.msk.f32.gmra.mrb[80].mxu1 %vm64_vm4, %v979_v31 }
  0xb0   :  { %4894 = vmatprep.mubr.msk.f32.mxu0 %vm5711_vm0, %v7728_v6  ;;  %4981 = vmatprep.mubr.msk.f32.mxu1 %vm5711_vm0, %v7728_v6 }
  0xb3   :  { %4895 = vmatmul.mubr.msk.f32.gmra.mrb[82].mxu0 %vm64_vm4, %v665_v32  ;;  %4982 = vmatmul.mubr.msk.f32.gmra.mrb[82].mxu1 %vm64_vm4, %v980_v33 }
  0xb4   :  { %4897 = vmatprep.mubr.msk.f32.mxu0 %vm5711_vm0, %v7728_v6  ;;  %4984 = vmatprep.mubr.msk.f32.mxu1 %vm5711_vm0, %v7728_v6 }
  0xb7   :  { %4898 = vmatmul.mubr.msk.f32.gmra.mrb[84].mxu0 %vm64_vm4, %v666_v34  ;;  %4985 = vmatmul.mubr.msk.f32.gmra.mrb[84].mxu1 %vm64_vm4, %v981_v35 }
  0xb8   :  { %4900 = vmatprep.mubr.msk.f32.mxu0 %vm5711_vm0, %v7728_v6  ;;  %4987 = vmatprep.mubr.msk.f32.mxu1 %vm5711_vm0, %v7728_v6 }
  0xbb   :  { %4901 = vmatmul.mubr.msk.f32.gmra.mrb[86].mxu0 %vm64_vm4, %v667_v36  ;;  %4988 = vmatmul.mubr.msk.f32.gmra.mrb[86].mxu1 %vm64_vm4, %v982_v37 }
  0xbc   :  { %4903 = vmatprep.mubr.msk.f32.mxu0 %vm5711_vm0, %v7728_v6  ;;  %4990 = vmatprep.mubr.msk.f32.mxu1 %vm5711_vm0, %v7728_v6 }
  0xbf   :  { %4904 = vmatmul.mubr.msk.f32.gmra.mrb[88].mxu0 %vm64_vm4, %v668_v38  ;;  %4991 = vmatmul.mubr.msk.f32.gmra.mrb[88].mxu1 %vm64_vm4, %v983_v39 }
  0xc0   :  { %4906 = vmatprep.mubr.msk.f32.mxu0 %vm5711_vm0, %v7728_v6  ;;  %4993 = vmatprep.mubr.msk.f32.mxu1 %vm5711_vm0, %v7728_v6 }
  0xc3   :  { %4907 = vmatmul.mubr.msk.f32.gmra.mrb[90].mxu0 %vm64_vm4, %v669_v40  ;;  %4994 = vmatmul.mubr.msk.f32.gmra.mrb[90].mxu1 %vm64_vm4, %v984_v41 }
  0xc4   :  { %4909 = vmatprep.mubr.msk.f32.mxu0 %vm5711_vm0, %v7728_v6  ;;  %4996 = vmatprep.mubr.msk.f32.mxu1 %vm5711_vm0, %v7728_v6 }
  0xc7   :  { %4910 = vmatmul.mubr.msk.f32.gmra.mrb[92].mxu0 %vm64_vm4, %v670_v42  ;;  %4997 = vmatmul.mubr.msk.f32.gmra.mrb[92].mxu1 %vm64_vm4, %v985_v43 }
  0xc8   :  { %4912 = vmatprep.mubr.msk.f32.mxu0 %vm5711_vm0, %v7728_v6  ;;  %4999 = vmatprep.mubr.msk.f32.mxu1 %vm5711_vm0, %v7728_v6 }
  0xcb   :  { %4913 = vmatmul.mubr.msk.f32.gmra.mrb[94].mxu0 %vm64_vm4, %v671_v44  ;;  %5000 = vmatmul.mubr.msk.f32.gmra.mrb[94].mxu1 %vm64_vm4, %v986_v45 }
  0xcc   :  { %4915 = vmatprep.mubr.msk.f32.mxu0 %vm5711_vm0, %v7728_v6  ;;  %5002 = vmatprep.mubr.msk.f32.mxu1 %vm5711_vm0, %v7728_v6 }
  0xcf   :  { %4916 = vmatmul.mubr.msk.f32.gmra.mrb[96].mxu0 %vm64_vm4, %v672_v46  ;;  %5003 = vmatmul.mubr.msk.f32.gmra.mrb[96].mxu1 %vm64_vm4, %v987_v47 }
  0xd0   :  { %4918 = vmatprep.mubr.msk.f32.mxu0 %vm5711_vm0, %v7728_v6  ;;  %5005 = vmatprep.mubr.msk.f32.mxu1 %vm5711_vm0, %v7728_v6 }
  0xd3   :  { %4919 = vmatmul.mubr.msk.f32.gmra.mrb[98].mxu0 %vm64_vm4, %v673_v48  ;;  %5006 = vmatmul.mubr.msk.f32.gmra.mrb[98].mxu1 %vm64_vm4, %v988_v49 }
  0xd4   :  { %5069 = vmatprep.mubr.msk.f32.mxu1 %vm5711_vm0, %v7728_v6  ;;  %5028 = vmatprep.mubr.msk.f32.mxu0 %vm5711_vm0, %v7728_v6 }
  0xe2   :  { %v6419_v50 = vpop.f32.mrb[0].mxu0  ;;  %v6421_v51 = vpop.f32.mrb[0].mxu1 }
  0xe3   :  { %v4674_v52 = vpop.f32.mrb[1].mxu0  ;;  %v624_v53 = vmax.f32 %v6419_v50, %v6421_v51  ;;  %v4761_v54 = vpop.f32.mrb[1].mxu1 }
  0xe6   :  { %v6425_v55 = vpop.f32.mrb[2].mxu0  ;;  %v6427_v56 = vpop.f32.mrb[2].mxu1 }
  0xe7   :  { %v4677_v57 = vpop.f32.mrb[3].mxu0  ;;  %v4764_v59 = vpop.f32.mrb[3].mxu1  ;;  %v7734_v50 = vmax.f32 %v6425_v55, %v6427_v56 }
  0xea   :  { %v6431_v60 = vpop.f32.mrb[4].mxu0  ;;  %v6433_v61 = vpop.f32.mrb[4].mxu1 }
  0xeb   :  { %v4680_v62 = vpop.f32.mrb[5].mxu0  ;;  %v4767_v0 = vpop.f32.mrb[5].mxu1  ;;  %v7735_v56 = vmax.f32 %v6431_v60, %v6433_v61 }
  0xee   :  { %v6437_v1 = vpop.f32.mrb[6].mxu0  ;;  %v6439_v2 = vpop.f32.mrb[6].mxu1 }
  0xef   :  { %v4683_v4 = vpop.f32.mrb[7].mxu0  ;;  %v4770_v7 = vpop.f32.mrb[7].mxu1 }
  0xf2   :  { %v6443_v8 = vpop.f32.mrb[8].mxu0  ;;  %v6445_v9 = vpop.f32.mrb[8].mxu1 }
  0xf3   :  { %v4686_v10 = vpop.f32.mrb[9].mxu0  ;;  %v4773_v12 = vpop.f32.mrb[9].mxu1 }
  0xf6   :  { %v6449_v13 = vpop.f32.mrb[10].mxu0  ;;  %v6451_v14 = vpop.f32.mrb[10].mxu1 }
  0xf7   :  { %v4689_v15 = vpop.f32.mrb[11].mxu0  ;;  %v4776_v17 = vpop.f32.mrb[11].mxu1 }
  0xfa   :  { %v6455_v18 = vpop.f32.mrb[12].mxu0  ;;  %v6457_v19 = vpop.f32.mrb[12].mxu1 }
  0xfb   :  { %v4692_v20 = vpop.f32.mrb[13].mxu0  ;;  %v4779_v22 = vpop.f32.mrb[13].mxu1 }
  0xfe   :  { %v6461_v23 = vpop.f32.mrb[14].mxu0  ;;  %v6463_v24 = vpop.f32.mrb[14].mxu1 }
  0xff   :  { %v4695_v25 = vpop.f32.mrb[15].mxu0  ;;  %v4782_v27 = vpop.f32.mrb[15].mxu1 }
 0x102   :  { %v6467_v28 = vpop.f32.mrb[16].mxu0  ;;  %v6469_v29 = vpop.f32.mrb[16].mxu1 }
 0x103   :  { %v4698_v30 = vpop.f32.mrb[17].mxu0  ;;  %v4785_v32 = vpop.f32.mrb[17].mxu1 }
 0x106   :  { %v6473_v33 = vpop.f32.mrb[18].mxu0  ;;  %v6475_v34 = vpop.f32.mrb[18].mxu1 }
 0x107   :  { %v4701_v35 = vpop.f32.mrb[19].mxu0  ;;  %v4788_v37 = vpop.f32.mrb[19].mxu1 }
 0x10a   :  { %v6479_v38 = vpop.f32.mrb[20].mxu0  ;;  %v6481_v39 = vpop.f32.mrb[20].mxu1 }
 0x10b   :  { %v4704_v40 = vpop.f32.mrb[21].mxu0  ;;  %v4791_v42 = vpop.f32.mrb[21].mxu1 }
 0x10e   :  { %v6485_v43 = vpop.f32.mrb[22].mxu0  ;;  %v6487_v44 = vpop.f32.mrb[22].mxu1 }
 0x10f   :  { %v4707_v45 = vpop.f32.mrb[23].mxu0  ;;  %v4794_v47 = vpop.f32.mrb[23].mxu1 }
 0x112   :  { %v6491_v48 = vpop.f32.mrb[24].mxu0  ;;  %v6493_v49 = vpop.f32.mrb[24].mxu1 }
 0x113   :  { %v4710_v52 = vpop.f32.mrb[25].mxu0  ;;  %v4797_v57 = vpop.f32.mrb[25].mxu1 }
 0x116   :  { %v6497_v59 = vpop.f32.mrb[26].mxu0  ;;  %v6499_v62 = vpop.f32.mrb[26].mxu1 }
 0x117   :  { %v4713_v0 = vpop.f32.mrb[27].mxu0  ;;  %v4800_v7 = vpop.f32.mrb[27].mxu1 }
 0x11a   :  { %v6503_v10 = vpop.f32.mrb[28].mxu0  ;;  %v6505_v12 = vpop.f32.mrb[28].mxu1 }
 0x11b   :  { %v4716_v15 = vpop.f32.mrb[29].mxu0  ;;  %v4803_v20 = vpop.f32.mrb[29].mxu1 }
 0x11e   :  { %v6509_v22 = vpop.f32.mrb[30].mxu0  ;;  %v6511_v25 = vpop.f32.mrb[30].mxu1 }
 0x11f   :  { %v4719_v27 = vpop.f32.mrb[31].mxu0  ;;  %v4806_v32 = vpop.f32.mrb[31].mxu1 }
 0x122   :  { %v6515_v35 = vpop.f32.mrb[32].mxu0  ;;  %v6517_v37 = vpop.f32.mrb[32].mxu1 }
 0x123   :  { %v4722_v40 = vpop.f32.mrb[33].mxu0  ;;  %v4809_v45 = vpop.f32.mrb[33].mxu1 }
 0x126   :  { %v6521_v47 = vpop.f32.mrb[34].mxu0  ;;  %v6523_v52 = vpop.f32.mrb[34].mxu1 }
 0x127   :  { %v4725_v57 = vpop.f32.mrb[35].mxu0  ;;  %v4812_v7 = vpop.f32.mrb[35].mxu1 }
 0x12a   :  { %v6527_v15 = vpop.f32.mrb[36].mxu0  ;;  %v6529_v20 = vpop.f32.mrb[36].mxu1 }
 0x12b   :  { %v4728_v27 = vpop.f32.mrb[37].mxu0  ;;  %v4815_v40 = vpop.f32.mrb[37].mxu1 }
 0x12e   :  { %v6533_v6 = vpop.f32.mrb[38].mxu0  ;;  %v6535_v45 = vpop.f32.mrb[38].mxu1 }
 0x12f   :  { %v4731_v42 = vpop.f32.mrb[39].mxu0  ;;  %v4818_v30 = vpop.f32.mrb[39].mxu1 }
 0x132   :  { %v6539_v0 = vpop.f32.mrb[40].mxu0  ;;  %v6541_v7 = vpop.f32.mrb[40].mxu1 }
 0x133   :  { %v4734_v17 = vpop.f32.mrb[41].mxu0  ;;  %v4821_v4 = vpop.f32.mrb[41].mxu1 }
 0x136   :  { %v6545_v32 = vpop.f32.mrb[42].mxu0  ;;  %v6547_v40 = vpop.f32.mrb[42].mxu1 }
 0x137   :  { %v4737_v54 = vpop.f32.mrb[43].mxu0  ;;  %v4824_v46 = vpop.f32.mrb[43].mxu1 }
 0x13a   :  { %v6551_v57 = vpop.f32.mrb[44].mxu0  ;;  %v6553_v30 = vpop.f32.mrb[44].mxu1 }
 0x13b   :  { %v4740_v41 = vpop.f32.mrb[45].mxu0  ;;  %v4827_v36 = vpop.f32.mrb[45].mxu1 }
 0x13c   :  { %v4165_v36 = vld [vmem:[%s7721_s3 + $0x50] sm:$0xff] }
 0x13e   :  { %v6557_v27 = vpop.f32.mrb[46].mxu0  ;;  %v6559_v4 = vpop.f32.mrb[46].mxu1 }
 0x13f   :  { %v4743_v31 = vpop.f32.mrb[47].mxu0  ;;  %v4830_v26 = vpop.f32.mrb[47].mxu1 }
 0x140   :  { %v4166_v31 = vld [vmem:[%s7721_s3 + $0x58] sm:$0xff]  ;;  %v1685_v26 = vld [vmem:[%s7721_s3] sm:$0xff] }
 0x141   :  { %v6578_v54 = vpack.c.bf16 %v4166_v31, %v4165_v36  ;;  %v6591_v36 = vld [vmem:[%s7720_s2] ss:$0 sm:$0xff] }
 0x142   :  { %v6563_v42 = vpop.f32.mrb[48].mxu0  ;;  %v6565_v46 = vpop.f32.mrb[48].mxu1 }
 0x143   :  { %v4746_v21 = vpop.f32.mrb[49].mxu0  ;;  %v4833_v16 = vpop.f32.mrb[49].mxu1  ;;  %5482 = vmatpush3.bf16.msra.mxu0 %v6578_v54 }
 0x144   :  { %v1686_v21 = vld [vmem:[%s7721_s3 + $0x8] sm:$0xff]  ;;  %5483 = vmatprep.subr.bf16.mxu0 %v7730_v3 }
 0x145   :  { %v5496_v41 = vpack.c.bf16 %v1686_v21, %v1685_v26 }
 0x146   :  { %v815_v16 = vpop.f32.mrb[50].mxu0  ;;  %v1130_v17 = vpop.f32.mrb[50].mxu1 }
 0x147   :  { %v939_v11 = vmax.f32 %v624_v53, %v815_v16  ;;  %v4848_v5 = vpop.f32.mrb[51].mxu0  ;;  %v4935_v63 = vpop.f32.mrb[51].mxu1  ;;  %5497 = vmatpush3.bf16.msra.mxu1 %v5496_v41  ;;  %v1687_v16 = vld [vmem:[%s7721_s3 + $0x10] sm:$0xff] }
 0x148   :  { %5498 = vmatprep.subr.bf16.mxu1 %v7730_v3 }
 0x149   :  { %v1254_v31 = vmax.f32 %v939_v11, %v1130_v17  ;;  %v1688_v11 = vld [vmem:[%s7721_s3 + $0x18] sm:$0xff] }
 0x14a   :  { %v820_v26 = vpop.f32.mrb[52].mxu0  ;;  %v1135_v21 = vpop.f32.mrb[52].mxu1 }
 0x14b   :  { %v1286_v58 = vadd.f32 %v6591_v36, %v1254_v31  ;;  %v940_v51 = vmax.f32 %v7734_v50, %v820_v26  ;;  %v4851_v53 = vpop.f32.mrb[53].mxu0  ;;  %v4938_v63 = vpop.f32.mrb[53].mxu1  ;;  %v5499_v31 = vpack.c.bf16 %v1688_v11, %v1687_v16 }
 0x14c   :  { %v7736_v53 = vmov 0.0|0.0   ;;  %v1689_v63 = vld [vmem:[%s7721_s3 + $0x20] sm:$0xff] }
 0x14d   :  { %v1311_v5 = vmax.f32 %v1286_v58, 0.0  ;;  %v1255_v41 = vmax.f32 %v940_v51, %v1135_v21  ;;  %5500 = vmatpush3.bf16.msra.mxu1 %v5499_v31 }
 0x14e   :  { %v825_v17 = vpop.f32.mrb[54].mxu0  ;;  %v1140_v3 = vpop.f32.mrb[54].mxu1  ;;  %5501 = vmatprep.subr.bf16.mxu1 %v7736_v53 }
 0x14f   :  { %1337 = vst.msk [vmem:[#allocation2] sm:$0xff] %vm1336_vm5, %v1311_v5  ;;  %v1287_v55 = vadd.f32 %v6591_v36, %v1255_v41  ;;  %v941_v58 = vmax.f32 %v7735_v56, %v825_v17  ;;  %v4854_v26 = vpop.f32.mrb[55].mxu0  ;;  %v4941_v21 = vpop.f32.mrb[55].mxu1  ;;  %v1690_v5 = vld [vmem:[%s7721_s3 + $0x28] sm:$0xff] }
 0x150   :  { %v5502_v11 = vpack.c.bf16 %v1690_v5, %v1689_v63  ;;  %v1692_v26 = vld [vmem:[%s7721_s3 + $0x38] sm:$0xff]  ;;  %v7738_v63 = vmax.f32 %v6443_v8, %v6445_v9  ;;  %v1693_v8 = vld [vmem:[%s7721_s3 + $0x40] sm:$0xff]  ;;  %v1694_v9 = vld [vmem:[%s7721_s3 + $0x48] sm:$0xff] }
 0x151   :  { %v1312_v50 = vmax.f32 %v1287_v55, 0.0  ;;  %v1256_v51 = vmax.f32 %v941_v58, %v1140_v3  ;;  %v7737_v3 = vmax.f32 %v6437_v1, %v6439_v2  ;;  %v1691_v58 = vld [vmem:[%s7721_s3 + $0x30] sm:$0xff] }
 0x152   :  { %v830_v41 = vpop.f32.mrb[56].mxu0  ;;  %v1145_v16 = vpop.f32.mrb[56].mxu1  ;;  %5503 = vmatpush3.bf16.msra.mxu1 %v5502_v11  ;;  %v5505_v1 = vpack.c.bf16 %v1692_v26, %v1691_v58  ;;  %v4167_v11 = vld [vmem:[%s7721_s3 + $0x60] sm:$0xff]  ;;  %v5508_v26 = vpack.c.bf16 %v1694_v9, %v1693_v8 }
 0x153   :  { %1338 = vst.msk [vmem:[#allocation2 + $0x8] sm:$0xff] %vm1336_vm5, %v1312_v50  ;;  %v1288_v60 = vadd.f32 %v6591_v36, %v1256_v51  ;;  %v942_v61 = vmax.f32 %v7737_v3, %v830_v41  ;;  %v4857_v17 = vpop.f32.mrb[57].mxu0  ;;  %v4944_v31 = vpop.f32.mrb[57].mxu1  ;;  %5504 = vmatprep.subr.bf16.mxu1 %v7736_v53 }
 0x155   :  { %v1313_v55 = vmax.f32 %v1288_v60, 0.0  ;;  %v1257_v56 = vmax.f32 %v942_v61, %v1145_v16  ;;  %v4168_v60 = vld [vmem:[%s7721_s3 + $0x68] sm:$0xff] }
 0x156   :  { %v835_v21 = vpop.f32.mrb[58].mxu0  ;;  %v1150_v50 = vpop.f32.mrb[58].mxu1  ;;  %v1362_v51 = vld [vmem:[#allocation2] sm:$0xff]  ;;  %5506 = vmatpush3.bf16.msra.mxu1 %v5505_v1  ;;  %v6640_v3 = vpack.c.bf16 %v4168_v60, %v4167_v11 }
 0x157   :  { %1339 = vst.msk [vmem:[#allocation2 + $0x10] sm:$0xff] %vm1336_vm5, %v1313_v55  ;;  %v1289_v2 = vadd.f32 %v6591_v36, %v1257_v56  ;;  %v943_v5 = vmax.f32 %v7738_v63, %v835_v21  ;;  %v4860_v41 = vpop.f32.mrb[59].mxu0  ;;  %v4947_v16 = vpop.f32.mrb[59].mxu1  ;;  %1374 = vst.msk [vmem:[#allocation3] sm:$0xff] %vm1336_vm5, %v1362_v51  ;;  %5507 = vmatprep.subr.bf16.mxu1 %v7736_v53 }
 0x158   :  { %5485 = vmatpush3.bf16.msra.mxu0 %v6640_v3 }
 0x159   :  { %v1314_v61 = vmax.f32 %v1289_v2, 0.0  ;;  %v1258_v17 = vmax.f32 %v943_v5, %v1150_v50  ;;  %v7739_v50 = vmax.f32 %v6449_v13, %v6451_v14  ;;  %5486 = vmatprep.subr.bf16.mxu0 %v7736_v53 }
 0x15a   :  { %v840_v31 = vpop.f32.mrb[60].mxu0  ;;  %v1459_v55 = vld [vmem:[#allocation2 + $0x2] sm:$0xff]  ;;  %v1155_v58 = vpop.f32.mrb[60].mxu1  ;;  %5509 = vmatpush3.bf16.msra.mxu1 %v5508_v26 }
 0x15b   :  { %v1386_v56 = vld [vmem:[#allocation2 + $0x1] sm:$0xff]  ;;  %1340 = vst.msk [vmem:[#allocation2 + $0x18] sm:$0xff] %vm1336_vm5, %v1314_v61  ;;  %v1290_v21 = vadd.f32 %v6591_v36, %v1258_v17  ;;  %v944_v51 = vmax.f32 %v7739_v50, %v840_v31  ;;  %1483 = vrot.lane.b32.xlu1 %v1459_v55, %s5714_s27  ;;  %v4863_v1 = vpop.f32.mrb[61].mxu0  ;;  %v4950_v2 = vpop.f32.mrb[61].mxu1  ;;  %5525 = vmatprep.subr.bf16.mxu1 %v7736_v53 }
 0x15c   :  { %1410 = vrot.lane.b32.xlu0 %v1386_v56, %s5715_s28  ;;  %v1363_v63 = vld [vmem:[#allocation2 + $0x8] sm:$0xff]  ;;  %v7740_v61 = vmax.f32 %v6455_v18, %v6457_v19  ;;  %v4170_v18 = vld [vmem:[%s7721_s3 + $0x78] sm:$0xff]  ;;  %v7741_v2 = vmax.f32 %v6461_v23, %v6463_v24  ;;  %v4171_v23 = vld [vmem:[%s7721_s3 + $0x80] sm:$0xff] }
 0x15d   :  { %1375 = vst.msk [vmem:[#allocation3 + $0x8] sm:$0xff] %vm1336_vm5, %v1363_v63  ;;  %v1315_v5 = vmax.f32 %v1290_v21, 0.0  ;;  %v1259_v41 = vmax.f32 %v944_v51, %v1155_v58  ;;  %v1532_v14 = vld [vmem:[#allocation2 + $0x3] sm:$0xff]  ;;  %v4169_v58 = vld [vmem:[%s7721_s3 + $0x70] sm:$0xff] }
 0x15e   :  { %v845_v13 = vpop.f32.mrb[62].mxu0  ;;  %v1387_v16 = vld [vmem:[#allocation2 + $0x9] sm:$0xff]  ;;  %v1160_v11 = vpop.f32.mrb[62].mxu1  ;;  %v6674_v51 = vpack.c.bf16 %v4170_v18, %v4169_v58 }
 0x15f   :  { %1341 = vst.msk [vmem:[#allocation2 + $0x20] sm:$0xff] %vm1336_vm5, %v1315_v5  ;;  %v1291_v60 = vadd.f32 %v6591_v36, %v1259_v41  ;;  %v945_v17 = vmax.f32 %v7740_v61, %v845_v13  ;;  %1556 = vrot.lane.b32.xlu1 %v1532_v14, %s5716_s29  ;;  %v4866_v8 = vpop.f32.mrb[63].mxu0  ;;  %v4953_v9 = vpop.f32.mrb[63].mxu1  ;;  %v1364_v31 = vld [vmem:[#allocation2 + $0x10] sm:$0xff]  ;;  %v1605_v26 = vld [vmem:[#allocation2 + $0x4] sm:$0xff] }
 0x160   :  { %1412 = vrot.lane.b32.xlu0 %v1387_v16, %s5715_s28  ;;  %1376 = vst.msk [vmem:[#allocation3 + $0x10] sm:$0xff] %vm1336_vm5, %v1364_v31  ;;  %v1606_v21 = vld [vmem:[#allocation2 + $0xc] sm:$0xff]  ;;  %5488 = vmatpush3.bf16.msra.mxu0 %v6674_v51  ;;  %v7742_v31 = vmax.f32 %v6467_v28, %v6469_v29  ;;  %v4174_v29 = vld [vmem:[%s7721_s3 + $0x98] sm:$0xff] }
 0x161   :  { %v1316_v55 = vmax.f32 %v1291_v60, 0.0  ;;  %v1260_v56 = vmax.f32 %v945_v17, %v1160_v11  ;;  %5489 = vmatprep.subr.bf16.mxu0 %v7736_v53  ;;  %v4172_v24 = vld [vmem:[%s7721_s3 + $0x88] sm:$0xff]  ;;  %v4173_v28 = vld [vmem:[%s7721_s3 + $0x90] sm:$0xff] }
 0x162   :  { %v850_v19 = vpop.f32.mrb[64].mxu0  ;;  %v1165_v50 = vpop.f32.mrb[64].mxu1  ;;  %v1365_v13 = vld [vmem:[#allocation2 + $0x18] sm:$0xff]  ;;  %v1460_v60 = vld [vmem:[#allocation2 + $0xa] sm:$0xff]  ;;  %v6692_v8 = vpack.c.bf16 %v4172_v24, %v4171_v23 }
 0x163   :  { %1342 = vst.msk [vmem:[#allocation2 + $0x28] sm:$0xff] %vm1336_vm5, %v1316_v55  ;;  %v1292_v1 = vadd.f32 %v6591_v36, %v1260_v56  ;;  %v946_v63 = vmax.f32 %v7741_v2, %v850_v19  ;;  %1629 = vrot.lane.b32.xlu1 %v1605_v26, %s5717_s12  ;;  %v4869_v5 = vpop.f32.mrb[65].mxu0  ;;  %v4956_v41 = vpop.f32.mrb[65].mxu1  ;;  %1377 = vst.msk [vmem:[#allocation3 + $0x18] sm:$0xff] %vm1336_vm5, %v1365_v13  ;;  %v1388_v61 = vld [vmem:[#allocation2 + $0x11] sm:$0xff] }
 0x164   :  { %1631 = vrot.lane.b32.xlu0 %v1606_v21, %s5717_s12  ;;  %5491 = vmatpush3.bf16.msra.mxu0 %v6692_v8  ;;  %v7743_v41 = vmax.f32 %v6473_v33, %v6475_v34 }
 0x165   :  { %v1317_v14 = vmax.f32 %v1292_v1, 0.0  ;;  %v1261_v16 = vmax.f32 %v946_v63, %v1165_v50  ;;  %5492 = vmatprep.subr.bf16.mxu0 %v7736_v53  ;;  %v1533_v50 = vld [vmem:[#allocation2 + $0xb] sm:$0xff]  ;;  %v1534_v1 = vld [vmem:[#allocation2 + $0x13] sm:$0xff]  ;;  %v6710_v63 = vpack.c.bf16 %v4174_v29, %v4173_v28 }
 0x166   :  { %v855_v11 = vpop.f32.mrb[66].mxu0  ;;  %v1170_v17 = vpop.f32.mrb[66].mxu1  ;;  %v1366_v18 = vld [vmem:[#allocation2 + $0x20] sm:$0xff]  ;;  %v1607_v28 = vld [vmem:[#allocation2 + $0x14] sm:$0xff] }
 0x167   :  { %1343 = vst.msk [vmem:[#allocation2 + $0x30] sm:$0xff] %vm1336_vm5, %v1317_v14  ;;  %v1293_v9 = vadd.f32 %v6591_v36, %v1261_v16  ;;  %v947_v55 = vmax.f32 %v7742_v31, %v855_v11  ;;  %1485 = vrot.lane.b32.xlu1 %v1460_v60, %s5714_s27  ;;  %v4872_v56 = vpop.f32.mrb[67].mxu0  ;;  %v4959_v58 = vpop.f32.mrb[67].mxu1  ;;  %1378 = vst.msk [vmem:[#allocation3 + $0x20] sm:$0xff] %vm1336_vm5, %v1366_v18  ;;  %v1462_v29 = vld [vmem:[#allocation2 + $0x1a] sm:$0xff] }
 0x168   :  { %1414 = vrot.lane.b32.xlu0 %v1388_v61, %s5715_s28  ;;  %5494 = vmatpush3.bf16.msra.mxu0 %v6710_v63  ;;  %v1461_v61 = vld [vmem:[#allocation2 + $0x12] sm:$0xff] }
 0x169   :  { %v1318_v19 = vmax.f32 %v1293_v9, 0.0  ;;  %v1262_v26 = vmax.f32 %v947_v55, %v1170_v17  ;;  %5510 = vmatprep.subr.bf16.mxu0 %v7736_v53  ;;  %v1389_v17 = vld [vmem:[#allocation2 + $0x19] sm:$0xff]  ;;  %v7744_v9 = vmax.f32 %v6479_v38, %v6481_v39  ;;  %v7745_v39 = vmax.f32 %v6485_v43, %v6487_v44 }
 0x16a   :  { %v860_v21 = vpop.f32.mrb[68].mxu0  ;;  %v1175_v2 = vpop.f32.mrb[68].mxu1  ;;  %v1367_v23 = vld [vmem:[#allocation2 + $0x28] sm:$0xff]  ;;  %v7746_v44 = vmax.f32 %v6491_v48, %v6493_v49  ;;  %v7747_v49 = vmax.f32 %v6497_v59, %v6499_v62  ;;  %v7748_v62 = vmax.f32 %v6503_v10, %v6505_v12  ;;  %v7749_v12 = vmax.f32 %v6509_v22, %v6511_v25 }
 0x16b   :  { %1344 = vst.msk [vmem:[#allocation2 + $0x38] sm:$0xff] %vm1336_vm5, %v1318_v19  ;;  %v1294_v5 = vadd.f32 %v6591_v36, %v1262_v26  ;;  %v948_v13 = vmax.f32 %v7743_v41, %v860_v21  ;;  %1558 = vrot.lane.b32.xlu1 %v1533_v50, %s5716_s29  ;;  %v4875_v14 = vpop.f32.mrb[69].mxu0  ;;  %v4962_v16 = vpop.f32.mrb[69].mxu1  ;;  %1379 = vst.msk [vmem:[#allocation3 + $0x28] sm:$0xff] %vm1336_vm5, %v1367_v23  ;;  %v1535_v23 = vld [vmem:[#allocation2 + $0x1b] sm:$0xff]  ;;  %v7750_v25 = vmax.f32 %v6515_v35, %v6517_v37 }
 0x16c   :  { %1560 = vrot.lane.b32.xlu0 %v1534_v1, %s5716_s29  ;;  %v1608_v16 = vld [vmem:[#allocation2 + $0x1c] sm:$0xff]  ;;  %v7751_v35 = vmax.f32 %v6521_v47, %v6523_v52  ;;  %v7752_v47 = vmax.f32 %v6527_v15, %v6529_v20  ;;  %v7753_v15 = vmax.f32 %v6533_v6, %v6535_v45  ;;  %v7754_v6 = vmax.f32 %v6539_v0, %v6541_v7 }
 0x16d   :  { %v1319_v24 = vmax.f32 %v1294_v5, 0.0  ;;  %v1263_v11 = vmax.f32 %v948_v13, %v1175_v2  ;;  %v7755_v0 = vmax.f32 %v6545_v32, %v6547_v40  ;;  %v7756_v32 = vmax.f32 %v6551_v57, %v6553_v30 }
 0x16e   :  { %v865_v60 = vpop.f32.mrb[70].mxu0  ;;  %v1180_v33 = vpop.f32.mrb[70].mxu1  ;;  %v1368_v58 = vld [vmem:[#allocation2 + $0x30] sm:$0xff]  ;;  %v7757_v57 = vmax.f32 %v6557_v27, %v6559_v4  ;;  %v7758_v27 = vmax.f32 %v6563_v42, %v6565_v46 }
 0x16f   :  { %1345 = vst.msk [vmem:[#allocation2 + $0x40] sm:$0xff] %vm1336_vm5, %v1319_v24  ;;  %v1295_v34 = vadd.f32 %v6591_v36, %v1263_v11  ;;  %v949_v31 = vmax.f32 %v7744_v9, %v865_v60  ;;  %1487 = vrot.lane.b32.xlu1 %v1461_v61, %s5714_s27  ;;  %v4878_v55 = vpop.f32.mrb[71].mxu0  ;;  %v4965_v56 = vpop.f32.mrb[71].mxu1  ;;  %1380 = vst.msk [vmem:[#allocation3 + $0x30] sm:$0xff] %vm1336_vm5, %v1368_v58 }
 0x170   :  { %1416 = vrot.lane.b32.xlu0 %v1389_v17, %s5715_s28  ;;  %v1390_v55 = vld [vmem:[#allocation2 + $0x21] sm:$0xff] }
 0x171   :  { %v1320_v18 = vmax.f32 %v1295_v34, 0.0  ;;  %v1264_v19 = vmax.f32 %v949_v31, %v1180_v33  ;;  %v1463_v31 = vld [vmem:[#allocation2 + $0x22] sm:$0xff] }
 0x172   :  { %v870_v26 = vpop.f32.mrb[72].mxu0  ;;  %v1185_v21 = vpop.f32.mrb[72].mxu1  ;;  %v1369_v5 = vld [vmem:[#allocation2 + $0x38] sm:$0xff] }
 0x173   :  { %1346 = vst.msk [vmem:[#allocation2 + $0x48] sm:$0xff] %vm1336_vm5, %v1320_v18  ;;  %v1296_v38 = vadd.f32 %v6591_v36, %v1264_v19  ;;  %v950_v50 = vmax.f32 %v7745_v39, %v870_v26  ;;  %1633 = vrot.lane.b32.xlu1 %v1607_v28, %s5717_s12  ;;  %v4881_v1 = vpop.f32.mrb[73].mxu0  ;;  %v4968_v2 = vpop.f32.mrb[73].mxu1  ;;  %1381 = vst.msk [vmem:[#allocation3 + $0x38] sm:$0xff] %vm1336_vm5, %v1369_v5  ;;  %v1536_v39 = vld [vmem:[#allocation2 + $0x23] sm:$0xff] }
 0x174   :  { %1489 = vrot.lane.b32.xlu0 %v1462_v29, %s5714_s27 }
 0x175   :  { %v1321_v41 = vmax.f32 %v1296_v38, 0.0  ;;  %v1265_v13 = vmax.f32 %v950_v50, %v1185_v21  ;;  %v1609_v38 = vld [vmem:[#allocation2 + $0x24] sm:$0xff] }
 0x176   :  { %v875_v14 = vpop.f32.mrb[74].mxu0  ;;  %v1190_v24 = vpop.f32.mrb[74].mxu1  ;;  %v1370_v17 = vld [vmem:[#allocation2 + $0x40] sm:$0xff] }
 0x177   :  { %1347 = vst.msk [vmem:[#allocation2 + $0x50] sm:$0xff] %vm1336_vm5, %v1321_v41  ;;  %v1297_v43 = vadd.f32 %v6591_v36, %v1265_v13  ;;  %v951_v11 = vmax.f32 %v7746_v44, %v875_v14  ;;  %1635 = vrot.lane.b32.xlu1 %v1608_v16, %s5717_s12  ;;  %v4884_v60 = vpop.f32.mrb[75].mxu0  ;;  %v4971_v61 = vpop.f32.mrb[75].mxu1  ;;  %1382 = vst.msk [vmem:[#allocation3 + $0x40] sm:$0xff] %vm1336_vm5, %v1370_v17 }
 0x178   :  { %1562 = vrot.lane.b32.xlu0 %v1535_v23, %s5716_s29  ;;  %v1464_v23 = vld [vmem:[#allocation2 + $0x2a] sm:$0xff] }
 0x179   :  { %v1322_v33 = vmax.f32 %v1297_v43, 0.0  ;;  %v1266_v34 = vmax.f32 %v951_v11, %v1190_v24  ;;  %v1391_v24 = vld [vmem:[#allocation2 + $0x29] sm:$0xff] }
 0x17a   :  { %v880_v9 = vpop.f32.mrb[76].mxu0  ;;  %v1195_v56 = vpop.f32.mrb[76].mxu1  ;;  %v1371_v26 = vld [vmem:[#allocation2 + $0x48] sm:$0xff] }
 0x17b   :  { %1348 = vst.msk [vmem:[#allocation2 + $0x58] sm:$0xff] %vm1336_vm5, %v1322_v33  ;;  %v1298_v48 = vadd.f32 %v6591_v36, %v1266_v34  ;;  %v952_v58 = vmax.f32 %v7747_v49, %v880_v9  ;;  %1491 = vrot.lane.b32.xlu1 %v1463_v31, %s5714_s27  ;;  %v4887_v18 = vpop.f32.mrb[77].mxu0  ;;  %v4974_v19 = vpop.f32.mrb[77].mxu1  ;;  %1383 = vst.msk [vmem:[#allocation3 + $0x48] sm:$0xff] %vm1336_vm5, %v1371_v26  ;;  %v1610_v9 = vld [vmem:[#allocation2 + $0x2c] sm:$0xff] }
 0x17c   :  { %1418 = vrot.lane.b32.xlu0 %v1390_v55, %s5715_s28  ;;  %v1537_v31 = vld [vmem:[#allocation2 + $0x2b] sm:$0xff] }
 0x17d   :  { %v1323_v28 = vmax.f32 %v1298_v48, 0.0  ;;  %v1267_v29 = vmax.f32 %v952_v58, %v1195_v56  ;;  %v1465_v26 = vld [vmem:[#allocation2 + $0x32] sm:$0xff] }
 0x17e   :  { %v885_v21 = vpop.f32.mrb[78].mxu0  ;;  %v1200_v50 = vpop.f32.mrb[78].mxu1  ;;  %v1372_v41 = vld [vmem:[#allocation2 + $0x50] sm:$0xff] }
 0x17f   :  { %1349 = vst.msk [vmem:[#allocation2 + $0x60] sm:$0xff] %vm1336_vm5, %v1323_v28  ;;  %v1299_v59 = vadd.f32 %v6591_v36, %v1267_v29  ;;  %v953_v1 = vmax.f32 %v7748_v62, %v885_v21  ;;  %1637 = vrot.lane.b32.xlu1 %v1609_v38, %s5717_s12  ;;  %v4890_v2 = vpop.f32.mrb[79].mxu0  ;;  %v4977_v5 = vpop.f32.mrb[79].mxu1  ;;  %1384 = vst.msk [vmem:[#allocation3 + $0x50] sm:$0xff] %vm1336_vm5, %v1372_v41  ;;  %v1392_v28 = vld [vmem:[#allocation2 + $0x31] sm:$0xff] }
 0x180   :  { %1564 = vrot.lane.b32.xlu0 %v1536_v39, %s5716_s29  ;;  %v1538_v2 = vld [vmem:[#allocation2 + $0x33] sm:$0xff] }
 0x181   :  { %v1324_v13 = vmax.f32 %v1299_v59, 0.0  ;;  %v1268_v14 = vmax.f32 %v953_v1, %v1200_v50  ;;  %v1611_v1 = vld [vmem:[#allocation2 + $0x34] sm:$0xff] }
 0x182   :  { %v890_v16 = vpop.f32.mrb[80].mxu0  ;;  %v1205_v43 = vpop.f32.mrb[80].mxu1  ;;  %v1373_v61 = vld [vmem:[#allocation2 + $0x58] sm:$0xff] }
 0x183   :  { %1350 = vst.msk [vmem:[#allocation2 + $0x68] sm:$0xff] %vm1336_vm5, %v1324_v13  ;;  %v1300_v10 = vadd.f32 %v6591_v36, %v1268_v14  ;;  %v954_v44 = vmax.f32 %v7749_v12, %v890_v16  ;;  %1493 = vrot.lane.b32.xlu1 %v1464_v23, %s5714_s27  ;;  %v4893_v11 = vpop.f32.mrb[81].mxu0  ;;  %v4980_v60 = vpop.f32.mrb[81].mxu1  ;;  %1385 = vst.msk [vmem:[#allocation3 + $0x58] sm:$0xff] %vm1336_vm5, %v1373_v61  ;;  %v1615_v46 = vld [vmem:[#allocation2 + $0x54] sm:$0xff] }
 0x184   :  { %1420 = vrot.lane.b32.xlu0 %v1391_v24, %s5715_s28 }
 0x185   :  { %v1325_v17 = vmax.f32 %v1300_v10, 0.0  ;;  %v1269_v33 = vmax.f32 %v954_v44, %v1205_v43  ;;  %v1466_v43 = vld [vmem:[#allocation2 + $0x3a] sm:$0xff] }
 0x186   :  { %v895_v34 = vpop.f32.mrb[82].mxu0  ;;  %v1210_v55 = vpop.f32.mrb[82].mxu1  ;;  %v1393_v10 = vld [vmem:[#allocation2 + $0x39] sm:$0xff] }
 0x187   :  { %1351 = vst.msk [vmem:[#allocation2 + $0x70] sm:$0xff] %vm1336_vm5, %v1325_v17  ;;  %v1301_v22 = vadd.f32 %v6591_v36, %v1269_v33  ;;  %v955_v56 = vmax.f32 %v7750_v25, %v895_v34  ;;  %1639 = vrot.lane.b32.xlu1 %v1610_v9, %s5717_s12  ;;  %v4896_v48 = vpop.f32.mrb[83].mxu0  ;;  %v4983_v49 = vpop.f32.mrb[83].mxu1  ;;  %v1612_v34 = vld [vmem:[#allocation2 + $0x3c] sm:$0xff] }
 0x188   :  { %1566 = vrot.lane.b32.xlu0 %v1537_v31, %s5716_s29  ;;  %v1539_v9 = vld [vmem:[#allocation2 + $0x3b] sm:$0xff] }
 0x189   :  { %v1326_v58 = vmax.f32 %v1301_v22, 0.0  ;;  %v1270_v18 = vmax.f32 %v955_v56, %v1210_v55 }
 0x18a   :  { %v900_v19 = vpop.f32.mrb[84].mxu0  ;;  %v1215_v29 = vpop.f32.mrb[84].mxu1 }
 0x18b   :  { %1352 = vst.msk [vmem:[#allocation2 + $0x78] sm:$0xff] %vm1336_vm5, %v1326_v58  ;;  %v1302_v21 = vadd.f32 %v6591_v36, %v1270_v18  ;;  %v956_v37 = vmax.f32 %v7751_v35, %v900_v19  ;;  %1495 = vrot.lane.b32.xlu1 %v1465_v26, %s5714_s27  ;;  %v4899_v38 = vpop.f32.mrb[85].mxu0  ;;  %v4986_v39 = vpop.f32.mrb[85].mxu1  ;;  %v1467_v58 = vld [vmem:[#allocation2 + $0x42] sm:$0xff] }
 0x18c   :  { %1422 = vrot.lane.b32.xlu0 %v1392_v28, %s5715_s28  ;;  %v1394_v18 = vld [vmem:[#allocation2 + $0x41] sm:$0xff] }
 0x18d   :  { %v1327_v50 = vmax.f32 %v1302_v21, 0.0  ;;  %v1271_v59 = vmax.f32 %v956_v37, %v1215_v29  ;;  %v1613_v38 = vld [vmem:[#allocation2 + $0x44] sm:$0xff] }
 0x18e   :  { %v905_v62 = vpop.f32.mrb[86].mxu0  ;;  %v1220_v5 = vpop.f32.mrb[86].mxu1  ;;  %v1540_v39 = vld [vmem:[#allocation2 + $0x43] sm:$0xff] }
 0x18f   :  { %1353 = vst.msk [vmem:[#allocation2 + $0x80] sm:$0xff] %vm1336_vm5, %v1327_v50  ;;  %v1303_v41 = vadd.f32 %v6591_v36, %v1271_v59  ;;  %v957_v52 = vmax.f32 %v7752_v47, %v905_v62  ;;  %1641 = vrot.lane.b32.xlu1 %v1611_v1, %s5717_s12  ;;  %v4902_v13 = vpop.f32.mrb[87].mxu0  ;;  %v4989_v14 = vpop.f32.mrb[87].mxu1  ;;  %v1468_v47 = vld [vmem:[#allocation2 + $0x4a] sm:$0xff] }
 0x190   :  { %1568 = vrot.lane.b32.xlu0 %v1538_v2, %s5716_s29 }
 0x191   :  { %v1328_v16 = vmax.f32 %v1303_v41, 0.0  ;;  %v1272_v23 = vmax.f32 %v957_v52, %v1220_v5  ;;  %v1395_v52 = vld [vmem:[#allocation2 + $0x49] sm:$0xff] }
 0x192   :  { %v910_v24 = vpop.f32.mrb[88].mxu0  ;;  %v1225_v12 = vpop.f32.mrb[88].mxu1 }
 0x193   :  { %1354 = vst.msk [vmem:[#allocation2 + $0x88] sm:$0xff] %vm1336_vm5, %v1328_v16  ;;  %v1304_v44 = vadd.f32 %v6591_v36, %v1272_v23  ;;  %v958_v20 = vmax.f32 %v7753_v15, %v910_v24  ;;  %1497 = vrot.lane.b32.xlu1 %v1466_v43, %s5714_s27  ;;  %v4905_v11 = vpop.f32.mrb[89].mxu0  ;;  %v4992_v60 = vpop.f32.mrb[89].mxu1 }
 0x194   :  { %1424 = vrot.lane.b32.xlu0 %v1393_v10, %s5715_s28 }
 0x195   :  { %v1329_v61 = vmax.f32 %v1304_v44, 0.0  ;;  %v1273_v17 = vmax.f32 %v958_v20, %v1225_v12  ;;  %v1614_v12 = vld [vmem:[#allocation2 + $0x4c] sm:$0xff] }
 0x196   :  { %v915_v33 = vpop.f32.mrb[90].mxu0  ;;  %v1230_v31 = vpop.f32.mrb[90].mxu1  ;;  %v1541_v44 = vld [vmem:[#allocation2 + $0x4b] sm:$0xff] }
 0x197   :  { %1355 = vst.msk [vmem:[#allocation2 + $0x90] sm:$0xff] %vm1336_vm5, %v1329_v61  ;;  %v1305_v55 = vadd.f32 %v6591_v36, %v1273_v17  ;;  %v959_v45 = vmax.f32 %v7754_v6, %v915_v33  ;;  %1643 = vrot.lane.b32.xlu1 %v1612_v34, %s5717_s12  ;;  %v4908_v22 = vpop.f32.mrb[91].mxu0  ;;  %v4995_v25 = vpop.f32.mrb[91].mxu1  ;;  %v1469_v33 = vld [vmem:[#allocation2 + $0x52] sm:$0xff] }
 0x198   :  { %1570 = vrot.lane.b32.xlu0 %v1539_v9, %s5716_s29  ;;  %v1396_v34 = vld [vmem:[#allocation2 + $0x51] sm:$0xff]  ;;  %v1543_v22 = vld [vmem:[#allocation2 + $0x5b] sm:$0xff] }
 0x199   :  { %v1330_v56 = vmax.f32 %v1305_v55, 0.0  ;;  %v1274_v48 = vmax.f32 %v959_v45, %v1230_v31  ;;  %v1542_v31 = vld [vmem:[#allocation2 + $0x53] sm:$0xff] }
 0x19a   :  { %v920_v49 = vpop.f32.mrb[92].mxu0  ;;  %v1235_v19 = vpop.f32.mrb[92].mxu1  ;;  %v1397_v55 = vld [vmem:[#allocation2 + $0x59] sm:$0xff] }
 0x19b   :  { %1356 = vst.msk [vmem:[#allocation2 + $0x98] sm:$0xff] %vm1336_vm5, %v1330_v56  ;;  %v1306_v26 = vadd.f32 %v6591_v36, %v1274_v48  ;;  %v960_v7 = vmax.f32 %v7755_v0, %v920_v49  ;;  %1499 = vrot.lane.b32.xlu1 %v1467_v58, %s5714_s27  ;;  %v4911_v28 = vpop.f32.mrb[93].mxu0  ;;  %v4998_v29 = vpop.f32.mrb[93].mxu1  ;;  %v2591_v6 = vld [vmem:[#allocation2 + $0x75] sm:$0xff]  ;;  %v2589_v49 = vld [vmem:[#allocation2 + $0x65] sm:$0xff] }
 0x19c   :  { %1426 = vrot.lane.b32.xlu0 %v1394_v18, %s5715_s28  ;;  %v2663_v45 = vld [vmem:[#allocation2 + $0x76] sm:$0xff]  ;;  %v2664_v58 = vld [vmem:[#allocation2 + $0x7e] sm:$0xff]  ;;  %v2590_v18 = vld [vmem:[#allocation2 + $0x6d] sm:$0xff] }
 0x19d   :  { %v1331_v21 = vmax.f32 %v1306_v26, 0.0  ;;  %v1275_v35 = vmax.f32 %v960_v7, %v1235_v19  ;;  %v2735_v25 = vld [vmem:[#allocation2 + $0x77] sm:$0xff]  ;;  %v2808_v19 = vld [vmem:[#allocation2 + $0x80] sm:$0xff]  ;;  %v2662_v26 = vld [vmem:[#allocation2 + $0x6e] sm:$0xff] }
 0x19e   :  { %v925_v37 = vpop.f32.mrb[94].mxu0  ;;  %v1240_v50 = vpop.f32.mrb[94].mxu1  ;;  %v1616_v56 = vld [vmem:[#allocation2 + $0x5c] sm:$0xff]  ;;  %v2665_v0 = vld [vmem:[#allocation2 + $0x86] sm:$0xff]  ;;  %v2734_v29 = vld [vmem:[#allocation2 + $0x6f] sm:$0xff] }
 0x19f   :  { %1357 = vst.msk [vmem:[#allocation2 + $0xa0] sm:$0xff] %vm1336_vm5, %v1331_v21  ;;  %v1307_v59 = vadd.f32 %v6591_v36, %v1275_v35  ;;  %v961_v40 = vmax.f32 %v7756_v32, %v925_v37  ;;  %1645 = vrot.lane.b32.xlu1 %v1613_v38, %s5717_s12  ;;  %v4914_v62 = vpop.f32.mrb[95].mxu0  ;;  %v5001_v1 = vpop.f32.mrb[95].mxu1  ;;  %v2807_v48 = vld [vmem:[#allocation2 + $0x78] sm:$0xff]  ;;  %v2809_v21 = vld [vmem:[#allocation2 + $0x88] sm:$0xff]  ;;  %v2806_v38 = vld [vmem:[#allocation2 + $0x70] sm:$0xff] }
 0x1a0   :  { %1572 = vrot.lane.b32.xlu0 %v1540_v39, %s5716_s29  ;;  %v2666_v39 = vld [vmem:[#allocation2 + $0x8e] sm:$0xff]  ;;  %v2592_v32 = vld [vmem:[#allocation2 + $0x7d] sm:$0xff] }
 0x1a1   :  { %v1332_v2 = vmax.f32 %v1307_v59, 0.0  ;;  %v1276_v5 = vmax.f32 %v961_v40, %v1240_v50  ;;  %v2810_v40 = vld [vmem:[#allocation2 + $0x90] sm:$0xff] }
 0x1a2   :  { %v930_v41 = vpop.f32.mrb[96].mxu0  ;;  %v1245_v13 = vpop.f32.mrb[96].mxu1 }
 0x1a3   :  { %1358 = vst.msk [vmem:[#allocation2 + $0xa8] sm:$0xff] %vm1336_vm5, %v1332_v2  ;;  %v1308_v14 = vadd.f32 %v6591_v36, %v1276_v5  ;;  %v962_v30 = vmax.f32 %v7757_v57, %v930_v41  ;;  %1501 = vrot.lane.b32.xlu1 %v1468_v47, %s5714_s27  ;;  %v4917_v16 = vpop.f32.mrb[97].mxu0  ;;  %v5004_v23 = vpop.f32.mrb[97].mxu1  ;;  %v4206_v2 = vld [vmem:[%s7721_s3 + $0xf0] sm:$0xff]  ;;  %v4207_v5 = vld [vmem:[%s7721_s3 + $0xf8] sm:$0xff] }
 0x1a4   :  { %1428 = vrot.lane.b32.xlu0 %v1395_v52, %s5715_s28  ;;  %v2736_v41 = vld [vmem:[#allocation2 + $0x7f] sm:$0xff]  ;;  %v2667_v47 = vld [vmem:[#allocation2 + $0x96] sm:$0xff]  ;;  %v6875_v52 = vpack.c.bf16 %v4207_v5, %v4206_v2  ;;  %v4209_v16 = vld [vmem:[%s7721_s3 + $0x108] sm:$0xff] }
 0x1a5   :  { %v1333_v24 = vmax.f32 %v1308_v14, 0.0  ;;  %v1277_v43 = vmax.f32 %v962_v30, %v1245_v13  ;;  %v4208_v13 = vld [vmem:[%s7721_s3 + $0x100] sm:$0xff]  ;;  %v4194_v5 = vld [vmem:[%s7721_s3 + $0xc8] sm:$0xff] }
 0x1a6   :  { %v935_v10 = vpop.f32.mrb[98].mxu0  ;;  %v1250_v15 = vpop.f32.mrb[98].mxu1  ;;  %v2565_v23 = vld [vmem:[#allocation2 + $0x64] sm:$0xff] }
 0x1a7   :  { %1359 = vst.msk [vmem:[#allocation2 + $0xb0] sm:$0xff] %vm1336_vm5, %v1333_v24  ;;  %v1309_v20 = vadd.f32 %v6591_v36, %v1277_v43  ;;  %v963_v4 = vmax.f32 %v7758_v27, %v935_v10  ;;  %1647 = vrot.lane.b32.xlu1 %v1614_v12, %s5717_s12  ;;  %v4920_v11 = vpop.f32.mrb[99].mxu0  ;;  %v5007_v60 = vpop.f32.mrb[99].mxu1  ;;  %v2593_v24 = vld [vmem:[#allocation2 + $0x85] sm:$0xff]  ;;  %v2811_v43 = vld [vmem:[#allocation2 + $0x98] sm:$0xff]  ;;  %v7759_v10 = vmov 0.0   ;;  %v6892_v12 = vpack.c.bf16 %v4209_v16, %v4208_v13 }
 0x1a8   :  { %1574 = vrot.lane.b32.xlu0 %v1541_v44, %s5716_s29  ;;  %v2737_v27 = vld [vmem:[#allocation2 + $0x87] sm:$0xff]  ;;  %v4211_v11 = vld [vmem:[%s7721_s3 + $0x118] sm:$0xff] }
 0x1a9   :  { %v1334_v61 = vmax.f32 %v1309_v20, 0.0  ;;  %v1278_v17 = vmax.f32 %v963_v4, %v1250_v15  ;;  %v4210_v20 = vld [vmem:[%s7721_s3 + $0x110] sm:$0xff]  ;;  %v2668_v4 = vld [vmem:[#allocation2 + $0x9e] sm:$0xff] }
 0x1aa   :  { %v2669_v2 = vld [vmem:[#allocation2 + $0xa6] sm:$0xff]  ;;  %v4196_v16 = vld [vmem:[%s7721_s3 + $0xd8] sm:$0xff] }
 0x1ab   :  { %1360 = vst.msk [vmem:[#allocation2 + $0xb8] sm:$0xff] %vm1336_vm5, %v1334_v61  ;;  %v1310_v9 = vadd.f32 %v6591_v36, %v1278_v17  ;;  %1503 = vrot.lane.b32.xlu1 %v1469_v33, %s5714_s27  ;;  %v1470_v36 = vld [vmem:[#allocation2 + $0x5a] sm:$0xff]  ;;  %v6908_v17 = vpack.c.bf16 %v4211_v11, %v4210_v20 }
 0x1ac   :  { %1430 = vrot.lane.b32.xlu0 %v1396_v34, %s5715_s28  ;;  %v4212_v33 = vld [vmem:[%s7721_s3 + $0x120] sm:$0xff] }
 0x1ad   :  { %v1335_v42 = vmax.f32 %v1310_v9, 0.0  ;;  %v2594_v9 = vld [vmem:[#allocation2 + $0x8d] sm:$0xff] }
 0x1af   :  { %1361 = vst.msk [vmem:[#allocation2 + $0xc0] sm:$0xff] %vm1336_vm5, %v1335_v42  ;;  %1649 = vrot.lane.b32.xlu1 %v1615_v46, %s5717_s12  ;;  %v4213_v42 = vld [vmem:[%s7721_s3 + $0x128] sm:$0xff]  ;;  %v2740_v46 = vld [vmem:[#allocation2 + $0x9f] sm:$0xff] }
 0x1b0   :  { %1576 = vrot.lane.b32.xlu0 %v1542_v31, %s5716_s29 }
 0x1b3   :  { %2617 = vrot.lane.b32.xlu1 %v2591_v6, %s5715_s28  ;;  %v6924_v6 = vpack.c.bf16 %v4213_v42, %v4212_v33  ;;  %v2813_v33 = vld [vmem:[#allocation2 + $0xa8] sm:$0xff] }
 0x1b4   :  { %1432 = vrot.lane.b32.xlu0 %v1397_v55, %s5715_s28 }
 0x1b7   :  { %2689 = vrot.lane.b32.xlu1 %v2663_v45, %s5714_s27  ;;  %v4189_v45 = vld [vmem:[%s7721_s3 + $0xa0] sm:$0xff] }
 0x1b8   :  { %1505 = vrot.lane.b32.xlu0 %v1470_v36, %s5714_s27  ;;  %v2738_v36 = vld [vmem:[#allocation2 + $0x8f] sm:$0xff] }
 0x1bb   :  { %2761 = vrot.lane.b32.xlu1 %v2735_v25, %s5716_s29  ;;  %v2812_v25 = vld [vmem:[#allocation2 + $0xa0] sm:$0xff] }
 0x1bc   :  { %1578 = vrot.lane.b32.xlu0 %v1543_v22, %s5716_s29  ;;  %v4190_v22 = vld [vmem:[%s7721_s3 + $0xa8] sm:$0xff] }
 0x1bf   :  { %2833 = vrot.lane.b32.xlu1 %v2807_v48, %s5717_s12  ;;  %v4215_v48 = vld [vmem:[%s7721_s3 + $0x138] sm:$0xff] }
 0x1c0   :  { %1651 = vrot.lane.b32.xlu0 %v1616_v56, %s5717_s12  ;;  %v4214_v56 = vld [vmem:[%s7721_s3 + $0x130] sm:$0xff] }
 0x1c3   :  { %2691 = vrot.lane.b32.xlu1 %v2664_v58, %s5714_s27 }
 0x1c4   :  { %2613 = vrot.lane.b32.xlu0 %v2589_v49, %s5715_s28 }
 0x1c7   :  { %2835 = vrot.lane.b32.xlu1 %v2808_v19, %s5717_s12 }
 0x1c8   :  { %2615 = vrot.lane.b32.xlu0 %v2590_v18, %s5715_s28 }
 0x1cb   :  { %2693 = vrot.lane.b32.xlu1 %v2665_v0, %s5714_s27  ;;  %v2566_v0 = vld [vmem:[#allocation2 + $0x6c] sm:$0xff] }
 0x1cc   :  { %2687 = vrot.lane.b32.xlu0 %v2662_v26, %s5714_s27  ;;  %v6944_v26 = vpack.c.bf16 %v4190_v22, %v4189_v45 }
 0x1cd   :  { %v1484_v7 = vpop.permute.xlu1 %1483 }
 0x1ce   :  { %v1411_v28 = vpop.permute.xlu0 %1410 }
 0x1cf   :  { %1447 = vst.msk [vmem:[#allocation3] sm:$0xff] %vm1446_vm6, %v1411_v28  ;;  %2837 = vrot.lane.b32.xlu1 %v2809_v21, %s5717_s12  ;;  %v6949_v28 = vpack.c.bf16 %v4215_v48, %v4214_v56  ;;  %v4191_v21 = vld [vmem:[%s7721_s3 + $0xb0] sm:$0xff] }
 0x1d0   :  { %2759 = vrot.lane.b32.xlu0 %v2734_v29, %s5716_s29  ;;  %1520 = vst.msk [vmem:[#allocation3] sm:$0xff] %vm1519_vm7, %v1484_v7  ;;  %v2595_v7 = vld [vmem:[#allocation2 + $0x95] sm:$0xff]  ;;  %v2597_v29 = vld [vmem:[#allocation2 + $0xa5] sm:$0xff] }
 0x1d1   :  { %v1557_v35 = vpop.permute.xlu1 %1556 }
 0x1d2   :  { %v1413_v37 = vpop.permute.xlu0 %1412  ;;  %1593 = vst.msk [vmem:[#allocation3] sm:$0xff] %vm1592_vm8, %v1557_v35  ;;  %v4192_v35 = vld [vmem:[%s7721_s3 + $0xb8] sm:$0xff] }
 0x1d3   :  { %1448 = vst.msk [vmem:[#allocation3 + $0x8] sm:$0xff] %vm1446_vm6, %v1413_v37  ;;  %2695 = vrot.lane.b32.xlu1 %v2666_v39, %s5714_s27  ;;  %v2567_v37 = vld [vmem:[#allocation2 + $0x74] sm:$0xff] }
 0x1d4   :  { %2831 = vrot.lane.b32.xlu0 %v2806_v38, %s5717_s12 }
 0x1d5   :  { %v1630_v50 = vpop.permute.xlu1 %1629 }
 0x1d6   :  { %v1632_v59 = vpop.permute.xlu0 %1631  ;;  %1666 = vst.msk [vmem:[#allocation3] sm:$0xff] %vm1665_vm9, %v1630_v50  ;;  %v4193_v50 = vld [vmem:[%s7721_s3 + $0xc0] sm:$0xff] }
 0x1d7   :  { %2839 = vrot.lane.b32.xlu1 %v2810_v40, %s5717_s12  ;;  %v6992_v13 = vpack.c.bf16 %v4194_v5, %v4193_v50  ;;  %v2599_v50 = vld [vmem:[#allocation2 + $0xb5] sm:$0xff] }
 0x1d8   :  { %2619 = vrot.lane.b32.xlu0 %v2592_v32, %s5715_s28  ;;  %v2743_v5 = vld [vmem:[#allocation2 + $0xb7] sm:$0xff] }
 0x1d9   :  { %v1486_v62 = vpop.permute.xlu1 %1485 }
 0x1da   :  { %v1415_v1 = vpop.permute.xlu0 %1414  ;;  %1521 = vst.msk [vmem:[#allocation3 + $0x8] sm:$0xff] %vm1519_vm7, %v1486_v62  ;;  %v6975_v62 = vpack.c.bf16 %v4192_v35, %v4191_v21 }
 0x1db   :  { %1449 = vst.msk [vmem:[#allocation3 + $0x10] sm:$0xff] %vm1446_vm6, %v1415_v1  ;;  %2697 = vrot.lane.b32.xlu1 %v2667_v47, %s5714_s27  ;;  %v2739_v1 = vld [vmem:[#allocation2 + $0x97] sm:$0xff] }
 0x1dc   :  { %2763 = vrot.lane.b32.xlu0 %v2736_v41, %s5716_s29 }
 0x1dd   :  { %v1559_v14 = vpop.permute.xlu1 %1558  ;;  %v1678_v30 = vld [vmem:[#allocation3] sm:$0xff] }
 0x1de   :  { %v1561_v57 = vpop.permute.xlu0 %1560  ;;  %1594 = vst.msk [vmem:[#allocation3 + $0x8] sm:$0xff] %vm1592_vm8, %v1559_v14  ;;  %5070 = vmatmul.mubr.msk.f32.vlgmr.msra.gmra.mrb[100].mxu1 %vm1713_vm10, %v1678_v30  ;;  %v4195_v14 = vld [vmem:[%s7721_s3 + $0xd0] sm:$0xff]  ;;  %v2741_v30 = vld [vmem:[#allocation2 + $0xa7] sm:$0xff] }
 0x1df   :  { %2577 = vst.msk [vmem:[#allocation3] sm:$0xff] %vm1336_vm5, %v2565_v23  ;;  %2841 = vrot.lane.b32.xlu1 %v2811_v43, %s5717_s12  ;;  %5072 = vmatprep.mubr.msk.f32.mxu1 %vm5711_vm0, %v7759_v10  ;;  %v2568_v23 = vld [vmem:[#allocation2 + $0x7c] sm:$0xff] }
 0x1e0   :  { %1667 = vst.msk [vmem:[#allocation3 + $0x8] sm:$0xff] %vm1665_vm9, %v1632_v59  ;;  %2621 = vrot.lane.b32.xlu0 %v2593_v24, %s5715_s28  ;;  %5527 = vmatpush3.bf16.msra.mxu1 %v6875_v52 }
 0x1e1   :  { %v1488_v44 = vpop.permute.xlu1 %1487  ;;  %5528 = vmatprep.subr.bf16.mxu1 %v7736_v53 }
 0x1e2   :  { %v1417_v15 = vpop.permute.xlu0 %1416  ;;  %1522 = vst.msk [vmem:[#allocation3 + $0x10] sm:$0xff] %vm1519_vm7, %v1488_v44  ;;  %v2661_v44 = vld [vmem:[#allocation2 + $0x66] sm:$0xff] }
 0x1e3   :  { %1450 = vst.msk [vmem:[#allocation3 + $0x18] sm:$0xff] %vm1446_vm6, %v1417_v15  ;;  %2699 = vrot.lane.b32.xlu1 %v2668_v4, %s5714_s27  ;;  %v7011_v4 = vpack.c.bf16 %v4196_v16, %v4195_v14 }
 0x1e4   :  { %1595 = vst.msk [vmem:[#allocation3 + $0x10] sm:$0xff] %vm1592_vm8, %v1561_v57  ;;  %2765 = vrot.lane.b32.xlu0 %v2737_v27, %s5716_s29  ;;  %5530 = vmatpush3.bf16.msra.mxu1 %v6892_v12  ;;  %v2596_v57 = vld [vmem:[#allocation2 + $0x9d] sm:$0xff] }
 0x1e5   :  { %v1634_v60 = vpop.permute.xlu1 %1633  ;;  %5531 = vmatprep.subr.bf16.mxu1 %v7736_v53 }
 0x1e6   :  { %v1490_v61 = vpop.permute.xlu0 %1489  ;;  %1668 = vst.msk [vmem:[#allocation3 + $0x10] sm:$0xff] %vm1665_vm9, %v1634_v60  ;;  %v4197_v60 = vld [vmem:[%s7721_s3 + $0xe0] sm:$0xff] }
 0x1e7   :  { %1523 = vst.msk [vmem:[#allocation3 + $0x18] sm:$0xff] %vm1519_vm7, %v1490_v61  ;;  %v1679_v34 = vld [vmem:[#allocation3 + $0x8] sm:$0xff]  ;;  %2771 = vrot.lane.b32.xlu1 %v2740_v46, %s5716_s29  ;;  %v4198_v61 = vld [vmem:[%s7721_s3 + $0xe8] sm:$0xff] }
 0x1e8   :  { %5073 = vmatmul.mubr.msk.f32.gmra.mrb[102].mxu1 %vm1713_vm10, %v1679_v34  ;;  %2623 = vrot.lane.b32.xlu0 %v2594_v9, %s5715_s28  ;;  %v7032_v42 = vpack.c.bf16 %v4198_v61, %v4197_v60  ;;  %v2733_v46 = vld [vmem:[#allocation2 + $0x67] sm:$0xff] }
 0x1e9   :  { %5075 = vmatprep.mubr.msk.f32.mxu1 %vm5711_vm0, %v7759_v10  ;;  %v1636_v31 = vpop.permute.xlu1 %1635  ;;  %5533 = vmatpush3.bf16.msra.mxu1 %v6908_v17 }
 0x1ea   :  { %v1563_v55 = vpop.permute.xlu0 %1562  ;;  %5534 = vmatprep.subr.bf16.mxu1 %v7736_v53 }
 0x1eb   :  { %1596 = vst.msk [vmem:[#allocation3 + $0x18] sm:$0xff] %vm1592_vm8, %v1563_v55  ;;  %2843 = vrot.lane.b32.xlu1 %v2812_v25, %s5717_s12  ;;  %v2569_v55 = vld [vmem:[#allocation2 + $0x84] sm:$0xff] }
 0x1ec   :  { %1669 = vst.msk [vmem:[#allocation3 + $0x18] sm:$0xff] %vm1665_vm9, %v1636_v31  ;;  %2767 = vrot.lane.b32.xlu0 %v2738_v36, %s5716_s29  ;;  %v2805_v31 = vld [vmem:[#allocation2 + $0x68] sm:$0xff] }
 0x1ed   :  { %v1492_v49 = vpop.permute.xlu1 %1491  ;;  %v1695_v18 = vld [vmem:[#allocation3 + $0xa] sm:$0xff]  ;;  %5536 = vmatpush3.bf16.msra.mxu1 %v6924_v6 }
 0x1ee   :  { %v1419_v58 = vpop.permute.xlu0 %1418  ;;  %v1680_v19 = vld [vmem:[#allocation3 + $0x10] sm:$0xff]  ;;  %5029 = vmatmul.mubr.msk.f32.vlgmr.msra.gmra.mrb[100].mxu0 %vm1713_vm10, %v1695_v18  ;;  %2578 = vst.msk [vmem:[#allocation3 + $0x8] sm:$0xff] %vm1336_vm5, %v2566_v0  ;;  %5537 = vmatprep.subr.bf16.mxu1 %v7736_v53  ;;  %v2742_v0 = vld [vmem:[#allocation2 + $0xaf] sm:$0xff] }
 0x1ef   :  { %1451 = vst.msk [vmem:[#allocation3 + $0x20] sm:$0xff] %vm1446_vm6, %v1419_v58  ;;  %5076 = vmatmul.mubr.msk.f32.gmra.mrb[104].mxu1 %vm1713_vm10, %v1680_v19  ;;  %5031 = vmatprep.mubr.msk.f32.mxu0 %vm5711_vm0, %v7759_v10  ;;  %v2670_v58 = vld [vmem:[#allocation2 + $0xae] sm:$0xff] }
 0x1f0   :  { %1524 = vst.msk [vmem:[#allocation3 + $0x20] sm:$0xff] %vm1519_vm7, %v1492_v49  ;;  %2625 = vrot.lane.b32.xlu0 %v2595_v7, %s5715_s28  ;;  %2629 = vrot.lane.b32.xlu1 %v2597_v29, %s5715_s28  ;;  %v2598_v49 = vld [vmem:[#allocation2 + $0xad] sm:$0xff] }
 0x1f1   :  { %5078 = vmatprep.mubr.msk.f32.mxu1 %vm5711_vm0, %v7759_v10  ;;  %v1638_v38 = vpop.permute.xlu1 %1637  ;;  %5512 = vmatpush3.bf16.msra.mxu0 %v6944_v26  ;;  %v2814_v7 = vld [vmem:[#allocation2 + $0xb0] sm:$0xff] }
 0x1f2   :  { %v1565_v39 = vpop.permute.xlu0 %1564  ;;  %5539 = vmatpush3.bf16.msra.mxu1 %v6949_v28  ;;  %5513 = vmatprep.subr.bf16.mxu0 %v7736_v53 }
 0x1f3   :  { %v1696_v59 = vld [vmem:[#allocation3 + $0x12] sm:$0xff]  ;;  %1597 = vst.msk [vmem:[#allocation3 + $0x20] sm:$0xff] %vm1592_vm8, %v1565_v39  ;;  %5555 = vmatprep.subr.bf16.mxu1 %v7736_v53  ;;  %v2570_v39 = vld [vmem:[#allocation2 + $0x8c] sm:$0xff] }
 0x1f4   :  { %v6970_v32 = vld [vmem:[#allocation3 + $0x14] sm:$0xff]  ;;  %1670 = vst.msk [vmem:[#allocation3 + $0x20] sm:$0xff] %vm1665_vm9, %v1638_v38  ;;  %5032 = vmatmul.mubr.msk.f32.gmra.mrb[102].mxu0 %vm1713_vm10, %v1696_v59  ;;  %2769 = vrot.lane.b32.xlu0 %v2739_v1, %s5716_s29 }
 0x1f5   :  { %v1681_v40 = vld [vmem:[#allocation3 + $0x18] sm:$0xff]  ;;  %2579 = vst.msk [vmem:[#allocation3 + $0x10] sm:$0xff] %vm1336_vm5, %v2567_v37  ;;  %2701 = vrot.lane.b32.xlu1 %v2669_v2, %s5714_s27  ;;  %v1494_v41 = vpop.permute.xlu1 %1493  ;;  %5034 = vmatprep.mubr.msk.f32.mxu0 %vm5711_vm0, %v7759_v10 }
 0x1f6   :  { %5079 = vmatmul.mubr.msk.f32.gmra.mrb[106].mxu1 %vm1713_vm10, %v1681_v40  ;;  %v1421_v47 = vpop.permute.xlu0 %1420  ;;  %5515 = vmatpush3.bf16.msra.mxu0 %v6975_v62  ;;  %v2671_v40 = vld [vmem:[#allocation2 + $0xb6] sm:$0xff] }
 0x1f7   :  { %5081 = vmatprep.mubr.msk.f32.mxu1 %vm5711_vm0, %v7759_v10  ;;  %1452 = vst.msk [vmem:[#allocation3 + $0x28] sm:$0xff] %vm1446_vm6, %v1421_v47  ;;  %5516 = vmatprep.subr.bf16.mxu0 %v7736_v53  ;;  %v2571_v47 = vld [vmem:[#allocation2 + $0x94] sm:$0xff] }
 0x1f8   :  { %1525 = vst.msk [vmem:[#allocation3 + $0x28] sm:$0xff] %vm1519_vm7, %v1494_v41  ;;  %2627 = vrot.lane.b32.xlu0 %v2596_v57, %s5715_s28  ;;  %v2815_v41 = vld [vmem:[#allocation2 + $0xb8] sm:$0xff] }
 0x1f9   :  { %2773 = vrot.lane.b32.xlu1 %v2741_v30, %s5716_s29  ;;  %v1640_v24 = vpop.permute.xlu1 %1639 }
 0x1fa   :  { %v1567_v43 = vpop.permute.xlu0 %1566  ;;  %5518 = vmatpush3.bf16.msra.mxu0 %v6992_v13 }
 0x1fb   :  { %v1697_v15 = vld [vmem:[#allocation3 + $0x1a] sm:$0xff]  ;;  %1598 = vst.msk [vmem:[#allocation3 + $0x28] sm:$0xff] %vm1592_vm8, %v1567_v43  ;;  %5519 = vmatprep.subr.bf16.mxu0 %v7736_v53 }
 0x1fc   :  { %v7005_v20 = vld [vmem:[#allocation3 + $0x1c] sm:$0xff]  ;;  %1671 = vst.msk [vmem:[#allocation3 + $0x28] sm:$0xff] %vm1665_vm9, %v1640_v24  ;;  %5035 = vmatmul.mubr.msk.f32.gmra.mrb[104].mxu0 %vm1713_vm10, %v1697_v15  ;;  %2685 = vrot.lane.b32.xlu0 %v2661_v44, %s5714_s27 }
 0x1fd   :  { %v7007_v27 = vld [vmem:[#allocation3 + $0x1e] sm:$0xff]  ;;  %2845 = vrot.lane.b32.xlu1 %v2813_v33, %s5717_s12  ;;  %v1496_v34 = vpop.permute.xlu1 %1495  ;;  %5037 = vmatprep.mubr.msk.f32.mxu0 %vm5711_vm0, %v7759_v10  ;;  %v2600_v24 = vld [vmem:[#allocation2 + $0xbd] sm:$0xff] }
 0x1fe   :  { %2580 = vst.msk [vmem:[#allocation3 + $0x18] sm:$0xff] %vm1336_vm5, %v2568_v23  ;;  %v1682_v11 = vld [vmem:[#allocation3 + $0x20] sm:$0xff]  ;;  %v1423_v9 = vpop.permute.xlu0 %1422  ;;  %5521 = vmatpush3.bf16.msra.mxu0 %v7011_v4  ;;  %v2672_v43 = vld [vmem:[#allocation2 + $0xbe] sm:$0xff] }
 0x1ff   :  { %5082 = vmatmul.mubr.msk.f32.gmra.mrb[108].mxu1 %vm1713_vm10, %v1682_v11  ;;  %1453 = vst.msk [vmem:[#allocation3 + $0x30] sm:$0xff] %vm1446_vm6, %v1423_v9  ;;  %5522 = vmatprep.subr.bf16.mxu0 %v7736_v53  ;;  %v2744_v15 = vld [vmem:[#allocation2 + $0xbf] sm:$0xff]  ;;  %v4224_v33 = vld [vmem:[%s7721_s3 + $0x148] sm:$0xff] }
 0x200   :  { %5084 = vmatprep.mubr.msk.f32.mxu1 %vm5711_vm0, %v7759_v10  ;;  %1526 = vst.msk [vmem:[#allocation3 + $0x30] sm:$0xff] %vm1519_vm7, %v1496_v34  ;;  %2757 = vrot.lane.b32.xlu0 %v2733_v46, %s5716_s29  ;;  %v2816_v11 = vld [vmem:[#allocation2 + $0xc0] sm:$0xff] }
 0x201   :  { %2829 = vrot.lane.b32.xlu1 %v2805_v31, %s5717_s12  ;;  %v1642_v36 = vpop.permute.xlu1 %1641 }
 0x202   :  { %v1569_v45 = vpop.permute.xlu0 %1568  ;;  %5524 = vmatpush3.bf16.msra.mxu0 %v7032_v42 }
 0x203   :  { %v1698_v22 = vld [vmem:[#allocation3 + $0x22] sm:$0xff]  ;;  %1599 = vst.msk [vmem:[#allocation3 + $0x30] sm:$0xff] %vm1592_vm8, %v1569_v45  ;;  %5540 = vmatprep.subr.bf16.mxu0 %v7736_v53 }
 0x204   :  { %v7038_v25 = vld [vmem:[#allocation3 + $0x24] sm:$0xff]  ;;  %1672 = vst.msk [vmem:[#allocation3 + $0x30] sm:$0xff] %vm1665_vm9, %v1642_v36  ;;  %5038 = vmatmul.mubr.msk.f32.gmra.mrb[106].mxu0 %vm1713_vm10, %v1698_v22  ;;  %2631 = vrot.lane.b32.xlu0 %v2598_v49, %s5715_s28  ;;  %v4226_v22 = vld [vmem:[%s7721_s3 + $0x158] sm:$0xff] }
 0x205   :  { %v2103_v56 = vld [vmem:[#allocation3 + $0x26] sm:$0xff]  ;;  %2703 = vrot.lane.b32.xlu1 %v2670_v58, %s5714_s27  ;;  %v1498_v18 = vpop.permute.xlu1 %1497  ;;  %5040 = vmatprep.mubr.msk.f32.mxu0 %vm5711_vm0, %v7759_v10 }
 0x206   :  { %2581 = vst.msk [vmem:[#allocation3 + $0x20] sm:$0xff] %vm1336_vm5, %v2569_v55  ;;  %v7045_v48 = vld [vmem:[#allocation3 + $0x28] sm:$0xff]  ;;  %v1425_v19 = vpop.permute.xlu0 %1424 }
 0x207   :  { %5085 = vmatmul.mubr.msk.f32.gmra.mrb[110].mxu1 %vm1713_vm10, %v7045_v48  ;;  %1454 = vst.msk [vmem:[#allocation3 + $0x38] sm:$0xff] %vm1446_vm6, %v1425_v19 }
 0x208   :  { %5087 = vmatprep.mubr.msk.f32.mxu1 %vm5711_vm0, %v7759_v10  ;;  %1527 = vst.msk [vmem:[#allocation3 + $0x38] sm:$0xff] %vm1519_vm7, %v1498_v18  ;;  %2775 = vrot.lane.b32.xlu0 %v2742_v0, %s5716_s29 }
 0x209   :  { %2847 = vrot.lane.b32.xlu1 %v2814_v7, %s5717_s12  ;;  %v1644_v29 = vpop.permute.xlu1 %1643 }
 0x20a   :  { %v1571_v21 = vpop.permute.xlu0 %1570 }
 0x20b   :  { %1600 = vst.msk [vmem:[#allocation3 + $0x38] sm:$0xff] %vm1592_vm8, %v1571_v21  ;;  %v1699_v35 = vld [vmem:[#allocation3 + $0x2a] sm:$0xff] }
 0x20c   :  { %v7061_v37 = vld [vmem:[#allocation3 + $0x30] sm:$0xff]  ;;  %1673 = vst.msk [vmem:[#allocation3 + $0x38] sm:$0xff] %vm1665_vm9, %v1644_v29  ;;  %5041 = vmatmul.mubr.msk.f32.gmra.mrb[108].mxu0 %vm1713_vm10, %v1699_v35  ;;  %2633 = vrot.lane.b32.xlu0 %v2599_v50, %s5715_s28 }
 0x20d   :  { %v2104_v38 = vld [vmem:[#allocation3 + $0x2e] sm:$0xff]  ;;  %5088 = vmatmul.mubr.msk.f32.gmra.mrb[112].mxu1 %vm1713_vm10, %v7061_v37  ;;  %2705 = vrot.lane.b32.xlu1 %v2671_v40, %s5714_s27  ;;  %v1500_v1 = vpop.permute.xlu1 %1499 }
 0x20e   :  { %v7067_v59 = vld [vmem:[#allocation3 + $0x2c] sm:$0xff]  ;;  %5151 = vmatprep.mubr.msk.f32.mxu1 %vm5711_vm0, %v7759_v10  ;;  %v1427_v2 = vpop.permute.xlu0 %1426  ;;  %5043 = vmatprep.mubr.msk.f32.mxu0 %vm5711_vm0, %v7759_v10 }
 0x20f   :  { %2582 = vst.msk [vmem:[#allocation3 + $0x28] sm:$0xff] %vm1336_vm5, %v2570_v39  ;;  %v4230_v35 = vld [vmem:[%s7721_s3 + $0x178] sm:$0xff] }
 0x210   :  { %1455 = vst.msk [vmem:[#allocation3 + $0x40] sm:$0xff] %vm1446_vm6, %v1427_v2  ;;  %2777 = vrot.lane.b32.xlu0 %v2743_v5, %s5716_s29  ;;  %v4232_v2 = vld [vmem:[%s7721_s3 + $0x188] sm:$0xff]  ;;  %v2575_v5 = vld [vmem:[#allocation2 + $0xb4] sm:$0xff] }
 0x211   :  { %1528 = vst.msk [vmem:[#allocation3 + $0x40] sm:$0xff] %vm1519_vm7, %v1500_v1  ;;  %5152 = vmatmul.mubr.msk.f32.vlgmr.msra.gmra.mrb[114].mxu1 %vm1713_vm10, %v7007_v27  ;;  %2849 = vrot.lane.b32.xlu1 %v2815_v41, %s5717_s12  ;;  %v1646_v14 = vpop.permute.xlu1 %1645  ;;  %v2572_v27 = vld [vmem:[#allocation2 + $0x9c] sm:$0xff] }
 0x212   :  { %5154 = vmatprep.mubr.msk.f32.mxu1 %vm5711_vm0, %v7759_v10  ;;  %v1573_v57 = vpop.permute.xlu0 %1572  ;;  %5557 = vmatpush3.bf16.msra.mxu1 %v6578_v54  ;;  %v4231_v1 = vld [vmem:[%s7721_s3 + $0x180] sm:$0xff] }
 0x213   :  { %1601 = vst.msk [vmem:[#allocation3 + $0x40] sm:$0xff] %vm1592_vm8, %v1573_v57  ;;  %v1700_v30 = vld [vmem:[#allocation3 + $0x32] sm:$0xff]  ;;  %5558 = vmatprep.subr.bf16.mxu1 %v7736_v53 }
 0x214   :  { %v2105_v16 = vld [vmem:[#allocation3 + $0x36] sm:$0xff]  ;;  %1674 = vst.msk [vmem:[#allocation3 + $0x40] sm:$0xff] %vm1665_vm9, %v1646_v14  ;;  %5044 = vmatmul.mubr.msk.f32.gmra.mrb[110].mxu0 %vm1713_vm10, %v1700_v30  ;;  %2635 = vrot.lane.b32.xlu0 %v2600_v24, %s5715_s28  ;;  %v7216_v30 = vpack.c.bf16 %v4232_v2, %v4231_v1 }
 0x215   :  { %v7086_v23 = vld [vmem:[#allocation3 + $0x34] sm:$0xff]  ;;  %5155 = vmatmul.mubr.msk.f32.gmra.mrb[116].mxu1 %vm1713_vm10, %v2103_v56  ;;  %2707 = vrot.lane.b32.xlu1 %v2672_v43, %s5714_s27  ;;  %v1502_v54 = vpop.permute.xlu1 %1501  ;;  %v2573_v56 = vld [vmem:[#allocation2 + $0xa4] sm:$0xff] }
 0x216   :  { %2583 = vst.msk [vmem:[#allocation3 + $0x30] sm:$0xff] %vm1336_vm5, %v2571_v47  ;;  %5157 = vmatprep.mubr.msk.f32.mxu1 %vm5711_vm0, %v7759_v10  ;;  %v1429_v44 = vpop.permute.xlu0 %1428  ;;  %5046 = vmatprep.mubr.msk.f32.mxu0 %vm5711_vm0, %v7759_v10  ;;  %v7114_v34 = vld [vmem:[#allocation3 + $0x38] sm:$0xff] }
 0x217   :  { %1456 = vst.msk [vmem:[#allocation3 + $0x48] sm:$0xff] %vm1446_vm6, %v1429_v44  ;;  %5560 = vmatpush3.bf16.msra.mxu1 %v6640_v3  ;;  %v4223_v3 = vld [vmem:[%s7721_s3 + $0x140] sm:$0xff] }
 0x218   :  { %1529 = vst.msk [vmem:[#allocation3 + $0x48] sm:$0xff] %vm1519_vm7, %v1502_v54  ;;  %5561 = vmatprep.subr.bf16.mxu1 %v7736_v53  ;;  %2779 = vrot.lane.b32.xlu0 %v2744_v15, %s5716_s29  ;;  %v7128_v45 = vpack.c.bf16 %v4224_v33, %v4223_v3  ;;  %v2884_v43 = vld [vmem:[%s7721_s3] sm:$0xff]  ;;  %v2885_v54 = vld [vmem:[%s7721_s3 + $0x8] sm:$0xff]  ;;  %v2887_v3 = vld [vmem:[%s7721_s3 + $0x18] sm:$0xff] }
 0x219   :  { %5158 = vmatmul.mubr.msk.f32.gmra.mrb[118].mxu1 %vm1713_vm10, %v2104_v38  ;;  %2851 = vrot.lane.b32.xlu1 %v2816_v11, %s5717_s12  ;;  %v1648_v60 = vpop.permute.xlu1 %1647  ;;  %v2574_v38 = vld [vmem:[#allocation2 + $0xac] sm:$0xff]  ;;  %v5571_v44 = vpack.c.bf16 %v2885_v54, %v2884_v43  ;;  %v2576_v15 = vld [vmem:[#allocation2 + $0xbc] sm:$0xff] }
 0x21a   :  { %5160 = vmatprep.mubr.msk.f32.mxu1 %vm5711_vm0, %v7759_v10  ;;  %v1575_v61 = vpop.permute.xlu0 %1574 }
 0x21b   :  { %1602 = vst.msk [vmem:[#allocation3 + $0x48] sm:$0xff] %vm1592_vm8, %v1575_v61  ;;  %v1701_v9 = vld [vmem:[#allocation3 + $0x3a] sm:$0xff]  ;;  %5563 = vmatpush3.bf16.msra.mxu1 %v6674_v51  ;;  %v4225_v51 = vld [vmem:[%s7721_s3 + $0x150] sm:$0xff] }
 0x21c   :  { %v2106_v46 = vld [vmem:[#allocation3 + $0x3e] sm:$0xff]  ;;  %1675 = vst.msk [vmem:[#allocation3 + $0x48] sm:$0xff] %vm1665_vm9, %v1648_v60  ;;  %5047 = vmatmul.mubr.msk.f32.gmra.mrb[112].mxu0 %vm1713_vm10, %v1701_v9  ;;  %5564 = vmatprep.subr.bf16.mxu1 %v7736_v53  ;;  %v7148_v18 = vpack.c.bf16 %v4226_v22, %v4225_v51  ;;  %v2886_v61 = vld [vmem:[%s7721_s3 + $0x10] sm:$0xff] }
 0x21d   :  { %v7117_v31 = vld [vmem:[#allocation3 + $0x3c] sm:$0xff]  ;;  %5161 = vmatmul.mubr.msk.f32.gmra.mrb[120].mxu1 %vm1713_vm10, %v2105_v16  ;;  %5110 = vmatprep.mubr.msk.f32.mxu0 %vm5711_vm0, %v7759_v10  ;;  %v1504_v55 = vpop.permute.xlu1 %1503  ;;  %v5574_v33 = vpack.c.bf16 %v2887_v3, %v2886_v61  ;;  %v2890_v22 = vld [vmem:[%s7721_s3 + $0x30] sm:$0xff] }
 0x21e   :  { %2584 = vst.msk [vmem:[#allocation3 + $0x38] sm:$0xff] %vm1336_vm5, %v2572_v27  ;;  %5163 = vmatprep.mubr.msk.f32.mxu1 %vm5711_vm0, %v7759_v10  ;;  %v1431_v36 = vpop.permute.xlu0 %1430  ;;  %v7161_v7 = vld [vmem:[#allocation3 + $0x40] sm:$0xff] }
 0x21f   :  { %1457 = vst.msk [vmem:[#allocation3 + $0x50] sm:$0xff] %vm1446_vm6, %v1431_v36  ;;  %5566 = vmatpush3.bf16.msra.mxu1 %v6692_v8  ;;  %v4227_v8 = vld [vmem:[%s7721_s3 + $0x160] sm:$0xff] }
 0x220   :  { %1530 = vst.msk [vmem:[#allocation3 + $0x50] sm:$0xff] %vm1519_vm7, %v1504_v55  ;;  %5111 = vmatmul.mubr.msk.f32.vlgmr.msra.gmra.mrb[114].mxu0 %vm1713_vm10, %v6970_v32  ;;  %v4228_v32 = vld [vmem:[%s7721_s3 + $0x168] sm:$0xff]  ;;  %5567 = vmatprep.subr.bf16.mxu1 %v7736_v53 }
 0x221   :  { %5164 = vmatmul.mubr.msk.f32.gmra.mrb[122].mxu1 %vm1713_vm10, %v2106_v46  ;;  %5113 = vmatprep.mubr.msk.f32.mxu0 %vm5711_vm0, %v7759_v10  ;;  %v1650_v49 = vpop.permute.xlu1 %1649  ;;  %v2889_v55 = vld [vmem:[%s7721_s3 + $0x28] sm:$0xff] }
 0x222   :  { %5166 = vmatprep.mubr.msk.f32.mxu1 %vm5711_vm0, %v7759_v10  ;;  %v1577_v58 = vpop.permute.xlu0 %1576  ;;  %5542 = vmatpush3.bf16.msra.mxu0 %v7128_v45 }
 0x223   :  { %1603 = vst.msk [vmem:[#allocation3 + $0x50] sm:$0xff] %vm1592_vm8, %v1577_v58  ;;  %v2107_v19 = vld [vmem:[#allocation3 + $0x46] sm:$0xff]  ;;  %5543 = vmatprep.subr.bf16.mxu0 %v7736_v53  ;;  %5569 = vmatpush3.bf16.msra.mxu1 %v6710_v63  ;;  %v7174_v63 = vpack.c.bf16 %v4228_v32, %v4227_v8  ;;  %v2892_v8 = vld [vmem:[%s7721_s3 + $0x40] sm:$0xff] }
 0x224   :  { %v7159_v0 = vld [vmem:[#allocation3 + $0x44] sm:$0xff]  ;;  %1676 = vst.msk [vmem:[#allocation3 + $0x50] sm:$0xff] %vm1665_vm9, %v1650_v49  ;;  %5114 = vmatmul.mubr.msk.f32.gmra.mrb[116].mxu0 %vm1713_vm10, %v7005_v20  ;;  %5585 = vmatprep.subr.bf16.mxu1 %v7736_v53 }
 0x225   :  { %5167 = vmatmul.mubr.msk.f32.gmra.mrb[124].mxu1 %vm1713_vm10, %v2107_v19  ;;  %2585 = vst.msk [vmem:[#allocation3 + $0x40] sm:$0xff] %vm1336_vm5, %v2573_v56  ;;  %5116 = vmatprep.mubr.msk.f32.mxu0 %vm5711_vm0, %v7759_v10  ;;  %v2618_v21 = vpop.permute.xlu1 %2617  ;;  %v4229_v20 = vld [vmem:[%s7721_s3 + $0x170] sm:$0xff]  ;;  %v2891_v56 = vld [vmem:[%s7721_s3 + $0x38] sm:$0xff]  ;;  %v2893_v32 = vld [vmem:[%s7721_s3 + $0x48] sm:$0xff] }
 0x226   :  { %5169 = vmatprep.mubr.msk.f32.mxu1 %vm5711_vm0, %v7759_v10  ;;  %v1433_v29 = vpop.permute.xlu0 %1432  ;;  %5545 = vmatpush3.bf16.msra.mxu0 %v7148_v18  ;;  %2651 = vst.msk [vmem:[#allocation3 + $0x10] sm:$0xff] %vm1446_vm6, %v2618_v21  ;;  %v7191_v40 = vpack.c.bf16 %v4230_v35, %v4229_v20  ;;  %v7202_v41 = vld [vmem:[#allocation3 + $0x48] sm:$0xff] }
 0x227   :  { %1458 = vst.msk [vmem:[#allocation3 + $0x58] sm:$0xff] %vm1446_vm6, %v1433_v29  ;;  %5546 = vmatprep.subr.bf16.mxu0 %v7736_v53 }
 0x228   :  { %5117 = vmatmul.mubr.msk.f32.gmra.mrb[118].mxu0 %vm1713_vm10, %v7038_v25 }
 0x229   :  { %5119 = vmatprep.mubr.msk.f32.mxu0 %vm5711_vm0, %v7759_v10  ;;  %v2690_v50 = vpop.permute.xlu1 %2689 }
 0x22a   :  { %v1506_v39 = vpop.permute.xlu0 %1505  ;;  %5548 = vmatpush3.bf16.msra.mxu0 %v7174_v63  ;;  %2723 = vst.msk [vmem:[#allocation3 + $0x10] sm:$0xff] %vm1519_vm7, %v2690_v50 }
 0x22b   :  { %1531 = vst.msk [vmem:[#allocation3 + $0x58] sm:$0xff] %vm1519_vm7, %v1506_v39  ;;  %v2108_v25 = vld [vmem:[#allocation3 + $0x4e] sm:$0xff]  ;;  %5549 = vmatprep.subr.bf16.mxu0 %v7736_v53 }
 0x22c   :  { %v7204_v47 = vld [vmem:[#allocation3 + $0x50] sm:$0xff]  ;;  %5120 = vmatmul.mubr.msk.f32.gmra.mrb[120].mxu0 %vm1713_vm10, %v7067_v59  ;;  %5170 = vmatmul.mubr.msk.f32.gmra.mrb[126].mxu1 %vm1713_vm10, %v2108_v25  ;;  %2586 = vst.msk [vmem:[#allocation3 + $0x48] sm:$0xff] %vm1336_vm5, %v2574_v38 }
 0x22d   :  { %2587 = vst.msk [vmem:[#allocation3 + $0x50] sm:$0xff] %vm1336_vm5, %v2575_v5  ;;  %5122 = vmatprep.mubr.msk.f32.mxu0 %vm5711_vm0, %v7759_v10  ;;  %5233 = vmatprep.mubr.msk.f32.mxu1 %vm5711_vm0, %v7759_v10  ;;  %v2762_v57 = vpop.permute.xlu1 %2761 }
 0x22e   :  { %v1579_v14 = vpop.permute.xlu0 %1578  ;;  %5551 = vmatpush3.bf16.msra.mxu0 %v7191_v40  ;;  %2795 = vst.msk [vmem:[#allocation3 + $0x10] sm:$0xff] %vm1592_vm8, %v2762_v57 }
 0x22f   :  { %1604 = vst.msk [vmem:[#allocation3 + $0x58] sm:$0xff] %vm1592_vm8, %v1579_v14  ;;  %5552 = vmatprep.subr.bf16.mxu0 %v7736_v53 }
 0x230   :  { %5123 = vmatmul.mubr.msk.f32.gmra.mrb[122].mxu0 %vm1713_vm10, %v7086_v23 }
 0x231   :  { %5125 = vmatprep.mubr.msk.f32.mxu0 %vm5711_vm0, %v7759_v10  ;;  %v2834_v16 = vpop.permute.xlu1 %2833 }
 0x232   :  { %v1652_v59 = vpop.permute.xlu0 %1651  ;;  %5554 = vmatpush3.bf16.msra.mxu0 %v7216_v30  ;;  %2867 = vst.msk [vmem:[#allocation3 + $0x10] sm:$0xff] %vm1665_vm9, %v2834_v16 }
 0x233   :  { %1677 = vst.msk [vmem:[#allocation3 + $0x58] sm:$0xff] %vm1665_vm9, %v1652_v59  ;;  %5570 = vmatprep.subr.bf16.mxu0 %v7736_v53 }
 0x234   :  { %5126 = vmatmul.mubr.msk.f32.gmra.mrb[124].mxu0 %vm1713_vm10, %v7117_v31  ;;  %v2888_v31 = vld [vmem:[%s7721_s3 + $0x20] sm:$0xff] }
 0x235   :  { %5128 = vmatprep.mubr.msk.f32.mxu0 %vm5711_vm0, %v7759_v10  ;;  %v2692_v24 = vpop.permute.xlu1 %2691 }
 0x236   :  { %v2614_v23 = vpop.permute.xlu0 %2613 }
 0x237   :  { %2649 = vst.msk [vmem:[#allocation3] sm:$0xff] %vm1446_vm6, %v2614_v23 }
 0x238   :  { %5129 = vmatmul.mubr.msk.f32.gmra.mrb[126].mxu0 %vm1713_vm10, %v7159_v0 }
 0x239   :  { %5192 = vmatprep.mubr.msk.f32.mxu0 %vm5711_vm0, %v7759_v10  ;;  %v2836_v11 = vpop.permute.xlu1 %2835 }
 0x23a   :  { %v2616_v27 = vpop.permute.xlu0 %2615  ;;  %v7244_v60 = vld [vmem:[#allocation3 + $0x58] sm:$0xff] }
 0x23b   :  { %2650 = vst.msk [vmem:[#allocation3 + $0x8] sm:$0xff] %vm1446_vm6, %v2616_v27 }
 0x23c   :  { %2588 = vst.msk [vmem:[#allocation3 + $0x58] sm:$0xff] %vm1336_vm5, %v2576_v15  ;;  %5193 = vmatmul.mubr.msk.f32.vlgmr.msra.gmra.mrb[128].mxu0 %vm1713_vm10, %v7045_v48  ;;  %v5577_v48 = vpack.c.bf16 %v2889_v55, %v2888_v31  ;;  %v2879_v31 = vld [vmem:[#allocation3 + $0x10] sm:$0xff] }
 0x23d   :  { %5195 = vmatprep.mubr.msk.f32.mxu0 %vm5711_vm0, %v7759_v10  ;;  %5572 = vmatpush3.bf16.msra.mxu0 %v5571_v44  ;;  %v2694_v46 = vpop.permute.xlu1 %2693 }
 0x23e   :  { %v2688_v9 = vpop.permute.xlu0 %2687  ;;  %5573 = vmatprep.subr.bf16.mxu0 %v7736_v53 }
 0x23f   :  { %2722 = vst.msk [vmem:[#allocation3 + $0x8] sm:$0xff] %vm1519_vm7, %v2688_v9 }
 0x240   :  { %5196 = vmatmul.mubr.msk.f32.gmra.mrb[130].mxu0 %vm1713_vm10, %v7061_v37  ;;  %v5580_v37 = vpack.c.bf16 %v2891_v56, %v2890_v22 }
 0x241   :  { %5198 = vmatprep.mubr.msk.f32.mxu0 %vm5711_vm0, %v7759_v10  ;;  %5575 = vmatpush3.bf16.msra.mxu0 %v5574_v33  ;;  %v2838_v51 = vpop.permute.xlu1 %2837 }
 0x242   :  { %v2760_v36 = vpop.permute.xlu0 %2759  ;;  %5576 = vmatprep.subr.bf16.mxu0 %v7736_v53 }
 0x243   :  { %2794 = vst.msk [vmem:[#allocation3 + $0x8] sm:$0xff] %vm1592_vm8, %v2760_v36 }
 0x244   :  { %5199 = vmatmul.mubr.msk.f32.gmra.mrb[132].mxu0 %vm1713_vm10, %v7114_v34  ;;  %v5583_v34 = vpack.c.bf16 %v2893_v32, %v2892_v8 }
 0x245   :  { %5201 = vmatprep.mubr.msk.f32.mxu0 %vm5711_vm0, %v7759_v10  ;;  %5578 = vmatpush3.bf16.msra.mxu0 %v5577_v48  ;;  %v2696_v58 = vpop.permute.xlu1 %2695 }
 0x246   :  { %v2832_v49 = vpop.permute.xlu0 %2831  ;;  %5579 = vmatprep.subr.bf16.mxu0 %v7736_v53 }
 0x247   :  { %2866 = vst.msk [vmem:[#allocation3 + $0x8] sm:$0xff] %vm1665_vm9, %v2832_v49 }
 0x248   :  { %5202 = vmatmul.mubr.msk.f32.gmra.mrb[134].mxu0 %vm1713_vm10, %v7161_v7 }
 0x249   :  { %5204 = vmatprep.mubr.msk.f32.mxu0 %vm5711_vm0, %v7759_v10  ;;  %5581 = vmatpush3.bf16.msra.mxu0 %v5580_v37  ;;  %v2840_v0 = vpop.permute.xlu1 %2839 }
 0x24a   :  { %v2620_v19 = vpop.permute.xlu0 %2619  ;;  %5582 = vmatprep.subr.bf16.mxu0 %v7736_v53 }
 0x24b   :  { %2652 = vst.msk [vmem:[#allocation3 + $0x18] sm:$0xff] %vm1446_vm6, %v2620_v19 }
 0x24c   :  { %2724 = vst.msk [vmem:[#allocation3 + $0x18] sm:$0xff] %vm1519_vm7, %v2692_v24  ;;  %5205 = vmatmul.mubr.msk.f32.gmra.mrb[136].mxu0 %vm1713_vm10, %v7202_v41 }
 0x24d   :  { %5207 = vmatprep.mubr.msk.f32.mxu0 %vm5711_vm0, %v7759_v10  ;;  %5584 = vmatpush3.bf16.msra.mxu0 %v5583_v34  ;;  %v2698_v29 = vpop.permute.xlu1 %2697 }
 0x24e   :  { %v2764_v7 = vpop.permute.xlu0 %2763  ;;  %v2894_v21 = vld [vmem:[#allocation3 + $0xa] sm:$0xff]  ;;  %5600 = vmatprep.subr.bf16.mxu0 %v7736_v53 }
 0x24f   :  { %2796 = vst.msk [vmem:[#allocation3 + $0x18] sm:$0xff] %vm1592_vm8, %v2764_v7  ;;  %5234 = vmatmul.mubr.msk.f32.vlgmr.msra.gmra.mrb[128].mxu1 %vm1713_vm10, %v2894_v21  ;;  %v2878_v9 = vld [vmem:[#allocation3 + $0x8] sm:$0xff] }
 0x250   :  { %2868 = vst.msk [vmem:[#allocation3 + $0x18] sm:$0xff] %vm1665_vm9, %v2836_v11  ;;  %5208 = vmatmul.mubr.msk.f32.gmra.mrb[138].mxu0 %vm1713_vm10, %v7204_v47  ;;  %5236 = vmatprep.mubr.msk.f32.mxu1 %vm5711_vm0, %v7759_v10 }
 0x251   :  { %5210 = vmatprep.mubr.msk.f32.mxu0 %vm5711_vm0, %v7759_v10  ;;  %5587 = vmatpush3.bf16.msra.mxu1 %v6944_v26  ;;  %v2842_v35 = vpop.permute.xlu1 %2841 }
 0x252   :  { %v2622_v20 = vpop.permute.xlu0 %2621  ;;  %5588 = vmatprep.subr.bf16.mxu1 %v7736_v53 }
 0x253   :  { %2653 = vst.msk [vmem:[#allocation3 + $0x20] sm:$0xff] %vm1446_vm6, %v2622_v20 }
 0x254   :  { %2725 = vst.msk [vmem:[#allocation3 + $0x20] sm:$0xff] %vm1519_vm7, %v2694_v46  ;;  %5211 = vmatmul.mubr.msk.f32.gmra.mrb[140].mxu0 %vm1713_vm10, %v7244_v60 }
 0x255   :  { %5590 = vmatpush3.bf16.msra.mxu1 %v6975_v62  ;;  %5274 = vmatprep.mubr.msk.f32.mxu0 %vm5711_vm0, %v7759_v10  ;;  %v2700_v39 = vpop.permute.xlu1 %2699 }
 0x256   :  { %v2766_v38 = vpop.permute.xlu0 %2765  ;;  %5591 = vmatprep.subr.bf16.mxu1 %v7736_v53 }
 0x257   :  { %2797 = vst.msk [vmem:[#allocation3 + $0x20] sm:$0xff] %vm1592_vm8, %v2766_v38  ;;  %v2895_v26 = vld [vmem:[#allocation3 + $0x12] sm:$0xff] }
 0x258   :  { %2869 = vst.msk [vmem:[#allocation3 + $0x20] sm:$0xff] %vm1665_vm9, %v2838_v51  ;;  %5237 = vmatmul.mubr.msk.f32.gmra.mrb[130].mxu1 %vm1713_vm10, %v2895_v26  ;;  %v3153_v61 = vld [vmem:[#allocation3 + $0x14] sm:$0xff] }
 0x259   :  { %5239 = vmatprep.mubr.msk.f32.mxu1 %vm5711_vm0, %v7759_v10  ;;  %5593 = vmatpush3.bf16.msra.mxu1 %v6992_v13  ;;  %v2772_v50 = vpop.permute.xlu1 %2771 }
 0x25a   :  { %v2624_v62 = vpop.permute.xlu0 %2623  ;;  %5594 = vmatprep.subr.bf16.mxu1 %v7736_v53 }
 0x25b   :  { %2654 = vst.msk [vmem:[#allocation3 + $0x28] sm:$0xff] %vm1446_vm6, %v2624_v62 }
 0x25c   :  { %2726 = vst.msk [vmem:[#allocation3 + $0x28] sm:$0xff] %vm1519_vm7, %v2696_v58 }
 0x25d   :  { %5596 = vmatpush3.bf16.msra.mxu1 %v7011_v4  ;;  %v2844_v2 = vpop.permute.xlu1 %2843 }
 0x25e   :  { %v2768_v1 = vpop.permute.xlu0 %2767  ;;  %5597 = vmatprep.subr.bf16.mxu1 %v7736_v53 }
 0x25f   :  { %2798 = vst.msk [vmem:[#allocation3 + $0x28] sm:$0xff] %vm1592_vm8, %v2768_v1  ;;  %v2896_v5 = vld [vmem:[#allocation3 + $0x1a] sm:$0xff] }
 0x260   :  { %2870 = vst.msk [vmem:[#allocation3 + $0x28] sm:$0xff] %vm1665_vm9, %v2840_v0  ;;  %5240 = vmatmul.mubr.msk.f32.gmra.mrb[132].mxu1 %vm1713_vm10, %v2896_v5 }
 0x261   :  { %5242 = vmatprep.mubr.msk.f32.mxu1 %vm5711_vm0, %v7759_v10  ;;  %5599 = vmatpush3.bf16.msra.mxu1 %v7032_v42 }
 0x262   :  { %v2626_v13 = vpop.permute.xlu0 %2625  ;;  %5615 = vmatprep.subr.bf16.mxu1 %v7736_v53  ;;  %v2630_v4 = vpop.permute.xlu1 %2629 }
 0x263   :  { %2655 = vst.msk [vmem:[#allocation3 + $0x30] sm:$0xff] %vm1446_vm6, %v2626_v13  ;;  %2657 = vst.msk [vmem:[#allocation3 + $0x40] sm:$0xff] %vm1446_vm6, %v2630_v4 }
 0x264   :  { %2727 = vst.msk [vmem:[#allocation3 + $0x30] sm:$0xff] %vm1519_vm7, %v2698_v29 }
 0x266   :  { %v2770_v25 = vpop.permute.xlu0 %2769 }
 0x267   :  { %v2702_v41 = vpop.permute.xlu1 %2701  ;;  %v2897_v47 = vld [vmem:[#allocation3 + $0x22] sm:$0xff]  ;;  %2799 = vst.msk [vmem:[#allocation3 + $0x30] sm:$0xff] %vm1592_vm8, %v2770_v25 }
 0x268   :  { %2729 = vst.msk [vmem:[#allocation3 + $0x40] sm:$0xff] %vm1519_vm7, %v2702_v41  ;;  %5243 = vmatmul.mubr.msk.f32.gmra.mrb[134].mxu1 %vm1713_vm10, %v2897_v47  ;;  %v2882_v22 = vld [vmem:[#allocation3 + $0x28] sm:$0xff] }
 0x269   :  { %2871 = vst.msk [vmem:[#allocation3 + $0x30] sm:$0xff] %vm1665_vm9, %v2842_v35  ;;  %5245 = vmatprep.mubr.msk.f32.mxu1 %vm5711_vm0, %v7759_v10  ;;  %v3299_v37 = vld [vmem:[#allocation3 + $0x26] sm:$0xff] }
 0x26a   :  { %v2628_v42 = vpop.permute.xlu0 %2627 }
 0x26b   :  { %v2774_v14 = vpop.permute.xlu1 %2773  ;;  %2656 = vst.msk [vmem:[#allocation3 + $0x38] sm:$0xff] %vm1446_vm6, %v2628_v42 }
 0x26c   :  { %2801 = vst.msk [vmem:[#allocation3 + $0x40] sm:$0xff] %vm1592_vm8, %v2774_v14 }
 0x26d   :  { %2728 = vst.msk [vmem:[#allocation3 + $0x38] sm:$0xff] %vm1519_vm7, %v2700_v39 }
 0x26e   :  { %2800 = vst.msk [vmem:[#allocation3 + $0x38] sm:$0xff] %vm1592_vm8, %v2772_v50  ;;  %v2686_v57 = vpop.permute.xlu0 %2685 }
 0x26f   :  { %2872 = vst.msk [vmem:[#allocation3 + $0x38] sm:$0xff] %vm1665_vm9, %v2844_v2  ;;  %v2846_v59 = vpop.permute.xlu1 %2845 }
 0x270   :  { %2721 = vst.msk [vmem:[#allocation3] sm:$0xff] %vm1519_vm7, %v2686_v57  ;;  %v2898_v16 = vld [vmem:[#allocation3 + $0x2a] sm:$0xff] }
 0x271   :  { %2873 = vst.msk [vmem:[#allocation3 + $0x40] sm:$0xff] %vm1665_vm9, %v2846_v59  ;;  %5246 = vmatmul.mubr.msk.f32.gmra.mrb[136].mxu1 %vm1713_vm10, %v2898_v16  ;;  %v2883_v56 = vld [vmem:[#allocation3 + $0x30] sm:$0xff] }
 0x272   :  { %5248 = vmatprep.mubr.msk.f32.mxu1 %vm5711_vm0, %v7759_v10  ;;  %v2758_v23 = vpop.permute.xlu0 %2757  ;;  %v3300_v49 = vld [vmem:[#allocation3 + $0x2e] sm:$0xff] }
 0x273   :  { %2793 = vst.msk [vmem:[#allocation3] sm:$0xff] %vm1592_vm8, %v2758_v23  ;;  %v2830_v24 = vpop.permute.xlu1 %2829 }
 0x274   :  { %2865 = vst.msk [vmem:[#allocation3] sm:$0xff] %vm1665_vm9, %v2830_v24 }
 0x276   :  { %v2899_v43 = vld [vmem:[#allocation3 + $0x32] sm:$0xff]  ;;  %v2632_v54 = vpop.permute.xlu0 %2631 }
 0x277   :  { %5249 = vmatmul.mubr.msk.f32.gmra.mrb[138].mxu1 %vm1713_vm10, %v2899_v43  ;;  %v2704_v44 = vpop.permute.xlu1 %2703  ;;  %2658 = vst.msk [vmem:[#allocation3 + $0x48] sm:$0xff] %vm1446_vm6, %v2632_v54  ;;  %v3445_v58 = vld [vmem:[#allocation3 + $0x38] sm:$0xff] }
 0x278   :  { %5251 = vmatprep.mubr.msk.f32.mxu1 %vm5711_vm0, %v7759_v10  ;;  %2730 = vst.msk [vmem:[#allocation3 + $0x48] sm:$0xff] %vm1519_vm7, %v2704_v44  ;;  %v2900_v15 = vld [vmem:[#allocation3 + $0x3a] sm:$0xff] }
 0x279   :  { %v3301_v8 = vld [vmem:[#allocation3 + $0x36] sm:$0xff]  ;;  %v3446_v32 = vld [vmem:[#allocation3 + $0x40] sm:$0xff] }
 0x27a   :  { %v2776_v27 = vpop.permute.xlu0 %2775  ;;  %v3302_v34 = vld [vmem:[#allocation3 + $0x3e] sm:$0xff] }
 0x27b   :  { %5252 = vmatmul.mubr.msk.f32.gmra.mrb[140].mxu1 %vm1713_vm10, %v2900_v15  ;;  %v2848_v11 = vpop.permute.xlu1 %2847  ;;  %2802 = vst.msk [vmem:[#allocation3 + $0x48] sm:$0xff] %vm1592_vm8, %v2776_v27  ;;  %v2877_v60 = vld [vmem:[#allocation3] sm:$0xff] }
 0x27c   :  { %5315 = vmatprep.mubr.msk.f32.mxu1 %vm5711_vm0, %v7759_v10  ;;  %2874 = vst.msk [vmem:[#allocation3 + $0x48] sm:$0xff] %vm1665_vm9, %v2848_v11  ;;  %5275 = vmatmul.mubr.msk.f32.vlgmr.msra.gmra.mrb[142].mxu0 %vm1713_vm10, %v2877_v60 }
 0x27d   :  { %5602 = vmatpush3.bf16.msra.mxu0 %v6875_v52  ;;  %5277 = vmatprep.mubr.msk.f32.mxu0 %vm5711_vm0, %v7759_v10  ;;  %v3154_v52 = vld [vmem:[#allocation3 + $0x1c] sm:$0xff] }
 0x27e   :  { %v2634_v3 = vpop.permute.xlu0 %2633  ;;  %5603 = vmatprep.subr.bf16.mxu0 %v7736_v53 }
 0x27f   :  { %5316 = vmatmul.mubr.msk.f32.vlgmr.msra.gmra.mrb[142].mxu1 %vm1713_vm10, %v3153_v61  ;;  %v2706_v33 = vpop.permute.xlu1 %2705  ;;  %2659 = vst.msk [vmem:[#allocation3 + $0x50] sm:$0xff] %vm1446_vm6, %v2634_v3 }
 0x280   :  { %5617 = vmatpush3.bf16.msra.mxu1 %v7128_v45  ;;  %5318 = vmatprep.mubr.msk.f32.mxu1 %vm5711_vm0, %v7759_v10  ;;  %2731 = vst.msk [vmem:[#allocation3 + $0x50] sm:$0xff] %vm1519_vm7, %v2706_v33 }
 0x281   :  { %5278 = vmatmul.mubr.msk.f32.gmra.mrb[144].mxu0 %vm1713_vm10, %v2878_v9  ;;  %5618 = vmatprep.subr.bf16.mxu1 %v7736_v53 }
 0x282   :  { %5280 = vmatprep.mubr.msk.f32.mxu0 %vm5711_vm0, %v7759_v10  ;;  %5605 = vmatpush3.bf16.msra.mxu0 %v6892_v12  ;;  %v2778_v46 = vpop.permute.xlu0 %2777  ;;  %v3155_v12 = vld [vmem:[#allocation3 + $0x24] sm:$0xff] }
 0x283   :  { %5319 = vmatmul.mubr.msk.f32.gmra.mrb[144].mxu1 %vm1713_vm10, %v3154_v52  ;;  %5606 = vmatprep.subr.bf16.mxu0 %v7736_v53  ;;  %v2850_v45 = vpop.permute.xlu1 %2849  ;;  %2803 = vst.msk [vmem:[#allocation3 + $0x50] sm:$0xff] %vm1592_vm8, %v2778_v46  ;;  %v3447_v19 = vld [vmem:[#allocation3 + $0x48] sm:$0xff] }
 0x284   :  { %5321 = vmatprep.mubr.msk.f32.mxu1 %vm5711_vm0, %v7759_v10  ;;  %5620 = vmatpush3.bf16.msra.mxu1 %v7148_v18  ;;  %2875 = vst.msk [vmem:[#allocation3 + $0x50] sm:$0xff] %vm1665_vm9, %v2850_v45  ;;  %v2880_v18 = vld [vmem:[#allocation3 + $0x18] sm:$0xff]  ;;  %v3303_v0 = vld [vmem:[#allocation3 + $0x46] sm:$0xff] }
 0x285   :  { %5281 = vmatmul.mubr.msk.f32.gmra.mrb[146].mxu0 %vm1713_vm10, %v2879_v31  ;;  %5621 = vmatprep.subr.bf16.mxu1 %v7736_v53 }
 0x286   :  { %5283 = vmatprep.mubr.msk.f32.mxu0 %vm5711_vm0, %v7759_v10  ;;  %5608 = vmatpush3.bf16.msra.mxu0 %v6908_v17  ;;  %v2636_v55 = vpop.permute.xlu0 %2635  ;;  %v3156_v17 = vld [vmem:[#allocation3 + $0x2c] sm:$0xff] }
 0x287   :  { %5322 = vmatmul.mubr.msk.f32.gmra.mrb[146].mxu1 %vm1713_vm10, %v3155_v12  ;;  %5609 = vmatprep.subr.bf16.mxu0 %v7736_v53  ;;  %v2708_v48 = vpop.permute.xlu1 %2707  ;;  %2660 = vst.msk [vmem:[#allocation3 + $0x58] sm:$0xff] %vm1446_vm6, %v2636_v55 }
 0x288   :  { %5324 = vmatprep.mubr.msk.f32.mxu1 %vm5711_vm0, %v7759_v10  ;;  %5623 = vmatpush3.bf16.msra.mxu1 %v7174_v63  ;;  %2732 = vst.msk [vmem:[#allocation3 + $0x58] sm:$0xff] %vm1519_vm7, %v2708_v48  ;;  %v2881_v63 = vld [vmem:[#allocation3 + $0x20] sm:$0xff] }
 0x289   :  { %5284 = vmatmul.mubr.msk.f32.gmra.mrb[148].mxu0 %vm1713_vm10, %v2880_v18  ;;  %5624 = vmatprep.subr.bf16.mxu1 %v7736_v53 }
 0x28a   :  { %5286 = vmatprep.mubr.msk.f32.mxu0 %vm5711_vm0, %v7759_v10  ;;  %5611 = vmatpush3.bf16.msra.mxu0 %v6924_v6  ;;  %v2780_v36 = vpop.permute.xlu0 %2779  ;;  %v3157_v6 = vld [vmem:[#allocation3 + $0x34] sm:$0xff] }
 0x28b   :  { %5325 = vmatmul.mubr.msk.f32.gmra.mrb[148].mxu1 %vm1713_vm10, %v3156_v17  ;;  %5612 = vmatprep.subr.bf16.mxu0 %v7736_v53  ;;  %v2852_v51 = vpop.permute.xlu1 %2851  ;;  %2804 = vst.msk [vmem:[#allocation3 + $0x58] sm:$0xff] %vm1592_vm8, %v2780_v36  ;;  %v3448_v7 = vld [vmem:[#allocation3 + $0x50] sm:$0xff] }
 0x28c   :  { %5327 = vmatprep.mubr.msk.f32.mxu1 %vm5711_vm0, %v7759_v10  ;;  %5626 = vmatpush3.bf16.msra.mxu1 %v7191_v40  ;;  %2876 = vst.msk [vmem:[#allocation3 + $0x58] sm:$0xff] %vm1665_vm9, %v2852_v51  ;;  %v3158_v40 = vld [vmem:[#allocation3 + $0x3c] sm:$0xff]  ;;  %v3304_v29 = vld [vmem:[#allocation3 + $0x4e] sm:$0xff] }
 0x28d   :  { %5287 = vmatmul.mubr.msk.f32.gmra.mrb[150].mxu0 %vm1713_vm10, %v2881_v63  ;;  %5627 = vmatprep.subr.bf16.mxu1 %v7736_v53 }
 0x28e   :  { %5289 = vmatprep.mubr.msk.f32.mxu0 %vm5711_vm0, %v7759_v10  ;;  %5614 = vmatpush3.bf16.msra.mxu0 %v6949_v28  ;;  %v3159_v28 = vld [vmem:[#allocation3 + $0x44] sm:$0xff] }
 0x28f   :  { %5328 = vmatmul.mubr.msk.f32.gmra.mrb[150].mxu1 %vm1713_vm10, %v3157_v6 }
 0x290   :  { %5330 = vmatprep.mubr.msk.f32.mxu1 %vm5711_vm0, %v7759_v10  ;;  %5629 = vmatpush3.bf16.msra.mxu1 %v7216_v30  ;;  %v3298_v30 = vld [vmem:[#allocation3 + $0x1e] sm:$0xff] }
 0x291   :  { %5290 = vmatmul.mubr.msk.f32.gmra.mrb[152].mxu0 %vm1713_vm10, %v2882_v22  ;;  %5662 = vmatprep.subr.bf16.mxu1 %v7736_v53 }
 0x292   :  { %5292 = vmatprep.mubr.msk.f32.mxu0 %vm5711_vm0, %v7759_v10 }
 0x293   :  { %5331 = vmatmul.mubr.msk.f32.gmra.mrb[152].mxu1 %vm1713_vm10, %v3158_v40  ;;  %v3449_v20 = vld [vmem:[#allocation3 + $0x58] sm:$0xff] }
 0x294   :  { %5333 = vmatprep.mubr.msk.f32.mxu1 %vm5711_vm0, %v7759_v10 }
 0x295   :  { %5293 = vmatmul.mubr.msk.f32.gmra.mrb[154].mxu0 %vm1713_vm10, %v2883_v56 }
 0x296   :  { %5356 = vmatprep.mubr.msk.f32.mxu0 %vm5711_vm0, %v7759_v10 }
 0x297   :  { %5334 = vmatmul.mubr.msk.f32.gmra.mrb[154].mxu1 %vm1713_vm10, %v3159_v28 }
 0x298   :  { %5397 = vmatprep.mubr.msk.f32.mxu1 %vm5711_vm0, %v7759_v10 }
 0x299   :  { %5357 = vmatmul.mubr.msk.f32.vlgmr.msra.gmra.mrb[156].mxu0 %vm1713_vm10, %v3298_v30 }
 0x29a   :  { %5359 = vmatprep.mubr.msk.f32.mxu0 %vm5711_vm0, %v7759_v10 }
 0x29b   :  { %5398 = vmatmul.mubr.msk.f32.vlgmr.msra.gmra.mrb[156].mxu1 %vm1713_vm10, %v2882_v22 }
 0x29c   :  { %5400 = vmatprep.mubr.msk.f32.mxu1 %vm5711_vm0, %v7759_v10 }
 0x29d   :  { %5360 = vmatmul.mubr.msk.f32.gmra.mrb[158].mxu0 %vm1713_vm10, %v3299_v37 }
 0x29e   :  { %5362 = vmatprep.mubr.msk.f32.mxu0 %vm5711_vm0, %v7759_v10 }
 0x29f   :  { %5401 = vmatmul.mubr.msk.f32.gmra.mrb[158].mxu1 %vm1713_vm10, %v2883_v56 }
 0x2a0   :  { %5403 = vmatprep.mubr.msk.f32.mxu1 %vm5711_vm0, %v7759_v10 }
 0x2a1   :  { %5363 = vmatmul.mubr.msk.f32.gmra.mrb[160].mxu0 %vm1713_vm10, %v3300_v49 }
 0x2a2   :  { %5365 = vmatprep.mubr.msk.f32.mxu0 %vm5711_vm0, %v7759_v10 }
 0x2a3   :  { %5404 = vmatmul.mubr.msk.f32.gmra.mrb[160].mxu1 %vm1713_vm10, %v3445_v58 }
 0x2a4   :  { %5406 = vmatprep.mubr.msk.f32.mxu1 %vm5711_vm0, %v7759_v10 }
 0x2a5   :  { %5366 = vmatmul.mubr.msk.f32.gmra.mrb[162].mxu0 %vm1713_vm10, %v3301_v8 }
 0x2a6   :  { %5368 = vmatprep.mubr.msk.f32.mxu0 %vm5711_vm0, %v7759_v10 }
 0x2a7   :  { %5407 = vmatmul.mubr.msk.f32.gmra.mrb[162].mxu1 %vm1713_vm10, %v3446_v32 }
 0x2a8   :  { %5409 = vmatprep.mubr.msk.f32.mxu1 %vm5711_vm0, %v7759_v10 }
 0x2a9   :  { %5369 = vmatmul.mubr.msk.f32.gmra.mrb[164].mxu0 %vm1713_vm10, %v3302_v34 }
 0x2aa   :  { %5371 = vmatprep.mubr.msk.f32.mxu0 %vm5711_vm0, %v7759_v10 }
 0x2ab   :  { %5410 = vmatmul.mubr.msk.f32.gmra.mrb[164].mxu1 %vm1713_vm10, %v3447_v19 }
 0x2ac   :  { %5412 = vmatprep.mubr.msk.f32.mxu1 %vm5711_vm0, %v7759_v10 }
 0x2ad   :  { %5372 = vmatmul.mubr.msk.f32.gmra.mrb[166].mxu0 %vm1713_vm10, %v3303_v0 }
 0x2ae   :  { %5374 = vmatprep.mubr.msk.f32.mxu0 %vm5711_vm0, %v7759_v10 }
 0x2af   :  { %5413 = vmatmul.mubr.msk.f32.gmra.mrb[166].mxu1 %vm1713_vm10, %v3448_v7 }
 0x2b0   :  { %5415 = vmatprep.mubr.msk.f32.mxu1 %vm5711_vm0, %v7759_v10 }
 0x2b1   :  { %5375 = vmatmul.mubr.msk.f32.gmra.mrb[168].mxu0 %vm1713_vm10, %v3304_v29  ;;  %v1922_v21 = vpop.f32.mrb[100].mxu1 }
 0x2b2   :  { %v5071_v35 = vpop.f32.mrb[101].mxu1 }
 0x2b3   :  { %5416 = vmatmul.mubr.msk.f32.gmra.mrb[168].mxu1 %vm1713_vm10, %v3449_v20 }
 0x2b4   :  { %5426 = vmatprep.mubr.msk.f32.mxu1 %vm5711_vm0, %v7759_v10 }
 0x2bb   :  { %v1927_v38 = vpop.f32.mrb[102].mxu1 }
 0x2bc   :  { %v5074_v39 = vpop.f32.mrb[103].mxu1 }
 0x2c1   :  { %v1801_v26 = vpop.f32.mrb[100].mxu0 }
 0x2c2   :  { %v1932_v62 = vpop.f32.mrb[104].mxu1  ;;  %v1923_v50 = vadd.f32 %v1922_v21, %v1801_v26  ;;  %v5030_v1 = vpop.f32.mrb[101].mxu0 }
 0x2c3   :  { %v5077_v2 = vpop.f32.mrb[105].mxu1 }
 0x2c7   :  { %v1806_v5 = vpop.f32.mrb[102].mxu0 }
 0x2c8   :  { %v1928_v4 = vadd.f32 %v1927_v38, %v1806_v5  ;;  %v5033_v25 = vpop.f32.mrb[103].mxu0 }
 0x2c9   :  { %v1937_v13 = vpop.f32.mrb[106].mxu1 }
 0x2ca   :  { %v5080_v41 = vpop.f32.mrb[107].mxu1 }
 0x2cf   :  { %v1811_v47 = vpop.f32.mrb[104].mxu0 }
 0x2d0   :  { %v1933_v42 = vadd.f32 %v1932_v62, %v1811_v47  ;;  %v5036_v57 = vpop.f32.mrb[105].mxu0 }
 0x2d2   :  { %v1942_v14 = vpop.f32.mrb[108].mxu1 }
 0x2d3   :  { %v5083_v59 = vpop.f32.mrb[109].mxu1 }
 0x2d7   :  { %v1816_v16 = vpop.f32.mrb[106].mxu0 }
 0x2d8   :  { %v1938_v23 = vadd.f32 %v1937_v13, %v1816_v16  ;;  %v5039_v43 = vpop.f32.mrb[107].mxu0 }
 0x2da   :  { %v1947_v24 = vpop.f32.mrb[110].mxu1 }
 0x2db   :  { %v5086_v54 = vpop.f32.mrb[111].mxu1 }
 0x2df   :  { %v1821_v44 = vpop.f32.mrb[108].mxu0 }
 0x2e0   :  { %v1952_v15 = vpop.f32.mrb[112].mxu1  ;;  %v1943_v27 = vadd.f32 %v1942_v14, %v1821_v44  ;;  %v5042_v11 = vpop.f32.mrb[109].mxu0  ;;  %v7484_v14 = vld [vmem:[%s7722_s4] ss:$0 sm:$0xff]  ;;  %s5719_s4 = smov 96  }
 0x2e1   :  { %v5089_v60 = vpop.f32.mrb[113].mxu1 }
 0x2e4   :  { %v2207_v61 = vpop.f32.mrb[114].mxu1 }
 0x2e5   :  { %v5153_v3 = vpop.f32.mrb[115].mxu1 }
 0x2e7   :  { %v1826_v33 = vpop.f32.mrb[110].mxu0 }
 0x2e8   :  { %v2212_v9 = vpop.f32.mrb[116].mxu1  ;;  %v1948_v52 = vadd.f32 %v1947_v24, %v1826_v33  ;;  %v5045_v46 = vpop.f32.mrb[111].mxu0  ;;  %v5718_v33 = vmov 1983009808  }
 0x2e9   :  { %v5156_v45 = vpop.f32.mrb[117].mxu1 }
 0x2ec   :  { %v2217_v31 = vpop.f32.mrb[118].mxu1 }
 0x2ed   :  { %v5159_v12 = vpop.f32.mrb[119].mxu1 }
 0x2ef   :  { %v1831_v55 = vpop.f32.mrb[112].mxu0 }
 0x2f0   :  { %v2222_v48 = vpop.f32.mrb[120].mxu1  ;;  %v1953_v18 = vadd.f32 %v1952_v15, %v1831_v55  ;;  %v5048_v17 = vpop.f32.mrb[113].mxu0 }
 0x2f1   :  { %v5162_v36 = vpop.f32.mrb[121].mxu1 }
 0x2f3   :  { %v2061_v51 = vpop.f32.mrb[114].mxu0 }
 0x2f4   :  { %v2227_v63 = vpop.f32.mrb[122].mxu1  ;;  %v2095_v6 = vadd.f32 %v2061_v51, %v1923_v50  ;;  %v5112_v22 = vpop.f32.mrb[115].mxu0 }
 0x2f5   :  { %v5165_v40 = vpop.f32.mrb[123].mxu1 }
 0x2f6   :  { %v2241_v56 = vadd.f32 %v2207_v61, %v2095_v6 }
 0x2f7   :  { %v2066_v28 = vpop.f32.mrb[116].mxu0 }
 0x2f8   :  { %v2232_v30 = vpop.f32.mrb[124].mxu1  ;;  %v2096_v37 = vadd.f32 %v2066_v28, %v1928_v4  ;;  %v5115_v49 = vpop.f32.mrb[117].mxu0 }
 0x2f9   :  { %v5168_v58 = vpop.f32.mrb[125].mxu1 }
 0x2fa   :  { %v2242_v8 = vadd.f32 %v2212_v9, %v2096_v37  ;;  %v2441_v9 = vunpack.c.l.s4 %v5718_v33 }
 0x2fb   :  { %v2071_v32 = vpop.f32.mrb[118].mxu0 }
 0x2fc   :  { %v2097_v34 = vadd.f32 %v2071_v32, %v1933_v42  ;;  %v5118_v19 = vpop.f32.mrb[119].mxu0  ;;  %v2442_v51 = vunpack.c.0.s8 %v2441_v9 }
 0x2fe   :  { %v2243_v0 = vadd.f32 %v2217_v31, %v2097_v34 }
 0x2ff   :  { %v2076_v7 = vpop.f32.mrb[120].mxu0  ;;  %v2237_v29 = vpop.f32.mrb[126].mxu1 }
 0x300   :  { %v2098_v21 = vadd.f32 %v2076_v7, %v1938_v23  ;;  %v5121_v20 = vpop.f32.mrb[121].mxu0  ;;  %v5171_v35 = vpop.f32.mrb[127].mxu1 }
 0x302   :  { %v2244_v38 = vadd.f32 %v2222_v48, %v2098_v21 }
 0x303   :  { %v2081_v39 = vpop.f32.mrb[122].mxu0 }
 0x304   :  { %v2099_v26 = vadd.f32 %v2081_v39, %v1943_v27  ;;  %v5124_v62 = vpop.f32.mrb[123].mxu0 }
 0x306   :  { %v2245_v50 = vadd.f32 %v2227_v63, %v2099_v26 }
 0x307   :  { %v2086_v1 = vpop.f32.mrb[124].mxu0 }
 0x308   :  { %v2100_v2 = vadd.f32 %v2086_v1, %v1948_v52  ;;  %v5127_v5 = vpop.f32.mrb[125].mxu0  ;;  %v2443_v52 = vlaneseq }
 0x30a   :  { %v2246_v13 = vadd.f32 %v2232_v30, %v2100_v2  ;;  %v2444_v63 = vshrl.u32 %v2443_v52, 7 }
 0x30b   :  { %v2091_v4 = vpop.f32.mrb[126].mxu0 }
 0x30c   :  { %v2101_v25 = vadd.f32 %v2091_v4, %v1953_v18  ;;  %v5130_v41 = vpop.f32.mrb[127].mxu0  ;;  %v7497_v35 = vsub.s32 %v2442_v51, %v2444_v63 }
 0x30e   :  { %v7479_v47 = vadd.f32 %v2237_v29, %v2101_v25 }
 0x30f   :  { %v2353_v42 = vpop.f32.mrb[128].mxu0 }
 0x310   :  { %v2387_v57 = vadd.f32 %v2353_v42, %v2241_v56  ;;  %v5194_v59 = vpop.f32.mrb[129].mxu0 }
 0x312   :  { %v2401_v16 = vadd.f32 %v7484_v14, %v2387_v57 }
 0x313   :  { %v2358_v23 = vpop.f32.mrb[130].mxu0 }
 0x314   :  { %v2408_v24 = vmax.f32 %v2401_v16, 0.0  ;;  %v2388_v43 = vadd.f32 %v2358_v23, %v2242_v8  ;;  %v5197_v54 = vpop.f32.mrb[131].mxu0 }
 0x316   :  { %2416 = vst.msk [vmem:[#allocation4] sm:$0xff] %vm2415_vm11, %v2408_v24  ;;  %v2402_v44 = vadd.f32 %v7484_v14, %v2388_v43 }
 0x317   :  { %v2363_v15 = vpop.f32.mrb[132].mxu0 }
 0x318   :  { %v2409_v27 = vmax.f32 %v2402_v44, 0.0  ;;  %v2389_v11 = vadd.f32 %v2363_v15, %v2243_v0  ;;  %v5200_v60 = vpop.f32.mrb[133].mxu0 }
 0x31a   :  { %2417 = vst.msk [vmem:[#allocation4 + $0x8] sm:$0xff] %vm2415_vm11, %v2409_v27  ;;  %v2403_v61 = vadd.f32 %v7484_v14, %v2389_v11 }
 0x31b   :  { %v2368_v3 = vpop.f32.mrb[134].mxu0 }
 0x31c   :  { %v2410_v46 = vmax.f32 %v2403_v61, 0.0  ;;  %v2390_v45 = vadd.f32 %v2368_v3, %v2244_v38  ;;  %v5203_v31 = vpop.f32.mrb[135].mxu0 }
 0x31d   :  { %v2423_v12 = vld [vmem:[#allocation4] sm:$0x1]  ;;  %v2424_v55 = vld [vmem:[#allocation4 + $0x1] sm:$0x1]  ;;  %v2432_v17 = vld [vmem:[#allocation4 + $0x2] sm:$0x1] }
 0x31e   :  { %2418 = vst.msk [vmem:[#allocation4 + $0x10] sm:$0xff] %vm2415_vm11, %v2410_v46  ;;  %v2404_v48 = vadd.f32 %v7484_v14, %v2390_v45  ;;  %v2433_v36 = vld [vmem:[#allocation4 + $0x3] sm:$0x1]  ;;  %v2452_v56 = vld [vmem:[#allocation4 + $0x4] sm:$0x1]  ;;  %v2425_v19 = vmax.f32 %v2423_v12, %v2424_v55 }
 0x31f   :  { %v2373_v18 = vpop.f32.mrb[136].mxu0  ;;  %v2453_v28 = vld [vmem:[#allocation4 + $0x5] sm:$0x1]  ;;  %v2434_v21 = vmax.f32 %v2432_v17, %v2433_v36 }
 0x320   :  { %v2411_v6 = vmax.f32 %v2404_v48, 0.0  ;;  %v2391_v22 = vadd.f32 %v2373_v18, %v2245_v50  ;;  %v5206_v40 = vpop.f32.mrb[137].mxu0  ;;  %v2454_v5 = vmax.f32 %v2452_v56, %v2453_v28 }
 0x321   :  { %v2426_v30 = vld [vmem:[#allocation4 + $0xa] sm:$0x1]  ;;  %v2427_v37 = vld [vmem:[#allocation4 + $0xb] sm:$0x1]  ;;  %v2435_v49 = vld [vmem:[#allocation4 + $0xc] sm:$0x1] }
 0x322   :  { %2419 = vst.msk [vmem:[#allocation4 + $0x18] sm:$0xff] %vm2415_vm11, %v2411_v6  ;;  %v2405_v58 = vadd.f32 %v7484_v14, %v2391_v22  ;;  %v7495_v8 = vpop.f32.mrb[128].mxu1  ;;  %v2436_v32 = vld [vmem:[#allocation4 + $0xd] sm:$0x1]  ;;  %v2455_v34 = vld [vmem:[#allocation4 + $0xe] sm:$0x1]  ;;  %v2428_v0 = vmax.f32 %v2426_v30, %v2427_v37 }
 0x323   :  { %v2378_v7 = vpop.f32.mrb[138].mxu0  ;;  %v5235_v29 = vpop.f32.mrb[129].mxu1  ;;  %v2437_v20 = vmax.f32 %v2435_v49, %v2436_v32  ;;  %v2456_v38 = vld [vmem:[#allocation4 + $0xf] sm:$0x1] }
 0x324   :  { %v2412_v39 = vmax.f32 %v2405_v58, 0.0  ;;  %v2392_v26 = vadd.f32 %v2378_v7, %v2246_v13  ;;  %v5209_v62 = vpop.f32.mrb[139].mxu0  ;;  %v2457_v50 = vmax.f32 %v2455_v34, %v2456_v38  ;;  %v2429_v1 = vmax.f32 %v2425_v19, %v2428_v0 }
 0x325   :  { %v2438_v2 = vmax.f32 %v2434_v21, %v2437_v20  ;;  %v2472_v57 = vld [vmem:[#allocation4 + $0x14] sm:$0x1]  ;;  %v2473_v59 = vld [vmem:[#allocation4 + $0x15] sm:$0x1]  ;;  %v2492_v27 = vld [vmem:[#allocation4 + $0x16] sm:$0x1] }
 0x326   :  { %2420 = vst.msk [vmem:[#allocation4 + $0x20] sm:$0xff] %vm2415_vm11, %v2412_v39  ;;  %v2406_v4 = vadd.f32 %v7484_v14, %v2392_v26  ;;  %v2458_v42 = vmax.f32 %v2454_v5, %v2457_v50  ;;  %v2474_v44 = vmax.f32 %v2472_v57, %v2473_v59  ;;  %v2493_v11 = vld [vmem:[#allocation4 + $0x17] sm:$0x1] }
 0x327   :  { %2431 = vst.msk [vmem:[#allocation5] sm:$0x1] %vm2430_vm12, %v2429_v1  ;;  %v2383_v25 = vpop.f32.mrb[140].mxu0  ;;  %v2446_v41 = vrot.slane %v2438_v2, %v7497_v35  ;;  %v2494_v48 = vmax.f32 %v2492_v27, %v2493_v11 }
 0x328   :  { %v2413_v16 = vmax.f32 %v2406_v4, 0.0  ;;  %v2393_v13 = vadd.f32 %v2383_v25, %v7479_v47  ;;  %v5212_v23 = vpop.f32.mrb[141].mxu0  ;;  %v2466_v61 = vrot.slane %v2458_v42, %v7497_v35 }
 0x329   :  { %2447 = vrot.lane.b32.xlu0 %v2446_v41, %s5714_s27  ;;  %v2475_v24 = vld [vmem:[#allocation4 + $0x1e] sm:$0x1]  ;;  %v2476_v43 = vld [vmem:[#allocation4 + $0x1f] sm:$0x1]  ;;  %v2500_v9 = vld [vmem:[#allocation4 + $0x18] sm:$0x1] }
 0x32a   :  { %2421 = vst.msk [vmem:[#allocation4 + $0x28] sm:$0xff] %vm2415_vm11, %v2413_v16  ;;  %v2407_v54 = vadd.f32 %v7484_v14, %v2393_v13  ;;  %v2477_v15 = vmax.f32 %v2475_v24, %v2476_v43  ;;  %v2501_v52 = vld [vmem:[#allocation4 + $0x19] sm:$0x1] }
 0x32b   :  { %v7507_v60 = vpop.f32.mrb[130].mxu1  ;;  %v2502_v17 = vmax.f32 %v2500_v9, %v2501_v52 }
 0x32c   :  { %v2414_v3 = vmax.f32 %v2407_v54, 0.0  ;;  %v5238_v33 = vpop.f32.mrb[131].mxu1  ;;  %v2478_v47 = vmax.f32 %v2474_v44, %v2477_v15 }
 0x32d   :  { %v2495_v46 = vld [vmem:[#allocation4 + $0x20] sm:$0x1]  ;;  %v2496_v45 = vld [vmem:[#allocation4 + $0x21] sm:$0x1]  ;;  %2467 = vrot.lane.b32.xlu0 %v2466_v61, %s5717_s12  ;;  %v2503_v31 = vld [vmem:[#allocation4 + $0x22] sm:$0x1] }
 0x32e   :  { %2422 = vst.msk [vmem:[#allocation4 + $0x30] sm:$0xff] %vm2415_vm11, %v2414_v3  ;;  %v2486_v12 = vrot.slane %v2478_v47, %v7497_v35  ;;  %v2504_v55 = vld [vmem:[#allocation4 + $0x23] sm:$0x1]  ;;  %v2497_v18 = vmax.f32 %v2495_v46, %v2496_v45 }
 0x32f   :  { %v2505_v36 = vmax.f32 %v2503_v31, %v2504_v55 }
 0x330   :  { %v2498_v51 = vmax.f32 %v2494_v48, %v2497_v18 }
 0x331   :  { %2487 = vrot.lane.b32.xlu0 %v2486_v12, %s5719_s4  ;;  %v2506_v63 = vmax.f32 %v2502_v17, %v2505_v36  ;;  %v2519_v6 = vld [vmem:[#allocation4 + $0x28] sm:$0x1]  ;;  %v2520_v22 = vld [vmem:[#allocation4 + $0x29] sm:$0x1]  ;;  %v2538_v28 = vld [vmem:[#allocation4 + $0x2a] sm:$0x1] }
 0x332   :  { %2499 = vst.msk [vmem:[#allocation5 + $0x2] sm:$0x1] %vm2430_vm12, %v2498_v51  ;;  %v2539_v30 = vld [vmem:[#allocation4 + $0x2b] sm:$0x1]  ;;  %v2557_v49 = vld [vmem:[#allocation4 + $0x2c] sm:$0x1]  ;;  %v2521_v0 = vmax.f32 %v2519_v6, %v2520_v22 }
 0x333   :  { %v3008_v40 = vpop.f32.mrb[132].mxu1  ;;  %v2514_v56 = vrot.slane %v2506_v63, %v7497_v35  ;;  %v2558_v58 = vld [vmem:[#allocation4 + $0x2d] sm:$0x1]  ;;  %v2540_v50 = vmax.f32 %v2538_v28, %v2539_v30 }
 0x334   :  { %v5241_v37 = vpop.f32.mrb[133].mxu1  ;;  %v2559_v39 = vmax.f32 %v2557_v49, %v2558_v58 }
 0x335   :  { %2515 = vrot.lane.b32.xlu1 %v2514_v56, %s5714_s27  ;;  %v2522_v32 = vld [vmem:[#allocation4 + $0x32] sm:$0x1]  ;;  %v2523_v34 = vld [vmem:[#allocation4 + $0x33] sm:$0x1]  ;;  %v2541_v19 = vld [vmem:[#allocation4 + $0x34] sm:$0x1] }
 0x336   :  { %v2524_v7 = vmax.f32 %v2522_v32, %v2523_v34  ;;  %v2542_v29 = vld [vmem:[#allocation4 + $0x35] sm:$0x1]  ;;  %v2560_v21 = vld [vmem:[#allocation4 + $0x36] sm:$0x1]  ;;  %v2561_v20 = vld [vmem:[#allocation4 + $0x37] sm:$0x1] }
 0x337   :  { %v2543_v38 = vmax.f32 %v2541_v19, %v2542_v29  ;;  %v2562_v26 = vmax.f32 %v2560_v21, %v2561_v20 }
 0x338   :  { %v2525_v62 = vmax.f32 %v2521_v0, %v2524_v7 }
 0x339   :  { %v2563_v1 = vmax.f32 %v2559_v39, %v2562_v26  ;;  %v2544_v5 = vmax.f32 %v2540_v50, %v2543_v38 }
 0x33a   :  { %v2533_v2 = vrot.slane %v2525_v62, %v7497_v35 }
 0x33b   :  { %v3013_v4 = vpop.f32.mrb[134].mxu1  ;;  %2564 = vst.msk [vmem:[#allocation5 + $0x4] sm:$0x1] %vm2430_vm12, %v2563_v1  ;;  %v2552_v41 = vrot.slane %v2544_v5, %v7497_v35 }
 0x33c   :  { %v5244_v25 = vpop.f32.mrb[135].mxu1  ;;  %2534 = vrot.lane.b32.xlu1 %v2533_v2, %s5717_s12 }
 0x340   :  { %2553 = vrot.lane.b32.xlu1 %v2552_v41, %s5719_s4 }
 0x344   :  { %v3018_v42 = vpop.f32.mrb[136].mxu1 }
 0x345   :  { %v5247_v57 = vpop.f32.mrb[137].mxu1 }
 0x34a   :  { %v3023_v59 = vpop.f32.mrb[138].mxu1 }
 0x34b   :  { %v5250_v16 = vpop.f32.mrb[139].mxu1 }
 0x34e   :  { %v3028_v13 = vpop.f32.mrb[140].mxu1 }
 0x34f   :  { %v5253_v23 = vpop.f32.mrb[141].mxu1  ;;  %v3119_v24 = vpop.f32.mrb[142].mxu0 }
 0x350   :  { %v3120_v43 = vadd.f32 %v3119_v24, %v7495_v8  ;;  %v5276_v54 = vpop.f32.mrb[143].mxu0 }
 0x352   :  { %v3257_v44 = vpop.f32.mrb[142].mxu1 }
 0x353   :  { %v3291_v15 = vadd.f32 %v3257_v44, %v3120_v43  ;;  %v5317_v27 = vpop.f32.mrb[143].mxu1 }
 0x354   :  { %v3124_v11 = vpop.f32.mrb[144].mxu0 }
 0x355   :  { %v3125_v61 = vadd.f32 %v3124_v11, %v7507_v60  ;;  %v5279_v3 = vpop.f32.mrb[145].mxu0 }
 0x356   :  { %v3262_v33 = vpop.f32.mrb[144].mxu1 }
 0x357   :  { %v3292_v47 = vadd.f32 %v3262_v33, %v3125_v61  ;;  %v5320_v9 = vpop.f32.mrb[145].mxu1 }
 0x358   :  { %v3129_v52 = vpop.f32.mrb[146].mxu0 }
 0x359   :  { %v3130_v46 = vadd.f32 %v3129_v52, %v3008_v40  ;;  %v5282_v45 = vpop.f32.mrb[147].mxu0 }
 0x35a   :  { %v3267_v31 = vpop.f32.mrb[146].mxu1 }
 0x35b   :  { %v3293_v12 = vadd.f32 %v3267_v31, %v3130_v46  ;;  %v5323_v55 = vpop.f32.mrb[147].mxu1 }
 0x35c   :  { %v3134_v48 = vpop.f32.mrb[148].mxu0 }
 0x35d   :  { %v3135_v18 = vadd.f32 %v3134_v48, %v3013_v4  ;;  %v5285_v8 = vpop.f32.mrb[149].mxu0 }
 0x35e   :  { %v3272_v17 = vpop.f32.mrb[148].mxu1 }
 0x35f   :  { %v3294_v36 = vadd.f32 %v3272_v17, %v3135_v18  ;;  %v5326_v51 = vpop.f32.mrb[149].mxu1  ;;  %v3771_v17 = vld [vmem:[%s7723_s5 + $0x80] sm:$0xff] }
 0x360   :  { %v3139_v63 = vpop.f32.mrb[150].mxu0 }
 0x361   :  { %v3140_v6 = vadd.f32 %v3139_v63, %v3018_v42  ;;  %v5288_v22 = vpop.f32.mrb[151].mxu0 }
 0x362   :  { %v3277_v60 = vpop.f32.mrb[150].mxu1 }
 0x363   :  { %v3295_v56 = vadd.f32 %v3277_v60, %v3140_v6  ;;  %v5329_v28 = vpop.f32.mrb[151].mxu1  ;;  %v3772_v60 = vld [vmem:[%s7723_s5 + $0x88] sm:$0xff] }
 0x364   :  { %v3144_v30 = vpop.f32.mrb[152].mxu0  ;;  %v3756_v28 = vld [vmem:[%s7723_s5 + $0x8] sm:$0xff] }
 0x365   :  { %v3145_v37 = vadd.f32 %v3144_v30, %v3023_v59  ;;  %v5291_v49 = vpop.f32.mrb[153].mxu0 }
 0x366   :  { %v3282_v40 = vpop.f32.mrb[152].mxu1 }
 0x367   :  { %v7524_v58 = vadd.f32 %v3282_v40, %v3145_v37  ;;  %v5332_v32 = vpop.f32.mrb[153].mxu1  ;;  %v5630_v40 = vpack.c.bf16 %v3772_v60, %v3771_v17 }
 0x368   :  { %v3149_v34 = vpop.f32.mrb[154].mxu0 }
 0x369   :  { %v3150_v19 = vadd.f32 %v3149_v34, %v3028_v13  ;;  %v5294_v0 = vpop.f32.mrb[155].mxu0  ;;  %5631 = vmatprep.subr.bf16.mxu0 %v5630_v40 }
 0x36a   :  { %v3287_v7 = vpop.f32.mrb[154].mxu1 }
 0x36b   :  { %v7526_v29 = vadd.f32 %v3287_v7, %v3150_v19  ;;  %v5335_v21 = vpop.f32.mrb[155].mxu1 }
 0x36c   :  { %v3402_v20 = vpop.f32.mrb[156].mxu0 }
 0x36d   :  { %v3436_v38 = vadd.f32 %v3402_v20, %v3291_v15  ;;  %v5358_v39 = vpop.f32.mrb[157].mxu0 }
 0x36e   :  { %v3547_v26 = vpop.f32.mrb[156].mxu1 }
 0x36f   :  { %v3581_v62 = vadd.f32 %v3547_v26, %v3436_v38  ;;  %v5399_v50 = vpop.f32.mrb[157].mxu1 }
 0x370   :  { %v3407_v1 = vpop.f32.mrb[158].mxu0 }
 0x371   :  { %v3595_v2 = vadd.f32 %v7484_v14, %v3581_v62  ;;  %v3437_v5 = vadd.f32 %v3407_v1, %v3292_v47  ;;  %v5361_v4 = vpop.f32.mrb[159].mxu0 }
 0x372   :  { %v3552_v25 = vpop.f32.mrb[158].mxu1 }
 0x373   :  { %v3602_v41 = vmax.f32 %v3595_v2, 0.0  ;;  %v3582_v42 = vadd.f32 %v3552_v25, %v3437_v5  ;;  %v5402_v57 = vpop.f32.mrb[159].mxu1  ;;  %v3773_v2 = vld [vmem:[%s7723_s5 + $0x90] sm:$0xff] }
 0x374   :  { %v3412_v59 = vpop.f32.mrb[160].mxu0  ;;  %v3757_v57 = vld [vmem:[%s7723_s5 + $0x10] sm:$0xff] }
 0x375   :  { %3609 = vst.msk [vmem:[#allocation4] sm:$0xff] %vm2415_vm11, %v3602_v41  ;;  %v3596_v16 = vadd.f32 %v7484_v14, %v3582_v42  ;;  %v3438_v13 = vadd.f32 %v3412_v59, %v3293_v12  ;;  %v5364_v23 = vpop.f32.mrb[161].mxu0  ;;  %v3774_v42 = vld [vmem:[%s7723_s5 + $0x98] sm:$0xff] }
 0x376   :  { %v3557_v24 = vpop.f32.mrb[160].mxu1  ;;  %v3758_v59 = vld [vmem:[%s7723_s5 + $0x18] sm:$0xff]  ;;  %v5634_v23 = vpack.c.bf16 %v3774_v42, %v3773_v2 }
 0x377   :  { %v3603_v43 = vmax.f32 %v3596_v16, 0.0  ;;  %v3583_v54 = vadd.f32 %v3557_v24, %v3438_v13  ;;  %v5405_v44 = vpop.f32.mrb[161].mxu1  ;;  %v5636_v24 = vpack.c.bf16 %v3758_v59, %v3757_v57 }
 0x378   :  { %v3417_v15 = vpop.f32.mrb[162].mxu0 }
 0x379   :  { %3610 = vst.msk [vmem:[#allocation4 + $0x8] sm:$0xff] %vm2415_vm11, %v3603_v43  ;;  %v3597_v27 = vadd.f32 %v7484_v14, %v3583_v54  ;;  %v3439_v11 = vadd.f32 %v3417_v15, %v3294_v36  ;;  %v5367_v61 = vpop.f32.mrb[163].mxu0 }
 0x37a   :  { %v3562_v3 = vpop.f32.mrb[162].mxu1 }
 0x37b   :  { %v3604_v33 = vmax.f32 %v3597_v27, 0.0  ;;  %v3584_v47 = vadd.f32 %v3562_v3, %v3439_v11  ;;  %v5408_v9 = vpop.f32.mrb[163].mxu1 }
 0x37c   :  { %v3422_v52 = vpop.f32.mrb[164].mxu0  ;;  %v3624_v12 = vld [vmem:[#allocation4 + $0x2] sm:$0x1]  ;;  %v3625_v55 = vld [vmem:[#allocation4 + $0x3] sm:$0x1] }
 0x37d   :  { %3611 = vst.msk [vmem:[#allocation4 + $0x10] sm:$0xff] %vm2415_vm11, %v3604_v33  ;;  %v3598_v46 = vadd.f32 %v7484_v14, %v3584_v47  ;;  %v3440_v45 = vadd.f32 %v3422_v52, %v3295_v56  ;;  %v5370_v31 = vpop.f32.mrb[165].mxu0  ;;  %v3643_v18 = vld [vmem:[#allocation4 + $0x4] sm:$0x1]  ;;  %v3644_v8 = vld [vmem:[#allocation4 + $0x5] sm:$0x1]  ;;  %v3626_v7 = vmax.f32 %v3624_v12, %v3625_v55 }
 0x37e   :  { %v3567_v48 = vpop.f32.mrb[164].mxu1  ;;  %v3616_v6 = vld [vmem:[#allocation4] sm:$0x1]  ;;  %v3617_v22 = vld [vmem:[#allocation4 + $0x1] sm:$0x1]  ;;  %v3755_v56 = vld [vmem:[%s7723_s5] sm:$0xff]  ;;  %v3645_v26 = vmax.f32 %v3643_v18, %v3644_v8 }
 0x37f   :  { %v3605_v36 = vmax.f32 %v3598_v46, 0.0  ;;  %v3585_v51 = vadd.f32 %v3567_v48, %v3440_v45  ;;  %v5411_v63 = vpop.f32.mrb[165].mxu1  ;;  %v5632_v32 = vpack.c.bf16 %v3756_v28, %v3755_v56  ;;  %v3618_v13 = vmax.f32 %v3616_v6, %v3617_v22  ;;  %v3775_v47 = vld [vmem:[%s7723_s5 + $0xa0] sm:$0xff]  ;;  %v3776_v9 = vld [vmem:[%s7723_s5 + $0xa8] sm:$0xff]  ;;  %v3777_v56 = vld [vmem:[%s7723_s5 + $0xb0] sm:$0xff] }
 0x380   :  { %v3427_v30 = vpop.f32.mrb[166].mxu0  ;;  %v3627_v37 = vld [vmem:[#allocation4 + $0xc] sm:$0x1]  ;;  %v3628_v49 = vld [vmem:[#allocation4 + $0xd] sm:$0x1]  ;;  %v5638_v31 = vpack.c.bf16 %v3776_v9, %v3775_v47  ;;  %v3760_v12 = vld [vmem:[%s7723_s5 + $0x28] sm:$0xff] }
 0x381   :  { %3612 = vst.msk [vmem:[#allocation4 + $0x18] sm:$0xff] %vm2415_vm11, %v3605_v36  ;;  %v3599_v34 = vadd.f32 %v7484_v14, %v3585_v51  ;;  %v3441_v19 = vadd.f32 %v3427_v30, %v7524_v58  ;;  %v5373_v0 = vpop.f32.mrb[167].mxu0  ;;  %v3629_v21 = vmax.f32 %v3627_v37, %v3628_v49  ;;  %v3646_v20 = vld [vmem:[#allocation4 + $0xe] sm:$0x1]  ;;  %v3647_v38 = vld [vmem:[#allocation4 + $0xf] sm:$0x1]  ;;  %5633 = vmatpush3.bf16.msra.mxu0 %v5632_v32 }
 0x382   :  { %v3572_v39 = vpop.f32.mrb[166].mxu1  ;;  %v3648_v62 = vmax.f32 %v3646_v20, %v3647_v38  ;;  %v3619_v50 = vld [vmem:[#allocation4 + $0xa] sm:$0x1]  ;;  %v3620_v1 = vld [vmem:[#allocation4 + $0xb] sm:$0x1]  ;;  %5635 = vmatprep.subr.bf16.mxu0 %v5634_v23  ;;  %v3787_v55 = vld [vmem:[%s7723_s5 + $0x100] sm:$0xff] }
 0x383   :  { %v3606_v5 = vmax.f32 %v3599_v34, 0.0  ;;  %v3586_v4 = vadd.f32 %v3572_v39, %v3441_v19  ;;  %v5414_v25 = vpop.f32.mrb[167].mxu1  ;;  %v3630_v41 = vmax.f32 %v3626_v7, %v3629_v21  ;;  %v3621_v58 = vmax.f32 %v3619_v50, %v3620_v1  ;;  %v3788_v48 = vld [vmem:[%s7723_s5 + $0x108] sm:$0xff]  ;;  %v3778_v28 = vld [vmem:[%s7723_s5 + $0xb8] sm:$0xff] }
 0x384   :  { %v3432_v16 = vpop.f32.mrb[168].mxu0  ;;  %v3649_v27 = vmax.f32 %v3645_v26, %v3648_v62  ;;  %v3662_v11 = vld [vmem:[#allocation4 + $0x14] sm:$0x1]  ;;  %v3663_v61 = vld [vmem:[#allocation4 + $0x15] sm:$0x1]  ;;  %v5663_v36 = vpack.c.bf16 %v3788_v48, %v3787_v55  ;;  %v5642_v37 = vpack.c.bf16 %v3778_v28, %v3777_v56  ;;  %v3764_v23 = vld [vmem:[%s7723_s5 + $0x48] sm:$0xff] }
 0x385   :  { %3613 = vst.msk [vmem:[#allocation4 + $0x20] sm:$0xff] %vm2415_vm11, %v3606_v5  ;;  %v3600_v43 = vadd.f32 %v7484_v14, %v3586_v4  ;;  %v3442_v54 = vadd.f32 %v3432_v16, %v7526_v29  ;;  %v5376_v44 = vpop.f32.mrb[169].mxu0  ;;  %v3638_v15 = vrot.slane %v3630_v41, %v7497_v35  ;;  %v3622_v33 = vmax.f32 %v3618_v13, %v3621_v58  ;;  %v3759_v29 = vld [vmem:[%s7723_s5 + $0x20] sm:$0xff]  ;;  %v3762_v49 = vld [vmem:[%s7723_s5 + $0x38] sm:$0xff]  ;;  %v3780_v4 = vld [vmem:[%s7723_s5 + $0xc8] sm:$0xff] }
 0x386   :  { %v3577_v3 = vpop.f32.mrb[168].mxu1  ;;  %5637 = vmatpush3.bf16.msra.mxu0 %v5636_v24  ;;  %v5640_v17 = vpack.c.bf16 %v3760_v12, %v3759_v29  ;;  %v3657_v63 = vrot.slane %v3649_v27, %v7497_v35  ;;  %v3664_v6 = vmax.f32 %v3662_v11, %v3663_v61  ;;  %5664 = vmatpush3.bf16.msra.mxu1 %v5663_v36  ;;  %v3681_v34 = vld [vmem:[#allocation4 + $0x16] sm:$0x1]  ;;  %v3682_v19 = vld [vmem:[#allocation4 + $0x17] sm:$0x1]  ;;  %v3779_v5 = vld [vmem:[%s7723_s5 + $0xc0] sm:$0xff] }
 0x387   :  { %v3607_v52 = vmax.f32 %v3600_v43, 0.0  ;;  %v3587_v46 = vadd.f32 %v3577_v3, %v3442_v54  ;;  %v5417_v45 = vpop.f32.mrb[169].mxu1  ;;  %3639 = vrot.lane.b32.xlu0 %v3638_v15, %s5714_s27  ;;  %3623 = vst.msk [vmem:[#allocation5 + $0x1] sm:$0x1] %vm2430_vm12, %v3622_v33  ;;  %5639 = vmatprep.subr.bf16.mxu0 %v5638_v31  ;;  %v3683_v50 = vmax.f32 %v3681_v34, %v3682_v19  ;;  %v3763_v58 = vld [vmem:[%s7723_s5 + $0x40] sm:$0xff]  ;;  %v3781_v44 = vld [vmem:[%s7723_s5 + $0xd0] sm:$0xff] }
 0x388   :  { %v3665_v18 = vld [vmem:[#allocation4 + $0x1e] sm:$0x1]  ;;  %v3666_v8 = vld [vmem:[#allocation4 + $0x1f] sm:$0x1]  ;;  %v3689_v60 = vld [vmem:[#allocation4 + $0x18] sm:$0x1]  ;;  %5665 = vmatprep.subr.bf16.mxu1 %v7736_v53  ;;  %v5646_v41 = vpack.c.bf16 %v3780_v4, %v3779_v5  ;;  %v5648_v54 = vpack.c.bf16 %v3764_v23, %v3763_v58 }
 0x389   :  { %v3601_v51 = vadd.f32 %v7484_v14, %v3587_v46  ;;  %v3667_v22 = vmax.f32 %v3665_v18, %v3666_v8  ;;  %3614 = vst.msk [vmem:[#allocation4 + $0x28] sm:$0xff] %vm2415_vm11, %v3607_v52  ;;  %v3690_v30 = vld [vmem:[#allocation4 + $0x19] sm:$0x1]  ;;  %v3761_v14 = vld [vmem:[%s7723_s5 + $0x30] sm:$0xff]  ;;  %v3782_v15 = vld [vmem:[%s7723_s5 + $0xd8] sm:$0xff] }
 0x38a   :  { %5641 = vmatpush3.bf16.msra.mxu0 %v5640_v17  ;;  %v5644_v0 = vpack.c.bf16 %v3762_v49, %v3761_v14  ;;  %v3691_v39 = vmax.f32 %v3689_v60, %v3690_v30  ;;  %v3765_v27 = vld [vmem:[%s7723_s5 + $0x50] sm:$0xff]  ;;  %v5650_v33 = vpack.c.bf16 %v3782_v15, %v3781_v44  ;;  %v3766_v55 = vld [vmem:[%s7723_s5 + $0x58] sm:$0xff]  ;;  %v3783_v48 = vld [vmem:[%s7723_s5 + $0xe0] sm:$0xff] }
 0x38b   :  { %v3608_v40 = vmax.f32 %v3601_v51, 0.0  ;;  %3658 = vrot.lane.b32.xlu0 %v3657_v63, %s5717_s12  ;;  %v3668_v32 = vmax.f32 %v3664_v6, %v3667_v22  ;;  %5643 = vmatprep.subr.bf16.mxu0 %v5642_v37  ;;  %v3784_v18 = vld [vmem:[%s7723_s5 + $0xe8] sm:$0xff]  ;;  %v5652_v17 = vpack.c.bf16 %v3766_v55, %v3765_v27  ;;  %v3789_v51 = vld [vmem:[%s7723_s5 + $0x110] sm:$0xff]  ;;  %v3790_v63 = vld [vmem:[%s7723_s5 + $0x118] sm:$0xff] }
 0x38c   :  { %v3692_v7 = vld [vmem:[#allocation4 + $0x22] sm:$0x1]  ;;  %v3693_v21 = vld [vmem:[#allocation4 + $0x23] sm:$0x1]  ;;  %v3684_v20 = vld [vmem:[#allocation4 + $0x20] sm:$0x1]  ;;  %v5654_v36 = vpack.c.bf16 %v3784_v18, %v3783_v48  ;;  %v5666_v56 = vpack.c.bf16 %v3790_v63, %v3789_v51 }
 0x38d   :  { %v3676_v38 = vrot.slane %v3668_v32, %v7497_v35  ;;  %v3694_v26 = vmax.f32 %v3692_v7, %v3693_v21  ;;  %3615 = vst.msk [vmem:[#allocation4 + $0x30] sm:$0xff] %vm2415_vm11, %v3608_v40  ;;  %v3685_v62 = vld [vmem:[#allocation4 + $0x21] sm:$0x1]  ;;  %v3767_v6 = vld [vmem:[%s7723_s5 + $0x60] sm:$0xff]  ;;  %v3785_v30 = vld [vmem:[%s7723_s5 + $0xf0] sm:$0xff] }
 0x38e   :  { %v3686_v1 = vmax.f32 %v3684_v20, %v3685_v62  ;;  %5645 = vmatpush3.bf16.msra.mxu0 %v5644_v0  ;;  %v3768_v28 = vld [vmem:[%s7723_s5 + $0x68] sm:$0xff]  ;;  %v3786_v37 = vld [vmem:[%s7723_s5 + $0xf8] sm:$0xff]  ;;  %5667 = vmatpush3.bf16.msra.mxu1 %v5666_v56  ;;  %v3769_v34 = vld [vmem:[%s7723_s5 + $0x70] sm:$0xff] }
 0x38f   :  { %3677 = vrot.lane.b32.xlu0 %v3676_v38, %s5719_s4  ;;  %v3695_v2 = vmax.f32 %v3691_v39, %v3694_v26  ;;  %5647 = vmatprep.subr.bf16.mxu0 %v5646_v41  ;;  %v5656_v14 = vpack.c.bf16 %v3768_v28, %v3767_v6  ;;  %v5658_v32 = vpack.c.bf16 %v3786_v37, %v3785_v30  ;;  %v3770_v19 = vld [vmem:[%s7723_s5 + $0x78] sm:$0xff]  ;;  %v4317_v15 = vld [vmem:[%s7724_s6] ss:$0 sm:$0xff] }
 0x390   :  { %v3687_v25 = vmax.f32 %v3683_v50, %v3686_v1  ;;  %v3746_v57 = vld [vmem:[#allocation4 + $0x2c] sm:$0x1]  ;;  %v3747_v59 = vld [vmem:[#allocation4 + $0x2d] sm:$0x1]  ;;  %v3708_v16 = vld [vmem:[#allocation4 + $0x28] sm:$0x1]  ;;  %5668 = vmatprep.subr.bf16.mxu1 %v7736_v53  ;;  %v5660_v7 = vpack.c.bf16 %v3770_v19, %v3769_v34 }
 0x391   :  { %v3703_v42 = vrot.slane %v3695_v2, %v7497_v35  ;;  %v3709_v13 = vld [vmem:[#allocation4 + $0x29] sm:$0x1]  ;;  %v3727_v24 = vld [vmem:[#allocation4 + $0x2a] sm:$0x1]  ;;  %v3728_v43 = vld [vmem:[#allocation4 + $0x2b] sm:$0x1]  ;;  %v3748_v47 = vmax.f32 %v3746_v57, %v3747_v59 }
 0x392   :  { %3688 = vst.msk [vmem:[#allocation5 + $0x3] sm:$0x1] %vm2430_vm12, %v3687_v25  ;;  %5649 = vmatpush3.bf16.msra.mxu0 %v5648_v54  ;;  %v3710_v45 = vmax.f32 %v3708_v16, %v3709_v13  ;;  %v3729_v60 = vmax.f32 %v3727_v24, %v3728_v43  ;;  %v3960_v16 = vld [vmem:[%s7725_s7] sm:$0xff]  ;;  %v3961_v13 = vld [vmem:[%s7725_s7 + $0x8] sm:$0xff] }
 0x393   :  { %3704 = vrot.lane.b32.xlu1 %v3703_v42, %s5714_s27  ;;  %5651 = vmatprep.subr.bf16.mxu0 %v5650_v33  ;;  %v5669_v23 = vpack.c.bf16 %v3961_v13, %v3960_v16  ;;  %v4319_v33 = vld [vmem:[%s7726_s8] ss:$0 sm:$0xff] }
 0x394   :  { %v3749_v11 = vld [vmem:[#allocation4 + $0x36] sm:$0x1]  ;;  %v3750_v61 = vld [vmem:[#allocation4 + $0x37] sm:$0x1]  ;;  %v3711_v3 = vld [vmem:[#allocation4 + $0x32] sm:$0x1] }
 0x395   :  { %v3751_v9 = vmax.f32 %v3749_v11, %v3750_v61  ;;  %v3712_v29 = vld [vmem:[#allocation4 + $0x33] sm:$0x1]  ;;  %v3730_v52 = vld [vmem:[#allocation4 + $0x34] sm:$0x1]  ;;  %v3731_v46 = vld [vmem:[#allocation4 + $0x35] sm:$0x1] }
 0x396   :  { %v3713_v31 = vmax.f32 %v3711_v3, %v3712_v29  ;;  %v3732_v12 = vmax.f32 %v3730_v52, %v3731_v46  ;;  %5653 = vmatpush3.bf16.msra.mxu0 %v5652_v17 }
 0x397   :  { %v3752_v8 = vmax.f32 %v3748_v47, %v3751_v9  ;;  %5655 = vmatprep.subr.bf16.mxu0 %v5654_v36 }
 0x398   :  { %v3714_v22 = vmax.f32 %v3710_v45, %v3713_v31  ;;  %v3733_v40 = vmax.f32 %v3729_v60, %v3732_v12 }
 0x399   :  { %3753 = vst.msk [vmem:[#allocation5 + $0x5] sm:$0x1] %vm2430_vm12, %v3752_v8 }
 0x39a   :  { %v3722_v49 = vrot.slane %v3714_v22, %v7497_v35  ;;  %5657 = vmatpush3.bf16.msra.mxu0 %v5656_v14  ;;  %v3741_v21 = vrot.slane %v3733_v40, %v7497_v35 }
 0x39b   :  { %v2448_v0 = vpop.permute.xlu0 %2447  ;;  %5659 = vmatprep.subr.bf16.mxu0 %v5658_v32 }
 0x39c   :  { %2451 = vst.msk [vmem:[#allocation5] sm:$0x1] %vm2450_vm13, %v2448_v0  ;;  %3723 = vrot.lane.b32.xlu1 %v3722_v49, %s5717_s12 }
 0x39e   :  { %5661 = vmatpush3.bf16.msra.mxu0 %v5660_v7 }
 0x39f   :  { %v2468_v20 = vpop.permute.xlu0 %2467 }
 0x3a0   :  { %2471 = vst.msk [vmem:[#allocation5] sm:$0x1] %vm2470_vm14, %v2468_v20  ;;  %3742 = vrot.lane.b32.xlu1 %v3741_v21, %s5719_s4 }
 0x3a3   :  { %v2488_v38 = vpop.permute.xlu0 %2487 }
 0x3a4   :  { %2491 = vst.msk [vmem:[#allocation5] sm:$0x1] %vm2490_vm15, %v2488_v38 }
 0x3a7   :  { %v2516_v39 = vpop.permute.xlu1 %2515 }
 0x3a8   :  { %2518 = vst.msk [vmem:[#allocation5 + $0x2] sm:$0x1] %vm2450_vm13, %v2516_v39 }
 0x3ae   :  { %v2535_v26 = vpop.permute.xlu1 %2534 }
 0x3af   :  { %2537 = vst.msk [vmem:[#allocation5 + $0x2] sm:$0x1] %vm2470_vm14, %v2535_v26 }
 0x3b2   :  { %v2554_v62 = vpop.permute.xlu1 %2553 }
 0x3b3   :  { %2556 = vst.msk [vmem:[#allocation5 + $0x2] sm:$0x1] %vm2490_vm15, %v2554_v62 }
 0x3f9   :  { %v3640_v50 = vpop.permute.xlu0 %3639 }
 0x3fa   :  { %3642 = vst.msk [vmem:[#allocation5 + $0x1] sm:$0x1] %vm2450_vm13, %v3640_v50 }
 0x3fd   :  { %v3659_v1 = vpop.permute.xlu0 %3658 }
 0x3fe   :  { %3661 = vst.msk [vmem:[#allocation5 + $0x1] sm:$0x1] %vm2470_vm14, %v3659_v1 }
 0x401   :  { %v3678_v2 = vpop.permute.xlu0 %3677 }
 0x402   :  { %3680 = vst.msk [vmem:[#allocation5 + $0x1] sm:$0x1] %vm2490_vm15, %v3678_v2 }
 0x405   :  { %v3705_v5 = vpop.permute.xlu1 %3704 }
 0x406   :  { %3707 = vst.msk [vmem:[#allocation5 + $0x3] sm:$0x1] %vm2450_vm13, %v3705_v5 }
 0x40e   :  { %v3724_v4 = vpop.permute.xlu1 %3723 }
 0x40f   :  { %3726 = vst.msk [vmem:[#allocation5 + $0x3] sm:$0x1] %vm2470_vm14, %v3724_v4 }
 0x412   :  { %v3743_v25 = vpop.permute.xlu1 %3742 }
 0x413   :  { %3745 = vst.msk [vmem:[#allocation5 + $0x3] sm:$0x1] %vm2490_vm15, %v3743_v25 }
 0x41a   :  { %v3754_v41 = vld [vmem:[#allocation5] sm:$0x3f] }
 0x41b   :  { %v3799_v58 = vcombine.high %v3754_v41, %v3754_v41  ;;  %v3806_v42 = vrot.slane %v3754_v41, %v7497_v35 }
 0x41d   :  { %v3813_v57 = vrot.slane %v3799_v58, %v7497_v35  ;;  %v3814_v59 = vcombine.high %v3806_v42, %v3806_v42  ;;  %v3962_v35 = vld [vmem:[%s7725_s7 + $0x10] sm:$0xff] }
 0x41f   :  { %3883 = vmatprep.mubr.f32.mxu0 %v3814_v59  ;;  %5427 = vmatmul.mubr.msk.f32.vlgmr.msra.gmra.mrb[170].mxu1 %vm2415_vm11, %v3813_v57 }
 0x420   :  { %3884 = vmatmul.mubr.f32.vlgmr.msra.gmra.mrb[170].mxu0 %v3806_v42  ;;  %5437 = vmatprep.mubr.msk.f32.mxu1 %vm5711_vm0, %v7759_v10  ;;  %v3963_v10 = vld [vmem:[%s7725_s7 + $0x18] sm:$0xff]  ;;  %s5720_s7 = smov [#allocation6]   ;;  %vm4044_vm0 = vcmask 17408  }
 0x421   :  { %5670 = vmatpush3.bf16.msra.mxu1 %v5669_v23  ;;  %v5672_v24 = vpack.c.bf16 %v3963_v10, %v3962_v35  ;;  %s4052_s24 = sshll.u32 %s5720_s7, 4  ;;  %s4053_s24 = int_to_ptr.vmem [resolvable:$true] %s4052_s24 }
 0x422   :  { %5671 = vmatprep.subr.bf16.mxu1 %v7736_v53  ;;  %s5686_s6 = scalar_lea.vmem %s4053_s24, 32  ;;  %p5691_p1 = scmp.lt.s32.totalorder %s4053_s24, %s4053_s24 }
 0x423   :  { %p5687_p0 = scmp.ne.s32.totalorder %s4053_s24, %s5686_s6  ;;  %p5692_p2 = scmp.lt.s32.totalorder %s5686_s6, %s5686_s6 }
 0x425   :  { %5673 = vmatpush3.bf16.msra.mxu1 %v5672_v24  ;;  %p5693_p3 = por %p5692_p2, %p5691_p1 }
 0x427   :  { %p5694_p4 = pnand %p5693_p3, %p5687_p0 }
 0x4f2   :  { %v3955_v43 = vpop.f32.mrb[170].mxu1 }
 0x4f3   :  { %v4647_v54 = vpop.f32.mrb[170].mxu0  ;;  %v5428_v44 = vpop.f32.mrb[171].mxu1 }
 0x4f4   :  { %v4648_v27 = vpop.f32.mrb[171].mxu0 }
 0x4f5   :  { %v4649_v11 = vadd.f32 %v4648_v27, %v4647_v54 }
 0x4f7   :  { %v3886_v53 = vadd.f32 %v4649_v11, %v4317_v15 }
 0x4f9   :  { %v3956_v61 = vadd.f32 %v3955_v43, %v3886_v53 }
 0x4fb   :  { %v3959_v3 = vmax.f32 %v3956_v61, 0.0 }
 0x4fd   :  { %5438 = vmatmul.mubr.msk.f32.vlgmr.msra.gmra.mrb[172].mxu1 %vm2415_vm11, %v3959_v3 }
 0x5d0   :  { %v4040_v47 = vpop.f32.mrb[172].mxu1 }
 0x5d1   :  { %v4041_v9 = vadd.f32 %v4319_v33, %v4040_v47  ;;  %v5439_v29 = vpop.f32.mrb[173].mxu1 }
 0x5d3   :  { %4045 = vst.msk [vmem:[#allocation6] sm:$0x3] %vm4044_vm0, %v4041_v9 }
 0x5d4   :  { %5697 = shalt.err (!%p5694_p4)
}
 0x5d5   :  { %s5698_s30 = scalar_lea.hbm %s7727_s9, 32 }
 0x5d6   :  { %p5699_p5 = scmp.ne.s32.totalorder %s7727_s9, %s5698_s30  ;;  %p5702_p6 = scmp.lt.u32.totalorder %s5698_s30, %s7727_s9 }
 0x5d8   :  { %p5704_p7 = pnand %p5702_p6, %p5699_p5 }
 0x5da   :  { %5707 = shalt.err (!%p5704_p7)
}
 0x5db   :  { %4055 = dma.vmem_to_hbm [thread:$0]  %s4053_s24, 32, %s7727_s9, [#allocation7]  }
 0x5dc   :  { %5708 = dma.done.wait [#allocation7], 32  }
 0x5dd   :  { %5709 = vsyncadd [#allocation7], 4294967264 }
 0x5de   :  { %4059 = vsyncpa [#allocation7], 1 }

</bundles_post_ra>
